<compile_context>
chip_gen: v5e
topology: v5e:2x2
jax: 0.10.0
libtpu: 0.0.40
codegen_flags: <defaults>
</compile_context>

<pallas_src>
import math

import jax
import jax.numpy as jnp
from jax.experimental import pallas as pl
from jax.experimental.pallas import tpu as pltpu


def _round_up(n, m):
    return ((n + m - 1) // m) * m


# ---------------------------------------------------------------------------
# Fused Pallas kernel: whole FCNet forward.  w1 / x / biases / BN params are
# VMEM-resident (auto-DMA); w2..w5 are streamed from HBM with double buffering.
# ---------------------------------------------------------------------------
def _fcnet_kernel(x_ref, mean_ref, istd_ref,
                  w1_ref, b1_ref,
                  w2_hbm, b2_ref, g2_ref, bt2_ref,
                  w3_hbm, b3_ref, g3_ref, bt3_ref,
                  w4_hbm, b4_ref, g4_ref, bt4_ref,
                  w5_hbm, b5_ref,
                  o_ref,
                  wbuf, w5buf, wsem, w5sem):
    mxu_dtype = w1_ref.dtype                  # bf16 (or f32) MXU operand dtype

    def dense(a_f32, w, b_ref):
        # bf16 (or f32) operands on the MXU, f32 accumulation, f32 bias add.
        return jnp.dot(a_f32.astype(mxu_dtype), w,
                       preferred_element_type=jnp.float32) + b_ref[...]

    def bn_relu(z, g_ref, bt_ref):
        # Train-mode BatchNorm1d, eps=1e-5.  One-pass batch stats:
        # var = E[z^2] - E[z]^2 (single sweep over z).
        mu = jnp.mean(z, axis=0, keepdims=True)
        ms = jnp.mean(z * z, axis=0, keepdims=True)
        var = ms - mu * mu
        y = (z - mu) * jax.lax.rsqrt(var + 1e-5) * g_ref[...] + bt_ref[...]
        return jnp.maximum(y, 0.0)

    # Stream layer-2 weights while layer 1 computes.
    cp2 = pltpu.make_async_copy(w2_hbm, wbuf.at[0], wsem.at[0])
    cp2.start()

    xn = (x_ref[...] - mean_ref[...]) * istd_ref[...]          # f32 normalize (mul)
    a1 = jnp.maximum(dense(xn, w1_ref[...], b1_ref), 0.0)      # Linear + ReLU

    cp2.wait()
    cp3 = pltpu.make_async_copy(w3_hbm, wbuf.at[1], wsem.at[1])
    cp3.start()
    a2 = bn_relu(dense(a1, wbuf[0], b2_ref), g2_ref, bt2_ref)  # Linear + BN + ReLU

    cp3.wait()
    cp4 = pltpu.make_async_copy(w4_hbm, wbuf.at[0], wsem.at[0])
    cp4.start()
    cp5 = pltpu.make_async_copy(w5_hbm, w5buf, w5sem)
    cp5.start()
    a3 = bn_relu(dense(a2, wbuf[1], b3_ref), g3_ref, bt3_ref)

    cp4.wait()
    a4 = bn_relu(dense(a3, wbuf[0], b4_ref), g4_ref, bt4_ref)

    cp5.wait()
    out = jax.nn.sigmoid(dense(a4, w5buf[...], b5_ref))        # Linear + Sigmoid
    o_ref[...] = out.astype(o_ref.dtype)


# ---------------------------------------------------------------------------
# One-time (outside jit) parameter preparation: pad, cast, precompute 1/std.
# Weights are expected in (in, out) layout, i.e. the transpose of PyTorch's
# nn.Linear (out, in) layout.
# ---------------------------------------------------------------------------
def prepare_params(params, *, use_bf16=True):
    mxu = jnp.bfloat16 if use_bf16 else jnp.float32
    D = params["mean"].size
    Dout = params["b5"].shape[-1]
    Dp = _round_up(D, 128)
    Dop = _round_up(Dout, 128)

    std = params["std"].reshape(1, D).astype(jnp.float32)
    if bool(jnp.any(std == 0.0)):                       # data-contract check (init-time)
        raise ValueError("std buffer contains zeros; normalization would produce inf/NaN")

    def pad_cols(v, target):                            # (1, C) -> (1, target), zero pad
        return jnp.pad(v, ((0, 0), (0, target - v.shape[-1])))

    row = lambda v: v.reshape(1, -1).astype(jnp.float32)

    mean = pad_cols(params["mean"].reshape(1, D).astype(jnp.float32), Dp)
    inv_std = pad_cols(1.0 / std, Dp)                   # padded cols: (0-0)*0 == 0
    w1 = jnp.pad(params["w1"].astype(jnp.float32), ((0, Dp - D), (0, 0))).astype(mxu)
    w5 = jnp.pad(params["w5"].astype(jnp.float32), ((0, 0), (0, Dop - Dout))).astype(mxu)
    b5 = pad_cols(row(params["b5"]), Dop)

    return dict(
        mean=mean, inv_std=inv_std,
        w1=w1, b1=row(params["b1"]),
        w2=params["w2"].astype(mxu), b2=row(params["b2"]),
        g2=row(params["g2"]), bt2=row(params["bt2"]),
        w3=params["w3"].astype(mxu), b3=row(params["b3"]),
        g3=row(params["g3"]), bt3=row(params["bt3"]),
        w4=params["w4"].astype(mxu), b4=row(params["b4"]),
        g4=row(params["g4"]), bt4=row(params["bt4"]),
        w5=w5, b5=b5,
    )


# ---------------------------------------------------------------------------
# Jitted wrapper: single pallas_call, no grid, explicit VMEM budget.
# ---------------------------------------------------------------------------
def fcnet_forward(x, kp, *, outsize):
    N = x.shape[0]
    D = math.prod(x.shape[1:])
    Dp = kp["mean"].shape[-1]
    Dop = kp["b5"].shape[-1]
    h = kp["b1"].shape[-1]
    Dout = math.prod(outsize)
    wdtype = kp["w2"].dtype
    wbytes = jnp.dtype(wdtype).itemsize

    xf = x.reshape(N, D).astype(jnp.float32)
    if Dp != D:
        xf = jnp.pad(xf, ((0, 0), (0, Dp - D)))

    vmem = pl.BlockSpec(memory_space=pltpu.MemorySpace.VMEM)
    hbm = pl.BlockSpec(memory_space=pl.ANY)
    in_specs = [vmem, vmem, vmem,            # x, mean, 1/std
                vmem, vmem,                  # w1, b1
                hbm, vmem, vmem, vmem,       # w2 (HBM), b2, g2, bt2
                hbm, vmem, vmem, vmem,       # w3 (HBM), b3, g3, bt3
                hbm, vmem, vmem, vmem,       # w4 (HBM), b4, g4, bt4
                hbm, vmem]                   # w5 (HBM), b5

    # Explicit VMEM budget (defaults: 16 MiB v5e / 32 MiB v6e+v7x are too small
    # at the module-default h=2048).  Peak = double-buffered hidden weights + w1
    # + w5 buffer + activations, with margin.
    est = (2 * h * h * wbytes + h * Dop * wbytes + Dp * h * wbytes
           + 4 * 4 * N * max(Dp, h, Dop) + (1 << 20))
    vmem_limit = max(int(est * 1.25), 32 * 1024 * 1024)

    out = pl.pallas_call(
        _fcnet_kernel,
        out_shape=jax.ShapeDtypeStruct((N, Dop), jnp.float32),
        in_specs=in_specs,
        out_specs=vmem,
        scratch_shapes=[
            pltpu.VMEM((2, h, h), wdtype),        # double buffer for w2/w3/w4
            pltpu.VMEM((h, Dop), wdtype),         # buffer for w5
            pltpu.SemaphoreType.DMA((2,)),
            pltpu.SemaphoreType.DMA(()),
        ],
        compiler_params=pltpu.CompilerParams(vmem_limit_bytes=vmem_limit),
    )(xf, kp["mean"], kp["inv_std"],
      kp["w1"], kp["b1"],
      kp["w2"], kp["b2"], kp["g2"], kp["bt2"],
      kp["w3"], kp["b3"], kp["g3"], kp["bt3"],
      kp["w4"], kp["b4"], kp["g4"], kp["bt4"],
      kp["w5"], kp["b5"])

    return out[:, :Dout].reshape((N,) + tuple(outsize))


# ---------------------------------------------------------------------------
# Pure-JAX reference (for correctness checking).
# ---------------------------------------------------------------------------
def fcnet_reference(x, params, *, outsize):
    N = x.shape[0]
    D = params["mean"].size
    xn = (x.reshape(N, D) - params["mean"].reshape(1, D)) / params["std"].reshape(1, D)

    def dense(a, w, b):
        return jnp.dot(a, w, precision=jax.lax.Precision.HIGHEST) + b.reshape(1, -1)

    def bn_relu(z, g, bt):
        mu = jnp.mean(z, axis=0, keepdims=True)
        var = jnp.mean((z - mu) ** 2, axis=0, keepdims=True)
        return jnp.maximum((z - mu) * jax.lax.rsqrt(var + 1e-5) * g.reshape(1, -1)
                           + bt.reshape(1, -1), 0.0)

    a1 = jnp.maximum(dense(xn, params["w1"], params["b1"]), 0.0)
    a2 = bn_relu(dense(a1, params["w2"], params["b2"]), params["g2"], params["bt2"])
    a3 = bn_relu(dense(a2, params["w3"], params["b3"]), params["g3"], params["bt3"])
    a4 = bn_relu(dense(a3, params["w4"], params["b4"]), params["g4"], params["bt4"])
    out = jax.nn.sigmoid(dense(a4, params["w5"], params["b5"]))
    return out.reshape((N,) + tuple(outsize))


# ---------------------------------------------------------------------------
if __name__ == "__main__":
    key = jax.random.PRNGKey(0)
    ks = jax.random.split(key, 8)

    # Small shapes consistent with the module (defaults: imsize=(1,28,28), h=2048).
    imsize = (1, 28, 28)
    outsize = imsize                      # module default: outsize = imsize
    h = 256                               # small hidden width (lane-multiple of 128)
    N = 16                                # small batch; multiple of 16 (bf16 tile)
    D = imsize[0] * imsize[1] * imsize[2]
    Dout = outsize[0] * outsize[1] * outsize[2]

    def lin(k, din, dout):
        # PyTorch nn.Linear default init range, stored as (in, out) = W_pt.T.
        bound = 1.0 / math.sqrt(din)
        kw, kb = jax.random.split(k)
        w = jax.random.uniform(kw, (din, dout), jnp.float32, -bound, bound)
        b = jax.random.uniform(kb, (dout,), jnp.float32, -bound, bound)
        return w, b

    w1, b1 = lin(ks[0], D, h)
    w2, b2 = lin(ks[1], h, h)
    w3, b3 = lin(ks[2], h, h)
    w4, b4 = lin(ks[3], h, h)
    w5, b5 = lin(ks[4], h, Dout)

    params = dict(
        mean=jnp.zeros(imsize, jnp.float32),            # buffer default: zeros
        std=jnp.ones(imsize, jnp.float32),              # buffer default: ones
        w1=w1, b1=b1,
        w2=w2, b2=b2, g2=jnp.ones((h,), jnp.float32), bt2=jnp.zeros((h,), jnp.float32),
        w3=w3, b3=b3, g3=jnp.ones((h,), jnp.float32), bt3=jnp.zeros((h,), jnp.float32),
        w4=w4, b4=b4, g4=jnp.ones((h,), jnp.float32), bt4=jnp.zeros((h,), jnp.float32),
        w5=w5, b5=b5,
    )

    x = jax.random.normal(ks[5], (N,) + imsize, jnp.float32)

    # One-time parameter preparation (outside jit): pad / cast / 1/std precompute.
    kp_bf16 = prepare_params(params, use_bf16=True)
    kp_f32 = prepare_params(params, use_bf16=False)

    fwd = jax.jit(fcnet_forward, static_argnames=("outsize",))
    ref_fn = jax.jit(fcnet_reference, static_argnames=("outsize",))

    # Correctness: f32 kernel vs pure-JAX reference (tight), bf16 kernel (loose).
    out_f32 = jax.block_until_ready(fwd(x, kp_f32, outsize=outsize))
    ref = jax.block_until_ready(ref_fn(x, params, outsize=outsize))
    assert out_f32.shape == (N,) + outsize, out_f32.shape
    assert float(jnp.max(jnp.abs(out_f32 - ref))) < 2e-3

    out = jax.block_until_ready(fwd(x, kp_bf16, outsize=outsize))  # bf16 MXU path
    assert out.shape == (N,) + outsize, out.shape
    assert bool(jnp.all((out >= 0.0) & (out <= 1.0)))              # sigmoid range
    assert float(jnp.max(jnp.abs(out - ref))) < 0.1                # bf16 tolerance

    print("KERNEL_OK")
</pallas_src>

<mosaic_0001>
module attributes {stable_mosaic.version = 11 : i64} {
  func.func @_fcnet_kernel(%arg0: memref<16x896xf32, #tpu.memory_space<vmem>>, %arg1: memref<1x896xf32, #tpu.memory_space<vmem>>, %arg2: memref<1x896xf32, #tpu.memory_space<vmem>>, %arg3: memref<896x256xf32, #tpu.memory_space<vmem>>, %arg4: memref<1x256xf32, #tpu.memory_space<vmem>>, %arg5: memref<256x256xf32, #tpu.memory_space<any>>, %arg6: memref<1x256xf32, #tpu.memory_space<vmem>>, %arg7: memref<1x256xf32, #tpu.memory_space<vmem>>, %arg8: memref<1x256xf32, #tpu.memory_space<vmem>>, %arg9: memref<256x256xf32, #tpu.memory_space<any>>, %arg10: memref<1x256xf32, #tpu.memory_space<vmem>>, %arg11: memref<1x256xf32, #tpu.memory_space<vmem>>, %arg12: memref<1x256xf32, #tpu.memory_space<vmem>>, %arg13: memref<256x256xf32, #tpu.memory_space<any>>, %arg14: memref<1x256xf32, #tpu.memory_space<vmem>>, %arg15: memref<1x256xf32, #tpu.memory_space<vmem>>, %arg16: memref<1x256xf32, #tpu.memory_space<vmem>>, %arg17: memref<256x896xf32, #tpu.memory_space<any>>, %arg18: memref<1x896xf32, #tpu.memory_space<vmem>>, %arg19: memref<16x896xf32, #tpu.memory_space<vmem>>, %arg20: memref<2x256x256xf32, #tpu.memory_space<vmem>>, %arg21: memref<256x896xf32, #tpu.memory_space<vmem>>, %arg22: memref<2x!tpu.dma_semaphore, #tpu.memory_space<semaphore_mem>>, %arg23: memref<!tpu.dma_semaphore, #tpu.memory_space<semaphore_mem>>) attributes {dimension_semantics = [], scalar_prefetch = 0 : i64, scratch_operands = 4 : i64, tpu.core_type = #tpu.core_type<tc>} {
    %c0_i32 = arith.constant 0 : i32
    %c0_i32_0 = arith.constant 0 : i32
    %c0_i32_1 = arith.constant 0 : i32
    %c0_i32_2 = arith.constant 0 : i32
    %0 = tpu.memref_slice %arg20[%c0_i32, %c0_i32_1, %c0_i32_2] : memref<2x256x256xf32, #tpu.memory_space<vmem>> -> memref<1x256x256xf32, #tpu.memory_space<vmem>>
    %1 = tpu.memref_squeeze %0 : memref<1x256x256xf32, #tpu.memory_space<vmem>> -> memref<256x256xf32, #tpu.memory_space<vmem>>
    %2 = tpu.memref_slice %arg22[%c0_i32_0] : memref<2x!tpu.dma_semaphore, #tpu.memory_space<semaphore_mem>> -> memref<1x!tpu.dma_semaphore, #tpu.memory_space<semaphore_mem>>
    %3 = tpu.memref_squeeze %2 : memref<1x!tpu.dma_semaphore, #tpu.memory_space<semaphore_mem>> -> memref<!tpu.dma_semaphore, #tpu.memory_space<semaphore_mem>>
    tpu.enqueue_dma source(%arg5 : memref<256x256xf32, #tpu.memory_space<any>>) target(%1 : memref<256x256xf32, #tpu.memory_space<vmem>>) target_semaphore(%3 : memref<!tpu.dma_semaphore, #tpu.memory_space<semaphore_mem>>)
    %c0 = arith.constant 0 : index
    %c0_3 = arith.constant 0 : index
    %4 = vector.load %arg0[%c0, %c0_3] : memref<16x896xf32, #tpu.memory_space<vmem>>, vector<16x896xf32>
    %c0_4 = arith.constant 0 : index
    %c0_5 = arith.constant 0 : index
    %5 = vector.load %arg1[%c0_4, %c0_5] : memref<1x896xf32, #tpu.memory_space<vmem>>, vector<1x896xf32>
    %6 = vector.broadcast %5 : vector<1x896xf32> to vector<16x896xf32>
    %7 = arith.subf %4, %6 : vector<16x896xf32>
    %c0_6 = arith.constant 0 : index
    %c0_7 = arith.constant 0 : index
    %8 = vector.load %arg2[%c0_6, %c0_7] : memref<1x896xf32, #tpu.memory_space<vmem>>, vector<1x896xf32>
    %9 = vector.broadcast %8 : vector<1x896xf32> to vector<16x896xf32>
    %10 = arith.mulf %7, %9 : vector<16x896xf32>
    %c0_8 = arith.constant 0 : index
    %c0_9 = arith.constant 0 : index
    %11 = vector.load %arg3[%c0_8, %c0_9] : memref<896x256xf32, #tpu.memory_space<vmem>>, vector<896x256xf32>
    %cst = arith.constant dense<0.000000e+00> : vector<16x256xf32>
    %12 = tpu.matmul %10, %11, %cst {dimension_numbers = #tpu.dot_dimension_numbers<[1], [0], [0], [1], [0, 0, 1, 1], [], []>} : vector<16x896xf32>, vector<896x256xf32>, vector<16x256xf32> -> vector<16x256xf32>
    %c0_10 = arith.constant 0 : index
    %c0_11 = arith.constant 0 : index
    %13 = vector.load %arg4[%c0_10, %c0_11] : memref<1x256xf32, #tpu.memory_space<vmem>>, vector<1x256xf32>
    %14 = vector.broadcast %13 : vector<1x256xf32> to vector<16x256xf32>
    %15 = arith.addf %12, %14 : vector<16x256xf32>
    %cst_12 = arith.constant 0.000000e+00 : f32
    %16 = vector.broadcast %cst_12 : f32 to vector<16x256xf32>
    %17 = arith.maximumf %15, %16 : vector<16x256xf32>
    %c0_i32_13 = arith.constant 0 : i32
    %c0_i32_14 = arith.constant 0 : i32
    %c0_i32_15 = arith.constant 0 : i32
    %c0_i32_16 = arith.constant 0 : i32
    %18 = tpu.memref_slice %arg20[%c0_i32_13, %c0_i32_15, %c0_i32_16] : memref<2x256x256xf32, #tpu.memory_space<vmem>> -> memref<1x256x256xf32, #tpu.memory_space<vmem>>
    %19 = tpu.memref_squeeze %18 : memref<1x256x256xf32, #tpu.memory_space<vmem>> -> memref<256x256xf32, #tpu.memory_space<vmem>>
    %20 = tpu.memref_slice %arg22[%c0_i32_14] : memref<2x!tpu.dma_semaphore, #tpu.memory_space<semaphore_mem>> -> memref<1x!tpu.dma_semaphore, #tpu.memory_space<semaphore_mem>>
    %21 = tpu.memref_squeeze %20 : memref<1x!tpu.dma_semaphore, #tpu.memory_space<semaphore_mem>> -> memref<!tpu.dma_semaphore, #tpu.memory_space<semaphore_mem>>
    tpu.wait_dma2 semaphore(%21 : memref<!tpu.dma_semaphore, #tpu.memory_space<semaphore_mem>>) src(%arg5 : memref<256x256xf32, #tpu.memory_space<any>>) dst(%19 : memref<256x256xf32, #tpu.memory_space<vmem>>)
    %c1_i32 = arith.constant 1 : i32
    %c1_i32_17 = arith.constant 1 : i32
    %c0_i32_18 = arith.constant 0 : i32
    %c0_i32_19 = arith.constant 0 : i32
    %22 = tpu.memref_slice %arg20[%c1_i32, %c0_i32_18, %c0_i32_19] : memref<2x256x256xf32, #tpu.memory_space<vmem>> -> memref<1x256x256xf32, #tpu.memory_space<vmem>>
    %23 = tpu.memref_squeeze %22 : memref<1x256x256xf32, #tpu.memory_space<vmem>> -> memref<256x256xf32, #tpu.memory_space<vmem>>
    %24 = tpu.memref_slice %arg22[%c1_i32_17] : memref<2x!tpu.dma_semaphore, #tpu.memory_space<semaphore_mem>> -> memref<1x!tpu.dma_semaphore, #tpu.memory_space<semaphore_mem>>
    %25 = tpu.memref_squeeze %24 : memref<1x!tpu.dma_semaphore, #tpu.memory_space<semaphore_mem>> -> memref<!tpu.dma_semaphore, #tpu.memory_space<semaphore_mem>>
    tpu.enqueue_dma source(%arg9 : memref<256x256xf32, #tpu.memory_space<any>>) target(%23 : memref<256x256xf32, #tpu.memory_space<vmem>>) target_semaphore(%25 : memref<!tpu.dma_semaphore, #tpu.memory_space<semaphore_mem>>)
    %c0_20 = arith.constant 0 : index
    %c0_21 = arith.constant 0 : index
    %c0_22 = arith.constant 0 : index
    %26 = vector.load %arg20[%c0_20, %c0_21, %c0_22] : memref<2x256x256xf32, #tpu.memory_space<vmem>>, vector<1x256x256xf32>
    %27 = vector.shape_cast %26 : vector<1x256x256xf32> to vector<256x256xf32>
    %cst_23 = arith.constant dense<0.000000e+00> : vector<16x256xf32>
    %28 = tpu.matmul %17, %27, %cst_23 {dimension_numbers = #tpu.dot_dimension_numbers<[1], [0], [0], [1], [0, 0, 1, 1], [], []>} : vector<16x256xf32>, vector<256x256xf32>, vector<16x256xf32> -> vector<16x256xf32>
    %c0_24 = arith.constant 0 : index
    %c0_25 = arith.constant 0 : index
    %29 = vector.load %arg6[%c0_24, %c0_25] : memref<1x256xf32, #tpu.memory_space<vmem>>, vector<1x256xf32>
    %30 = vector.broadcast %29 : vector<1x256xf32> to vector<16x256xf32>
    %31 = arith.addf %28, %30 : vector<16x256xf32>
    %cst_26 = arith.constant dense<0.000000e+00> : vector<256xf32>
    %32 = vector.multi_reduction <add>, %31, %cst_26 [0] : vector<16x256xf32> to vector<256xf32>
    %33 = vector.shape_cast %32 : vector<256xf32> to vector<1x256xf32>
    %cst_27 = arith.constant 1.600000e+01 : f32
    %34 = vector.broadcast %cst_27 : f32 to vector<1x256xf32>
    %35 = arith.divf %33, %34 : vector<1x256xf32>
    %36 = arith.mulf %31, %31 : vector<16x256xf32>
    %cst_28 = arith.constant dense<0.000000e+00> : vector<256xf32>
    %37 = vector.multi_reduction <add>, %36, %cst_28 [0] : vector<16x256xf32> to vector<256xf32>
    %38 = vector.shape_cast %37 : vector<256xf32> to vector<1x256xf32>
    %cst_29 = arith.constant 1.600000e+01 : f32
    %39 = vector.broadcast %cst_29 : f32 to vector<1x256xf32>
    %40 = arith.divf %38, %39 : vector<1x256xf32>
    %41 = arith.mulf %35, %35 : vector<1x256xf32>
    %42 = arith.subf %40, %41 : vector<1x256xf32>
    %43 = vector.broadcast %35 : vector<1x256xf32> to vector<16x256xf32>
    %44 = arith.subf %31, %43 : vector<16x256xf32>
    %cst_30 = arith.constant 9.99999974E-6 : f32
    %45 = vector.broadcast %cst_30 : f32 to vector<1x256xf32>
    %46 = arith.addf %42, %45 : vector<1x256xf32>
    %47 = math.rsqrt %46 : vector<1x256xf32>
    %48 = vector.broadcast %47 : vector<1x256xf32> to vector<16x256xf32>
    %49 = arith.mulf %44, %48 : vector<16x256xf32>
    %c0_31 = arith.constant 0 : index
    %c0_32 = arith.constant 0 : index
    %50 = vector.load %arg7[%c0_31, %c0_32] : memref<1x256xf32, #tpu.memory_space<vmem>>, vector<1x256xf32>
    %51 = vector.broadcast %50 : vector<1x256xf32> to vector<16x256xf32>
    %52 = arith.mulf %49, %51 : vector<16x256xf32>
    %c0_33 = arith.constant 0 : index
    %c0_34 = arith.constant 0 : index
    %53 = vector.load %arg8[%c0_33, %c0_34] : memref<1x256xf32, #tpu.memory_space<vmem>>, vector<1x256xf32>
    %54 = vector.broadcast %53 : vector<1x256xf32> to vector<16x256xf32>
    %55 = arith.addf %52, %54 : vector<16x256xf32>
    %cst_35 = arith.constant 0.000000e+00 : f32
    %56 = vector.broadcast %cst_35 : f32 to vector<16x256xf32>
    %57 = arith.maximumf %55, %56 : vector<16x256xf32>
    %c1_i32_36 = arith.constant 1 : i32
    %c1_i32_37 = arith.constant 1 : i32
    %c0_i32_38 = arith.constant 0 : i32
    %c0_i32_39 = arith.constant 0 : i32
    %58 = tpu.memref_slice %arg20[%c1_i32_36, %c0_i32_38, %c0_i32_39] : memref<2x256x256xf32, #tpu.memory_space<vmem>> -> memref<1x256x256xf32, #tpu.memory_space<vmem>>
    %59 = tpu.memref_squeeze %58 : memref<1x256x256xf32, #tpu.memory_space<vmem>> -> memref<256x256xf32, #tpu.memory_space<vmem>>
    %60 = tpu.memref_slice %arg22[%c1_i32_37] : memref<2x!tpu.dma_semaphore, #tpu.memory_space<semaphore_mem>> -> memref<1x!tpu.dma_semaphore, #tpu.memory_space<semaphore_mem>>
    %61 = tpu.memref_squeeze %60 : memref<1x!tpu.dma_semaphore, #tpu.memory_space<semaphore_mem>> -> memref<!tpu.dma_semaphore, #tpu.memory_space<semaphore_mem>>
    tpu.wait_dma2 semaphore(%61 : memref<!tpu.dma_semaphore, #tpu.memory_space<semaphore_mem>>) src(%arg9 : memref<256x256xf32, #tpu.memory_space<any>>) dst(%59 : memref<256x256xf32, #tpu.memory_space<vmem>>)
    %c0_i32_40 = arith.constant 0 : i32
    %c0_i32_41 = arith.constant 0 : i32
    %c0_i32_42 = arith.constant 0 : i32
    %c0_i32_43 = arith.constant 0 : i32
    %62 = tpu.memref_slice %arg20[%c0_i32_40, %c0_i32_42, %c0_i32_43] : memref<2x256x256xf32, #tpu.memory_space<vmem>> -> memref<1x256x256xf32, #tpu.memory_space<vmem>>
    %63 = tpu.memref_squeeze %62 : memref<1x256x256xf32, #tpu.memory_space<vmem>> -> memref<256x256xf32, #tpu.memory_space<vmem>>
    %64 = tpu.memref_slice %arg22[%c0_i32_41] : memref<2x!tpu.dma_semaphore, #tpu.memory_space<semaphore_mem>> -> memref<1x!tpu.dma_semaphore, #tpu.memory_space<semaphore_mem>>
    %65 = tpu.memref_squeeze %64 : memref<1x!tpu.dma_semaphore, #tpu.memory_space<semaphore_mem>> -> memref<!tpu.dma_semaphore, #tpu.memory_space<semaphore_mem>>
    tpu.enqueue_dma source(%arg13 : memref<256x256xf32, #tpu.memory_space<any>>) target(%63 : memref<256x256xf32, #tpu.memory_space<vmem>>) target_semaphore(%65 : memref<!tpu.dma_semaphore, #tpu.memory_space<semaphore_mem>>)
    tpu.enqueue_dma source(%arg17 : memref<256x896xf32, #tpu.memory_space<any>>) target(%arg21 : memref<256x896xf32, #tpu.memory_space<vmem>>) target_semaphore(%arg23 : memref<!tpu.dma_semaphore, #tpu.memory_space<semaphore_mem>>)
    %c1 = arith.constant 1 : index
    %c0_44 = arith.constant 0 : index
    %c0_45 = arith.constant 0 : index
    %66 = vector.load %arg20[%c1, %c0_44, %c0_45] : memref<2x256x256xf32, #tpu.memory_space<vmem>>, vector<1x256x256xf32>
    %67 = vector.shape_cast %66 : vector<1x256x256xf32> to vector<256x256xf32>
    %cst_46 = arith.constant dense<0.000000e+00> : vector<16x256xf32>
    %68 = tpu.matmul %57, %67, %cst_46 {dimension_numbers = #tpu.dot_dimension_numbers<[1], [0], [0], [1], [0, 0, 1, 1], [], []>} : vector<16x256xf32>, vector<256x256xf32>, vector<16x256xf32> -> vector<16x256xf32>
    %c0_47 = arith.constant 0 : index
    %c0_48 = arith.constant 0 : index
    %69 = vector.load %arg10[%c0_47, %c0_48] : memref<1x256xf32, #tpu.memory_space<vmem>>, vector<1x256xf32>
    %70 = vector.broadcast %69 : vector<1x256xf32> to vector<16x256xf32>
    %71 = arith.addf %68, %70 : vector<16x256xf32>
    %cst_49 = arith.constant dense<0.000000e+00> : vector<256xf32>
    %72 = vector.multi_reduction <add>, %71, %cst_49 [0] : vector<16x256xf32> to vector<256xf32>
    %73 = vector.shape_cast %72 : vector<256xf32> to vector<1x256xf32>
    %cst_50 = arith.constant 1.600000e+01 : f32
    %74 = vector.broadcast %cst_50 : f32 to vector<1x256xf32>
    %75 = arith.divf %73, %74 : vector<1x256xf32>
    %76 = arith.mulf %71, %71 : vector<16x256xf32>
    %cst_51 = arith.constant dense<0.000000e+00> : vector<256xf32>
    %77 = vector.multi_reduction <add>, %76, %cst_51 [0] : vector<16x256xf32> to vector<256xf32>
    %78 = vector.shape_cast %77 : vector<256xf32> to vector<1x256xf32>
    %cst_52 = arith.constant 1.600000e+01 : f32
    %79 = vector.broadcast %cst_52 : f32 to vector<1x256xf32>
    %80 = arith.divf %78, %79 : vector<1x256xf32>
    %81 = arith.mulf %75, %75 : vector<1x256xf32>
    %82 = arith.subf %80, %81 : vector<1x256xf32>
    %83 = vector.broadcast %75 : vector<1x256xf32> to vector<16x256xf32>
    %84 = arith.subf %71, %83 : vector<16x256xf32>
    %cst_53 = arith.constant 9.99999974E-6 : f32
    %85 = vector.broadcast %cst_53 : f32 to vector<1x256xf32>
    %86 = arith.addf %82, %85 : vector<1x256xf32>
    %87 = math.rsqrt %86 : vector<1x256xf32>
    %88 = vector.broadcast %87 : vector<1x256xf32> to vector<16x256xf32>
    %89 = arith.mulf %84, %88 : vector<16x256xf32>
    %c0_54 = arith.constant 0 : index
    %c0_55 = arith.constant 0 : index
    %90 = vector.load %arg11[%c0_54, %c0_55] : memref<1x256xf32, #tpu.memory_space<vmem>>, vector<1x256xf32>
    %91 = vector.broadcast %90 : vector<1x256xf32> to vector<16x256xf32>
    %92 = arith.mulf %89, %91 : vector<16x256xf32>
    %c0_56 = arith.constant 0 : index
    %c0_57 = arith.constant 0 : index
    %93 = vector.load %arg12[%c0_56, %c0_57] : memref<1x256xf32, #tpu.memory_space<vmem>>, vector<1x256xf32>
    %94 = vector.broadcast %93 : vector<1x256xf32> to vector<16x256xf32>
    %95 = arith.addf %92, %94 : vector<16x256xf32>
    %cst_58 = arith.constant 0.000000e+00 : f32
    %96 = vector.broadcast %cst_58 : f32 to vector<16x256xf32>
    %97 = arith.maximumf %95, %96 : vector<16x256xf32>
    %c0_i32_59 = arith.constant 0 : i32
    %c0_i32_60 = arith.constant 0 : i32
    %c0_i32_61 = arith.constant 0 : i32
    %c0_i32_62 = arith.constant 0 : i32
    %98 = tpu.memref_slice %arg20[%c0_i32_59, %c0_i32_61, %c0_i32_62] : memref<2x256x256xf32, #tpu.memory_space<vmem>> -> memref<1x256x256xf32, #tpu.memory_space<vmem>>
    %99 = tpu.memref_squeeze %98 : memref<1x256x256xf32, #tpu.memory_space<vmem>> -> memref<256x256xf32, #tpu.memory_space<vmem>>
    %100 = tpu.memref_slice %arg22[%c0_i32_60] : memref<2x!tpu.dma_semaphore, #tpu.memory_space<semaphore_mem>> -> memref<1x!tpu.dma_semaphore, #tpu.memory_space<semaphore_mem>>
    %101 = tpu.memref_squeeze %100 : memref<1x!tpu.dma_semaphore, #tpu.memory_space<semaphore_mem>> -> memref<!tpu.dma_semaphore, #tpu.memory_space<semaphore_mem>>
    tpu.wait_dma2 semaphore(%101 : memref<!tpu.dma_semaphore, #tpu.memory_space<semaphore_mem>>) src(%arg13 : memref<256x256xf32, #tpu.memory_space<any>>) dst(%99 : memref<256x256xf32, #tpu.memory_space<vmem>>)
    %c0_63 = arith.constant 0 : index
    %c0_64 = arith.constant 0 : index
    %c0_65 = arith.constant 0 : index
    %102 = vector.load %arg20[%c0_63, %c0_64, %c0_65] : memref<2x256x256xf32, #tpu.memory_space<vmem>>, vector<1x256x256xf32>
    %103 = vector.shape_cast %102 : vector<1x256x256xf32> to vector<256x256xf32>
    %cst_66 = arith.constant dense<0.000000e+00> : vector<16x256xf32>
    %104 = tpu.matmul %97, %103, %cst_66 {dimension_numbers = #tpu.dot_dimension_numbers<[1], [0], [0], [1], [0, 0, 1, 1], [], []>} : vector<16x256xf32>, vector<256x256xf32>, vector<16x256xf32> -> vector<16x256xf32>
    %c0_67 = arith.constant 0 : index
    %c0_68 = arith.constant 0 : index
    %105 = vector.load %arg14[%c0_67, %c0_68] : memref<1x256xf32, #tpu.memory_space<vmem>>, vector<1x256xf32>
    %106 = vector.broadcast %105 : vector<1x256xf32> to vector<16x256xf32>
    %107 = arith.addf %104, %106 : vector<16x256xf32>
    %cst_69 = arith.constant dense<0.000000e+00> : vector<256xf32>
    %108 = vector.multi_reduction <add>, %107, %cst_69 [0] : vector<16x256xf32> to vector<256xf32>
    %109 = vector.shape_cast %108 : vector<256xf32> to vector<1x256xf32>
    %cst_70 = arith.constant 1.600000e+01 : f32
    %110 = vector.broadcast %cst_70 : f32 to vector<1x256xf32>
    %111 = arith.divf %109, %110 : vector<1x256xf32>
    %112 = arith.mulf %107, %107 : vector<16x256xf32>
    %cst_71 = arith.constant dense<0.000000e+00> : vector<256xf32>
    %113 = vector.multi_reduction <add>, %112, %cst_71 [0] : vector<16x256xf32> to vector<256xf32>
    %114 = vector.shape_cast %113 : vector<256xf32> to vector<1x256xf32>
    %cst_72 = arith.constant 1.600000e+01 : f32
    %115 = vector.broadcast %cst_72 : f32 to vector<1x256xf32>
    %116 = arith.divf %114, %115 : vector<1x256xf32>
    %117 = arith.mulf %111, %111 : vector<1x256xf32>
    %118 = arith.subf %116, %117 : vector<1x256xf32>
    %119 = vector.broadcast %111 : vector<1x256xf32> to vector<16x256xf32>
    %120 = arith.subf %107, %119 : vector<16x256xf32>
    %cst_73 = arith.constant 9.99999974E-6 : f32
    %121 = vector.broadcast %cst_73 : f32 to vector<1x256xf32>
    %122 = arith.addf %118, %121 : vector<1x256xf32>
    %123 = math.rsqrt %122 : vector<1x256xf32>
    %124 = vector.broadcast %123 : vector<1x256xf32> to vector<16x256xf32>
    %125 = arith.mulf %120, %124 : vector<16x256xf32>
    %c0_74 = arith.constant 0 : index
    %c0_75 = arith.constant 0 : index
    %126 = vector.load %arg15[%c0_74, %c0_75] : memref<1x256xf32, #tpu.memory_space<vmem>>, vector<1x256xf32>
    %127 = vector.broadcast %126 : vector<1x256xf32> to vector<16x256xf32>
    %128 = arith.mulf %125, %127 : vector<16x256xf32>
    %c0_76 = arith.constant 0 : index
    %c0_77 = arith.constant 0 : index
    %129 = vector.load %arg16[%c0_76, %c0_77] : memref<1x256xf32, #tpu.memory_space<vmem>>, vector<1x256xf32>
    %130 = vector.broadcast %129 : vector<1x256xf32> to vector<16x256xf32>
    %131 = arith.addf %128, %130 : vector<16x256xf32>
    %cst_78 = arith.constant 0.000000e+00 : f32
    %132 = vector.broadcast %cst_78 : f32 to vector<16x256xf32>
    %133 = arith.maximumf %131, %132 : vector<16x256xf32>
    tpu.wait_dma2 semaphore(%arg23 : memref<!tpu.dma_semaphore, #tpu.memory_space<semaphore_mem>>) src(%arg17 : memref<256x896xf32, #tpu.memory_space<any>>) dst(%arg21 : memref<256x896xf32, #tpu.memory_space<vmem>>)
    %c0_79 = arith.constant 0 : index
    %c0_80 = arith.constant 0 : index
    %134 = vector.load %arg21[%c0_79, %c0_80] : memref<256x896xf32, #tpu.memory_space<vmem>>, vector<256x896xf32>
    %cst_81 = arith.constant dense<0.000000e+00> : vector<16x896xf32>
    %135 = tpu.matmul %133, %134, %cst_81 {dimension_numbers = #tpu.dot_dimension_numbers<[1], [0], [0], [1], [0, 0, 1, 1], [], []>} : vector<16x256xf32>, vector<256x896xf32>, vector<16x896xf32> -> vector<16x896xf32>
    %c0_82 = arith.constant 0 : index
    %c0_83 = arith.constant 0 : index
    %136 = vector.load %arg18[%c0_82, %c0_83] : memref<1x896xf32, #tpu.memory_space<vmem>>, vector<1x896xf32>
    %137 = vector.broadcast %136 : vector<1x896xf32> to vector<16x896xf32>
    %138 = arith.addf %135, %137 : vector<16x896xf32>
    %139 = arith.negf %138 : vector<16x896xf32>
    %140 = math.exp %139 : vector<16x896xf32>
    %cst_84 = arith.constant 1.000000e+00 : f32
    %141 = vector.broadcast %cst_84 : f32 to vector<16x896xf32>
    %142 = arith.addf %141, %140 : vector<16x896xf32>
    %143 = arith.divf %141, %142 : vector<16x896xf32>
    %c0_85 = arith.constant 0 : index
    %c0_86 = arith.constant 0 : index
    %144 = vector.load %arg19[%c0_85, %c0_86] : memref<16x896xf32, #tpu.memory_space<vmem>>, vector<16x896xf32>
    tpu.vector_store %arg19[%c0_85, %c0_86], %143 {strides = array<i32>} : memref<16x896xf32, #tpu.memory_space<vmem>>, vector<16x896xf32>,
    return
  }
}

</mosaic_0001>

<bundles_post_ra>
// kernel: fcnet_forward.1
= control target key start
LH: loop header
LB: loop body
LE: loop exit
PB: predicated region body
PF: predicated region fallthrough
CT: control target
= control target key end

     0   :  { %s4120_s0 = inlined_call_operand.vmem [shape: f32[16,896], index: 0, kind: input, shape index: {}]   ;;  %s4121_s1 = inlined_call_operand.vmem [shape: f32[1,896], index: 1, kind: input, shape index: {}]   ;;  %s4122_s2 = inlined_call_operand.vmem [shape: f32[1,896], index: 2, kind: input, shape index: {}]   ;;  %s4123_s3 = inlined_call_operand.vmem [shape: f32[896,256], index: 3, kind: input, shape index: {}]   ;;  %s4124_s4 = inlined_call_operand.vmem [shape: f32[1,256], index: 4, kind: input, shape index: {}]   ;;  %s4125_s5 = inlined_call_operand.hbm [shape: f32[256,256], index: 5, kind: input, shape index: {}]   ;;  %s4126_s6 = inlined_call_operand.vmem [shape: f32[1,256], index: 6, kind: input, shape index: {}]   ;;  %s4127_s7 = inlined_call_operand.vmem [shape: f32[1,256], index: 7, kind: input, shape index: {}]   ;;  %s4128_s8 = inlined_call_operand.vmem [shape: f32[1,256], index: 8, kind: input, shape index: {}]   ;;  %s4129_s9 = inlined_call_operand.hbm [shape: f32[256,256], index: 9, kind: input, shape index: {}]   ;;  %s4130_s10 = inlined_call_operand.vmem [shape: f32[1,256], index: 10, kind: input, shape index: {}]   ;;  %s4131_s11 = inlined_call_operand.hbm [shape: f32[1,256], index: 11, kind: input, shape index: {}]   ;;  %s4132_s12 = inlined_call_operand.hbm [shape: f32[1,256], index: 12, kind: input, shape index: {}]   ;;  %s4133_s13 = inlined_call_operand.hbm [shape: f32[256,256], index: 13, kind: input, shape index: {}]   ;;  %s4134_s14 = inlined_call_operand.hbm [shape: f32[1,256], index: 14, kind: input, shape index: {}]   ;;  %s4135_s15 = inlined_call_operand.hbm [shape: f32[1,256], index: 15, kind: input, shape index: {}]   ;;  %s4136_s16 = inlined_call_operand.hbm [shape: f32[1,256], index: 16, kind: input, shape index: {}]   ;;  %s4137_s17 = inlined_call_operand.hbm [shape: f32[256,896], index: 17, kind: input, shape index: {}]   ;;  %s4138_s18 = inlined_call_operand.vmem [shape: f32[1,896], index: 18, kind: input, shape index: {}]   ;;  %s4139_s19 = inlined_call_operand.vmem [shape: f32[16,896], index: 19, kind: output, shape index: {}]  }
   0x1   :  { %4142 = sst [smem:[#allocation31_spill]] %s4120_s0 }
   0x2   :  { %4143 = sst [smem:[#allocation32_spill]] %s4121_s1 }
   0x3   :  { %4144 = sst [smem:[#allocation33_spill]] %s4122_s2 }
   0x4   :  { %4145 = sst [smem:[#allocation34_spill]] %s4123_s3 }
   0x5   :  { %24 = vsyncpa [#allocation7], 0 }
   0x6   :  { %25 = vsyncpa [#allocation9], 0  ;;  %s61_s20 = sshll.u32 %s4132_s12, 4  ;;  %s62_s20 = int_to_ptr.hbm [resolvable:$true] %s61_s20 }
   0x7   :  { %26 = vsyncpa [#allocation12], 0  ;;  %s2786_s21 = smov [#allocation8]   ;;  %s83_s23 = sshll.u32 %s4135_s15, 4  ;;  %s84_s23 = int_to_ptr.hbm [resolvable:$true] %s83_s23 }
   0x8   :  { %s63_s1 = sshll.u32 %s2786_s21, 4  ;;  %s2787_s24 = smov [#allocation11]   ;;  %s64_s1 = int_to_ptr.vmem [resolvable:$true] %s63_s1 }
   0x9   :  { %66 = dma.hbm_to_vmem [thread:$0]  %s62_s20, 32, %s64_s1, [#allocation9]  }
   0xa   :  { %s85_s25 = sshll.u32 %s2787_s24, 4  ;;  %s50_s27 = sshll.u32 %s4131_s11, 4  ;;  %s86_s25 = int_to_ptr.vmem [resolvable:$true] %s85_s25  ;;  %s51_s27 = int_to_ptr.hbm [resolvable:$true] %s50_s27 }
   0xb   :  { %88 = dma.hbm_to_vmem [thread:$0]  %s84_s23, 32, %s86_s25, [#allocation12]  }
   0xc   :  { %s72_s29 = sshll.u32 %s4134_s14, 4  ;;  %s2788_s0 = smov [#allocation6]   ;;  %s73_s29 = int_to_ptr.hbm [resolvable:$true] %s72_s29 }
   0xd   :  { %s52_s30 = sshll.u32 %s2788_s0, 4  ;;  %s2789_s15 = smov [#allocation10]   ;;  %s53_s30 = int_to_ptr.vmem [resolvable:$true] %s52_s30 }
   0xe   :  { %55 = dma.hbm_to_vmem [thread:$0]  %s51_s27, 32, %s53_s30, [#allocation7]  }
   0xf   :  { %s74_s20 = sshll.u32 %s2789_s15, 4  ;;  %s94_s22 = sshll.u32 %s4136_s16, 4  ;;  %s75_s20 = int_to_ptr.vmem [resolvable:$true] %s74_s20  ;;  %s95_s22 = int_to_ptr.hbm [resolvable:$true] %s94_s22 }
  0x10   :  { %77 = dma.hbm_to_vmem [thread:$0]  %s73_s29, 32, %s75_s20, [#allocation9]  }
  0x11   :  { %s2790_s11 = smov [#allocation13]  }
  0x12   :  { %s96_s2 = sshll.u32 %s2790_s11, 4  ;;  %s97_s2 = int_to_ptr.vmem [resolvable:$true] %s96_s2 }
  0x13   :  { %99 = dma.hbm_to_vmem [thread:$0]  %s95_s22, 32, %s97_s2, [#allocation12]  }
  0x14   :  { %2772 = dma.done.wait [#allocation7], 32  }
  0x15   :  { %2773 = vsyncadd [#allocation7], 4294967264 }
  0x16   :  { %2774 = dma.done.wait [#allocation9], 64  }
  0x17   :  { %2775 = vsyncadd [#allocation9], 4294967232 }
  0x18   :  { %2776 = dma.done.wait [#allocation12], 64  }
  0x19   :  { %2777 = vsyncadd [#allocation12], 4294967232  ;;  %s4146_s24 = sld [smem:[#allocation34_spill]]  ;;  %s129_s25 = sshll.u32 %s4125_s5, 4  ;;  %s130_s25 = int_to_ptr.hbm [resolvable:$true] %s129_s25 }
  0x1a   :  { %s4147_s11 = sld [smem:[#allocation32_spill]]  ;;  %s2791_s3 = smov [#allocation2]  }
  0x1b   :  { %s4148_s29 = sld [smem:[#allocation31_spill]]  ;;  %s3754_s16 = sshll.u32 %s2791_s3, 4  ;;  %s132_s16 = int_to_ptr.vmem [resolvable:$true] %s3754_s16 }
  0x1c   :  { %s4149_s23 = sld [smem:[#allocation33_spill]] }
  0x1d   :  { %134 = dma.hbm_to_vmem [thread:$0]  %s130_s25, 8192, %s132_s16, [#allocation4] }
  0x1f   :  { %v239_v0 = vld [vmem:[%s4146_s24 + $0xf0] sm:$0xff]  ;;  %v237_v1 = vld [vmem:[%s4146_s24 + $0xe0] sm:$0xff] }
  0x20   :  { %v271_v2 = vld [vmem:[%s4146_s24 + $0x1f0] sm:$0xff]  ;;  %439 = vmatpush.msra.mxu0 %v239_v0  ;;  %v269_v3 = vld [vmem:[%s4146_s24 + $0x1e0] sm:$0xff] }
  0x21   :  { %462 = vmatpush.msra.mxu1 %v271_v2  ;;  %v235_v4 = vld [vmem:[%s4146_s24 + $0xd0] sm:$0xff]  ;;  %v301_v7 = vld [vmem:[%s4146_s24 + $0x2e0] sm:$0xff] }
  0x22   :  { %v267_v5 = vld [vmem:[%s4146_s24 + $0x1d0] sm:$0xff]  ;;  %440 = vmatpush.msra.mxu0 %v237_v1  ;;  %v233_v8 = vld [vmem:[%s4146_s24 + $0xc0] sm:$0xff] }
  0x23   :  { %v303_v6 = vld [vmem:[%s4146_s24 + $0x2f0] sm:$0xff]  ;;  %463 = vmatpush.msra.mxu1 %v269_v3  ;;  %v265_v9 = vld [vmem:[%s4146_s24 + $0x1c0] sm:$0xff] }
  0x24   :  { %485 = vmatpush.msra.mxu2 %v303_v6  ;;  %441 = vmatpush.msra.mxu0 %v235_v4  ;;  %v299_v10 = vld [vmem:[%s4146_s24 + $0x2d0] sm:$0xff]  ;;  %v297_v14 = vld [vmem:[%s4146_s24 + $0x2c0] sm:$0xff] }
  0x25   :  { %464 = vmatpush.msra.mxu1 %v267_v5  ;;  %v231_v11 = vld [vmem:[%s4146_s24 + $0xb0] sm:$0xff]  ;;  %v229_v15 = vld [vmem:[%s4146_s24 + $0xa0] sm:$0xff] }
  0x26   :  { %486 = vmatpush.msra.mxu2 %v301_v7  ;;  %v263_v12 = vld [vmem:[%s4146_s24 + $0x1b0] sm:$0xff]  ;;  %442 = vmatpush.msra.mxu0 %v233_v8  ;;  %v261_v16 = vld [vmem:[%s4146_s24 + $0x1a0] sm:$0xff] }
  0x27   :  { %v335_v13 = vld [vmem:[%s4146_s24 + $0x3f0] sm:$0xff]  ;;  %465 = vmatpush.msra.mxu1 %v265_v9  ;;  %v333_v17 = vld [vmem:[%s4146_s24 + $0x3e0] sm:$0xff] }
  0x28   :  { %487 = vmatpush.msra.mxu2 %v299_v10  ;;  %508 = vmatpush.msra.mxu3 %v335_v13  ;;  %v295_v18 = vld [vmem:[%s4146_s24 + $0x2b0] sm:$0xff]  ;;  %v293_v22 = vld [vmem:[%s4146_s24 + $0x2a0] sm:$0xff] }
  0x29   :  { %443 = vmatpush.msra.mxu0 %v231_v11  ;;  %466 = vmatpush.msra.mxu1 %v263_v12  ;;  %v331_v19 = vld [vmem:[%s4146_s24 + $0x3d0] sm:$0xff]  ;;  %v329_v23 = vld [vmem:[%s4146_s24 + $0x3c0] sm:$0xff] }
  0x2a   :  { %v227_v20 = vld [vmem:[%s4146_s24 + $0x90] sm:$0xff]  ;;  %488 = vmatpush.msra.mxu2 %v297_v14  ;;  %509 = vmatpush.msra.mxu3 %v333_v17  ;;  %v225_v24 = vld [vmem:[%s4146_s24 + $0x80] sm:$0xff] }
  0x2b   :  { %v259_v21 = vld [vmem:[%s4146_s24 + $0x190] sm:$0xff]  ;;  %444 = vmatpush.msra.mxu0 %v229_v15  ;;  %467 = vmatpush.msra.mxu1 %v261_v16  ;;  %v257_v25 = vld [vmem:[%s4146_s24 + $0x180] sm:$0xff]  ;;  %v240_v15 = vld [vmem:[%s4146_s24 + $0xf8] sm:$0xff] }
  0x2c   :  { %489 = vmatpush.msra.mxu2 %v295_v18  ;;  %510 = vmatpush.msra.mxu3 %v331_v19  ;;  %v291_v26 = vld [vmem:[%s4146_s24 + $0x290] sm:$0xff]  ;;  %v289_v30 = vld [vmem:[%s4146_s24 + $0x280] sm:$0xff] }
  0x2d   :  { %445 = vmatpush.msra.mxu0 %v227_v20  ;;  %468 = vmatpush.msra.mxu1 %v259_v21  ;;  %v327_v27 = vld [vmem:[%s4146_s24 + $0x3b0] sm:$0xff]  ;;  %v325_v31 = vld [vmem:[%s4146_s24 + $0x3a0] sm:$0xff]  ;;  %v238_v20 = vld [vmem:[%s4146_s24 + $0xe8] sm:$0xff] }
  0x2e   :  { %v223_v28 = vld [vmem:[%s4146_s24 + $0x70] sm:$0xff]  ;;  %490 = vmatpush.msra.mxu2 %v293_v22  ;;  %511 = vmatpush.msra.mxu3 %v329_v23  ;;  %v221_v32 = vld [vmem:[%s4146_s24 + $0x60] sm:$0xff] }
  0x2f   :  { %v255_v29 = vld [vmem:[%s4146_s24 + $0x170] sm:$0xff]  ;;  %446 = vmatpush.msra.mxu0 %v225_v24  ;;  %469 = vmatpush.msra.mxu1 %v257_v25  ;;  %v253_v33 = vld [vmem:[%s4146_s24 + $0x160] sm:$0xff] }
  0x30   :  { %491 = vmatpush.msra.mxu2 %v291_v26  ;;  %512 = vmatpush.msra.mxu3 %v327_v27  ;;  %v287_v34 = vld [vmem:[%s4146_s24 + $0x270] sm:$0xff]  ;;  %v285_v38 = vld [vmem:[%s4146_s24 + $0x260] sm:$0xff] }
  0x31   :  { %447 = vmatpush.msra.mxu0 %v223_v28  ;;  %470 = vmatpush.msra.mxu1 %v255_v29  ;;  %v323_v35 = vld [vmem:[%s4146_s24 + $0x390] sm:$0xff]  ;;  %v321_v39 = vld [vmem:[%s4146_s24 + $0x380] sm:$0xff]  ;;  %v236_v29 = vld [vmem:[%s4146_s24 + $0xd8] sm:$0xff] }
  0x32   :  { %v219_v36 = vld [vmem:[%s4146_s24 + $0x50] sm:$0xff]  ;;  %492 = vmatpush.msra.mxu2 %v289_v30  ;;  %513 = vmatpush.msra.mxu3 %v325_v31  ;;  %v217_v40 = vld [vmem:[%s4146_s24 + $0x40] sm:$0xff] }
  0x33   :  { %v251_v37 = vld [vmem:[%s4146_s24 + $0x150] sm:$0xff]  ;;  %448 = vmatpush.msra.mxu0 %v221_v32  ;;  %471 = vmatpush.msra.mxu1 %v253_v33  ;;  %v249_v41 = vld [vmem:[%s4146_s24 + $0x140] sm:$0xff]  ;;  %v136_v33 = vld [vmem:[%s4148_s29 + $0x8] sm:$0xff] }
  0x34   :  { %493 = vmatpush.msra.mxu2 %v287_v34  ;;  %514 = vmatpush.msra.mxu3 %v323_v35  ;;  %v283_v42 = vld [vmem:[%s4146_s24 + $0x250] sm:$0xff]  ;;  %v281_v46 = vld [vmem:[%s4146_s24 + $0x240] sm:$0xff] }
  0x35   :  { %449 = vmatpush.msra.mxu0 %v219_v36  ;;  %472 = vmatpush.msra.mxu1 %v251_v37  ;;  %v319_v43 = vld [vmem:[%s4146_s24 + $0x370] sm:$0xff]  ;;  %v317_v47 = vld [vmem:[%s4146_s24 + $0x360] sm:$0xff]  ;;  %v234_v37 = vld [vmem:[%s4146_s24 + $0xc8] sm:$0xff] }
  0x36   :  { %v215_v44 = vld [vmem:[%s4146_s24 + $0x30] sm:$0xff]  ;;  %494 = vmatpush.msra.mxu2 %v285_v38  ;;  %515 = vmatpush.msra.mxu3 %v321_v39  ;;  %v213_v48 = vld [vmem:[%s4146_s24 + $0x20] sm:$0xff] }
  0x37   :  { %v247_v45 = vld [vmem:[%s4146_s24 + $0x130] sm:$0xff]  ;;  %450 = vmatpush.msra.mxu0 %v217_v40  ;;  %473 = vmatpush.msra.mxu1 %v249_v41  ;;  %v245_v49 = vld [vmem:[%s4146_s24 + $0x120] sm:$0xff] }
  0x38   :  { %495 = vmatpush.msra.mxu2 %v283_v42  ;;  %516 = vmatpush.msra.mxu3 %v319_v43  ;;  %v279_v50 = vld [vmem:[%s4146_s24 + $0x230] sm:$0xff]  ;;  %v277_v54 = vld [vmem:[%s4146_s24 + $0x220] sm:$0xff] }
  0x39   :  { %451 = vmatpush.msra.mxu0 %v215_v44  ;;  %474 = vmatpush.msra.mxu1 %v247_v45  ;;  %v315_v51 = vld [vmem:[%s4146_s24 + $0x350] sm:$0xff]  ;;  %v313_v55 = vld [vmem:[%s4146_s24 + $0x340] sm:$0xff] }
  0x3a   :  { %v211_v52 = vld [vmem:[%s4146_s24 + $0x10] sm:$0xff]  ;;  %496 = vmatpush.msra.mxu2 %v281_v46  ;;  %517 = vmatpush.msra.mxu3 %v317_v47  ;;  %v209_v56 = vld [vmem:[%s4146_s24] sm:$0xff] }
  0x3b   :  { %v243_v53 = vld [vmem:[%s4146_s24 + $0x110] sm:$0xff]  ;;  %452 = vmatpush.msra.mxu0 %v213_v48  ;;  %475 = vmatpush.msra.mxu1 %v245_v49  ;;  %v241_v57 = vld [vmem:[%s4146_s24 + $0x100] sm:$0xff]  ;;  %v232_v48 = vld [vmem:[%s4146_s24 + $0xb8] sm:$0xff] }
  0x3c   :  { %497 = vmatpush.msra.mxu2 %v279_v50  ;;  %518 = vmatpush.msra.mxu3 %v315_v51  ;;  %v367_v58 = vld [vmem:[%s4146_s24 + $0x4f0] sm:$0xff]  ;;  %v365_v62 = vld [vmem:[%s4146_s24 + $0x4e0] sm:$0xff]  ;;  %v144_v50 = vld [vmem:[%s4148_s29 + $0x48] sm:$0xff] }
  0x3d   :  { %453 = vmatpush.msra.mxu0 %v211_v52  ;;  %476 = vmatpush.msra.mxu1 %v243_v53  ;;  %v399_v59 = vld [vmem:[%s4146_s24 + $0x5f0] sm:$0xff]  ;;  %v397_v63 = vld [vmem:[%s4146_s24 + $0x5e0] sm:$0xff] }
  0x3e   :  { %498 = vmatpush.msra.mxu2 %v277_v54  ;;  %v275_v60 = vld [vmem:[%s4146_s24 + $0x210] sm:$0xff]  ;;  %519 = vmatpush.msra.mxu3 %v313_v55  ;;  %v273_v0 = vld [vmem:[%s4146_s24 + $0x200] sm:$0xff] }
  0x3f   :  { %v311_v61 = vld [vmem:[%s4146_s24 + $0x330] sm:$0xff]  ;;  %454 = vmatpush.msra.mxu0 %v209_v56  ;;  %477 = vmatpush.msra.mxu1 %v241_v57  ;;  %v309_v1 = vld [vmem:[%s4146_s24 + $0x320] sm:$0xff] }
  0x40   :  { %499 = vmatpush.msra.mxu2 %v275_v60  ;;  %v363_v2 = vld [vmem:[%s4146_s24 + $0x4d0] sm:$0xff]  ;;  %520 = vmatpush.msra.mxu3 %v311_v61  ;;  %v361_v6 = vld [vmem:[%s4146_s24 + $0x4c0] sm:$0xff]  ;;  %v138_v60 = vld [vmem:[%s4148_s29 + $0x18] sm:$0xff] }
  0x41   :  { %531 = vmatpush.msrb.mxu0 %v367_v58  ;;  %554 = vmatpush.msrb.mxu1 %v399_v59  ;;  %v395_v3 = vld [vmem:[%s4146_s24 + $0x5d0] sm:$0xff]  ;;  %v393_v7 = vld [vmem:[%s4146_s24 + $0x5c0] sm:$0xff]  ;;  %v142_v59 = vld [vmem:[%s4148_s29 + $0x38] sm:$0xff] }
  0x42   :  { %v431_v4 = vld [vmem:[%s4146_s24 + $0x6f0] sm:$0xff]  ;;  %500 = vmatpush.msra.mxu2 %v273_v0  ;;  %521 = vmatpush.msra.mxu3 %v309_v1  ;;  %v429_v8 = vld [vmem:[%s4146_s24 + $0x6e0] sm:$0xff] }
  0x43   :  { %532 = vmatpush.msrb.mxu0 %v365_v62  ;;  %555 = vmatpush.msrb.mxu1 %v397_v63  ;;  %v307_v5 = vld [vmem:[%s4146_s24 + $0x310] sm:$0xff]  ;;  %v305_v9 = vld [vmem:[%s4146_s24 + $0x300] sm:$0xff]  ;;  %v230_v62 = vld [vmem:[%s4146_s24 + $0xa8] sm:$0xff] }
  0x44   :  { %v3135_v10 = vld [vmem:[%s4147_s11] sm:$0xff]  ;;  %577 = vmatpush.msrb.mxu2 %v431_v4  ;;  %v359_v11 = vld [vmem:[%s4146_s24 + $0x4b0] sm:$0xff]  ;;  %522 = vmatpush.msra.mxu3 %v307_v5 }
  0x45   :  { %533 = vmatpush.msrb.mxu0 %v363_v2  ;;  %556 = vmatpush.msrb.mxu1 %v395_v3  ;;  %v391_v12 = vld [vmem:[%s4146_s24 + $0x5b0] sm:$0xff]  ;;  %v151_v13 = vperm.slane %v3135_v10, 0  ;;  %v135_v16 = vld [vmem:[%s4148_s29] sm:$0xff]  ;;  %v153_v21 = vperm.slane %v3135_v10, 2  ;;  %v152_v30 = vperm.slane %v3135_v10, 1  ;;  %v154_v56 = vperm.slane %v3135_v10, 3 }
  0x46   :  { %v427_v14 = vld [vmem:[%s4146_s24 + $0x6d0] sm:$0xff]  ;;  %578 = vmatpush.msrb.mxu2 %v429_v8  ;;  %v357_v17 = vld [vmem:[%s4146_s24 + $0x4a0] sm:$0xff]  ;;  %523 = vmatpush.msra.mxu3 %v305_v9  ;;  %v228_v2 = vld [vmem:[%s4146_s24 + $0x98] sm:$0xff] }
  0x47   :  { %534 = vmatpush.msrb.mxu0 %v361_v6  ;;  %557 = vmatpush.msrb.mxu1 %v393_v7  ;;  %v389_v18 = vld [vmem:[%s4146_s24 + $0x5a0] sm:$0xff]  ;;  %v355_v23 = vld [vmem:[%s4146_s24 + $0x490] sm:$0xff]  ;;  %v165_v26 = vsub.f32 %v135_v16, %v151_v13  ;;  %v166_v42 = vsub.f32 %v136_v33, %v152_v30  ;;  %v174_v58 = vsub.f32 %v144_v50, %v153_v21  ;;  %v270_v33 = vld [vmem:[%s4146_s24 + $0x1e8] sm:$0xff] }
  0x48   :  { %v425_v19 = vld [vmem:[%s4146_s24 + $0x6c0] sm:$0xff]  ;;  %579 = vmatpush.msrb.mxu2 %v427_v14  ;;  %v387_v24 = vld [vmem:[%s4146_s24 + $0x590] sm:$0xff]  ;;  %600 = vmatpush.msrb.mxu3 %v240_v15  ;;  %v172_v3 = vsub.f32 %v142_v59, %v151_v13  ;;  %v168_v4 = vsub.f32 %v138_v60, %v154_v56  ;;  %v214_v59 = vld [vmem:[%s4146_s24 + $0x28] sm:$0xff] }
  0x49   :  { %535 = vmatpush.msrb.mxu0 %v359_v11  ;;  %558 = vmatpush.msrb.mxu1 %v391_v12  ;;  %v3169_v22 = vld [vmem:[%s4149_s23] sm:$0xff]  ;;  %v137_v25 = vld [vmem:[%s4148_s29 + $0x10] sm:$0xff]  ;;  %v226_v12 = vld [vmem:[%s4146_s24 + $0x88] sm:$0xff] }
  0x4a   :  { %v181_v27 = vperm.slane %v3169_v22, 0  ;;  %v423_v28 = vld [vmem:[%s4146_s24 + $0x6b0] sm:$0xff]  ;;  %580 = vmatpush.msrb.mxu2 %v425_v19  ;;  %v353_v31 = vld [vmem:[%s4146_s24 + $0x480] sm:$0xff]  ;;  %601 = vmatpush.msrb.mxu3 %v238_v20  ;;  %v167_v35 = vsub.f32 %v137_v25, %v153_v21  ;;  %v183_v36 = vperm.slane %v3169_v22, 2  ;;  %v182_v43 = vperm.slane %v3169_v22, 1  ;;  %v262_v60 = vld [vmem:[%s4146_s24 + $0x1a8] sm:$0xff] }
  0x4b   :  { %536 = vmatpush.msrb.mxu0 %v357_v17  ;;  %559 = vmatpush.msrb.mxu1 %v389_v18  ;;  %v385_v32 = vld [vmem:[%s4146_s24 + $0x580] sm:$0xff]  ;;  %v351_v38 = vld [vmem:[%s4146_s24 + $0x470] sm:$0xff]  ;;  %v184_v5 = vperm.slane %v3169_v22, 3  ;;  %v157_v19 = vperm.slane %v3135_v10, 6  ;;  %v155_v21 = vperm.slane %v3135_v10, 4 }
  0x4c   :  { %v421_v34 = vld [vmem:[%s4146_s24 + $0x6a0] sm:$0xff]  ;;  %581 = vmatpush.msrb.mxu2 %v423_v28  ;;  %v383_v39 = vld [vmem:[%s4146_s24 + $0x570] sm:$0xff]  ;;  %602 = vmatpush.msrb.mxu3 %v236_v29  ;;  %v3214_v40 = vmul.f32 %v181_v27, %v165_v26  ;;  %v3231_v47 = vmul.f32 %v183_v36, %v167_v35  ;;  %v3251_v53 = vmul.f32 %v182_v43, %v166_v42  ;;  %v222_v29 = vld [vmem:[%s4146_s24 + $0x68] sm:$0xff] }
  0x4d   :  { %537 = vmatpush.msrb.mxu0 %v355_v23  ;;  %560 = vmatpush.msrb.mxu1 %v387_v24  ;;  %v419_v41 = vld [vmem:[%s4146_s24 + $0x690] sm:$0xff]  ;;  %v349_v44 = vld [vmem:[%s4146_s24 + $0x460] sm:$0xff]  ;;  %v3303_v9 = vmul.f32 %v183_v36, %v174_v58  ;;  %v3324_v17 = vmul.f32 %v181_v27, %v172_v3  ;;  %v3328_v18 = vmul.f32 %v184_v5, %v168_v4  ;;  %v224_v23 = vld [vmem:[%s4146_s24 + $0x78] sm:$0xff]  ;;  %v185_v36 = vperm.slane %v3169_v22, 4 }
  0x4e   :  { %582 = vmatpush.msrb.mxu2 %v421_v34  ;;  %v381_v45 = vld [vmem:[%s4146_s24 + $0x560] sm:$0xff]  ;;  %603 = vmatpush.msrb.mxu3 %v234_v37  ;;  %v347_v49 = vld [vmem:[%s4146_s24 + $0x450] sm:$0xff]  ;;  %v272_v24 = vld [vmem:[%s4146_s24 + $0x1f8] sm:$0xff] }
  0x4f   :  { %538 = vmatpush.msrb.mxu0 %v353_v31  ;;  %561 = vmatpush.msrb.mxu1 %v385_v32  ;;  %v417_v46 = vld [vmem:[%s4146_s24 + $0x680] sm:$0xff]  ;;  %v379_v51 = vld [vmem:[%s4146_s24 + $0x550] sm:$0xff]  ;;  %v187_v31 = vperm.slane %v3169_v22, 6  ;;  %v156_v32 = vperm.slane %v3135_v10, 5  ;;  %v304_v34 = vld [vmem:[%s4146_s24 + $0x2f8] sm:$0xff] }
  0x50   :  { %583 = vmatpush.msrb.mxu2 %v419_v41  ;;  %455 = vmatmul.f32.vlgmr.msra.gmra.mxu0 %v3214_v40  ;;  %v415_v52 = vld [vmem:[%s4146_s24 + $0x670] sm:$0xff]  ;;  %v345_v54 = vld [vmem:[%s4146_s24 + $0x440] sm:$0xff]  ;;  %v140_v37 = vld [vmem:[%s4148_s29 + $0x28] sm:$0xff] }
  0x51   :  { %539 = vmatpush.msrb.mxu0 %v351_v38  ;;  %562 = vmatpush.msrb.mxu1 %v383_v39  ;;  %v377_v55 = vld [vmem:[%s4146_s24 + $0x540] sm:$0xff]  ;;  %v343_v61 = vld [vmem:[%s4146_s24 + $0x430] sm:$0xff]  ;;  %v220_v39 = vld [vmem:[%s4146_s24 + $0x58] sm:$0xff] }
  0x52   :  { %584 = vmatpush.msrb.mxu2 %v417_v46  ;;  %604 = vmatpush.msrb.mxu3 %v232_v48  ;;  %v413_v57 = vld [vmem:[%s4146_s24 + $0x660] sm:$0xff]  ;;  %v375_v63 = vld [vmem:[%s4146_s24 + $0x530] sm:$0xff]  ;;  %v268_v41 = vld [vmem:[%s4146_s24 + $0x1d8] sm:$0xff]  ;;  %v170_v46 = vsub.f32 %v140_v37, %v156_v32  ;;  %v186_v48 = vperm.slane %v3169_v22, 5 }
  0x53   :  { %540 = vmatpush.msrb.mxu0 %v349_v44  ;;  %563 = vmatpush.msrb.mxu1 %v381_v45  ;;  %v411_v0 = vld [vmem:[%s4146_s24 + $0x650] sm:$0xff]  ;;  %v341_v1 = vld [vmem:[%s4146_s24 + $0x420] sm:$0xff]  ;;  %v302_v42 = vld [vmem:[%s4146_s24 + $0x2e8] sm:$0xff] }
  0x54   :  { %501 = vmatmul.f32.vlgmr.msra.gmra.mxu2 %v3231_v47  ;;  %478 = vmatmul.f32.vlgmr.msra.gmra.mxu1 %v3251_v53  ;;  %v143_v6 = vld [vmem:[%s4148_s29 + $0x40] sm:$0xff]  ;;  %v339_v11 = vld [vmem:[%s4146_s24 + $0x410] sm:$0xff]  ;;  %v218_v45 = vld [vmem:[%s4146_s24 + $0x48] sm:$0xff] }
  0x55   :  { %541 = vmatpush.msrb.mxu0 %v347_v49  ;;  %564 = vmatpush.msrb.mxu1 %v379_v51  ;;  %v373_v7 = vld [vmem:[%s4146_s24 + $0x520] sm:$0xff]  ;;  %v371_v13 = vld [vmem:[%s4146_s24 + $0x510] sm:$0xff]  ;;  %v173_v14 = vsub.f32 %v143_v6, %v152_v30  ;;  %v266_v49 = vld [vmem:[%s4146_s24 + $0x1c8] sm:$0xff] }
  0x56   :  { %585 = vmatpush.msrb.mxu2 %v415_v52  ;;  %605 = vmatpush.msrb.mxu3 %v230_v62  ;;  %v409_v8 = vld [vmem:[%s4146_s24 + $0x640] sm:$0xff]  ;;  %v407_v16 = vld [vmem:[%s4146_s24 + $0x630] sm:$0xff]  ;;  %v300_v51 = vld [vmem:[%s4146_s24 + $0x2d8] sm:$0xff] }
  0x57   :  { %542 = vmatpush.msrb.mxu0 %v345_v54  ;;  %565 = vmatpush.msrb.mxu1 %v377_v55  ;;  %v337_v15 = vld [vmem:[%s4146_s24 + $0x400] sm:$0xff]  ;;  %v141_v20 = vld [vmem:[%s4148_s29 + $0x30] sm:$0xff]  ;;  %v3353_v28 = vmul.f32 %v182_v43, %v173_v14  ;;  %v216_v52 = vld [vmem:[%s4146_s24 + $0x38] sm:$0xff] }
  0x58   :  { %586 = vmatpush.msrb.mxu2 %v413_v57  ;;  %606 = vmatpush.msrb.mxu3 %v228_v2  ;;  %v139_v25 = vld [vmem:[%s4148_s29 + $0x20] sm:$0xff]  ;;  %v171_v30 = vsub.f32 %v141_v20, %v157_v19  ;;  %v403_v38 = vld [vmem:[%s4146_s24 + $0x610] sm:$0xff]  ;;  %v264_v54 = vld [vmem:[%s4146_s24 + $0x1b8] sm:$0xff]  ;;  %v3424_v57 = vmul.f32 %v186_v48, %v170_v46 }
  0x59   :  { %543 = vmatpush.msrb.mxu0 %v343_v61  ;;  %566 = vmatpush.msrb.mxu1 %v375_v63  ;;  %v369_v26 = vld [vmem:[%s4146_s24 + $0x500] sm:$0xff]  ;;  %v169_v35 = vsub.f32 %v139_v25, %v155_v21  ;;  %v298_v55 = vld [vmem:[%s4146_s24 + $0x2c8] sm:$0xff]  ;;  %v336_v58 = vld [vmem:[%s4146_s24 + $0x3f8] sm:$0xff] }
  0x5a   :  { %587 = vmatpush.msrb.mxu2 %v411_v0  ;;  %607 = vmatpush.msrb.mxu3 %v226_v12  ;;  %v405_v27 = vld [vmem:[%s4146_s24 + $0x620] sm:$0xff]  ;;  %v3394_v44 = vmul.f32 %v187_v31, %v171_v30  ;;  %v296_v61 = vld [vmem:[%s4146_s24 + $0x2b8] sm:$0xff]  ;;  %v334_v63 = vld [vmem:[%s4146_s24 + $0x3e8] sm:$0xff] }
  0x5b   :  { %544 = vmatpush.msrb.mxu0 %v341_v1  ;;  %567 = vmatpush.msrb.mxu1 %v373_v7  ;;  %v401_v43 = vld [vmem:[%s4146_s24 + $0x600] sm:$0xff]  ;;  %v3407_v50 = vmul.f32 %v185_v36, %v169_v35  ;;  %v212_v62 = vld [vmem:[%s4146_s24 + $0x18] sm:$0xff]  ;;  %v294_v1 = vld [vmem:[%s4146_s24 + $0x2a8] sm:$0xff] }
  0x5c   :  { %588 = vmatpush.msrb.mxu2 %v409_v8  ;;  %458 = vmatmul.f32.gmra.mxu0 %v3324_v17  ;;  %v260_v0 = vld [vmem:[%s4146_s24 + $0x198] sm:$0xff]  ;;  %v210_v2 = vld [vmem:[%s4146_s24 + $0x8] sm:$0xff]  ;;  %v145_v7 = vld [vmem:[%s4148_s29 + $0x50] sm:$0xff] }
  0x5d   :  { %545 = vmatpush.msrb.mxu0 %v339_v11  ;;  %504 = vmatmul.f32.gmra.mxu2 %v3303_v9  ;;  %v332_v3 = vld [vmem:[%s4146_s24 + $0x3d8] sm:$0xff]  ;;  %v258_v4 = vld [vmem:[%s4146_s24 + $0x188] sm:$0xff]  ;;  %v147_v46 = vld [vmem:[%s4148_s29 + $0x60] sm:$0xff] }
  0x5e   :  { %568 = vmatpush.msrb.mxu1 %v371_v13  ;;  %589 = vmatpush.msrb.mxu2 %v407_v16  ;;  %v292_v6 = vld [vmem:[%s4146_s24 + $0x298] sm:$0xff]  ;;  %v330_v11 = vld [vmem:[%s4146_s24 + $0x3c8] sm:$0xff]  ;;  %v175_v16 = vsub.f32 %v145_v7, %v154_v56 }
  0x5f   :  { %546 = vmatpush.msrb.mxu0 %v337_v15  ;;  %524 = vmatmul.f32.vlgmr.msra.gmra.mxu3 %v3328_v18  ;;  %v368_v8 = vld [vmem:[%s4146_s24 + $0x4f8] sm:$0xff]  ;;  %v290_v13 = vld [vmem:[%s4146_s24 + $0x288] sm:$0xff] }
  0x60   :  { %608 = vmatpush.msrb.mxu3 %v224_v23  ;;  %569 = vmatpush.msrb.mxu1 %v369_v26  ;;  %v256_v12 = vld [vmem:[%s4146_s24 + $0x178] sm:$0xff]  ;;  %v366_v14 = vld [vmem:[%s4146_s24 + $0x4e8] sm:$0xff]  ;;  %v3513_v30 = vmul.f32 %v184_v5, %v175_v16 }
  0x61   :  { %623 = vmatpush.msra.mxu0 %v272_v24  ;;  %590 = vmatpush.msrb.mxu2 %v405_v27  ;;  %v328_v15 = vld [vmem:[%s4146_s24 + $0x3b8] sm:$0xff]  ;;  %v254_v20 = vld [vmem:[%s4146_s24 + $0x168] sm:$0xff] }
  0x62   :  { %481 = vmatmul.f32.gmra.mxu1 %v3353_v28  ;;  %609 = vmatpush.msrb.mxu3 %v222_v29  ;;  %v288_v23 = vld [vmem:[%s4146_s24 + $0x278] sm:$0xff]  ;;  %v148_v24 = vld [vmem:[%s4148_s29 + $0x68] sm:$0xff] }
  0x63   :  { %624 = vmatpush.msra.mxu0 %v270_v33  ;;  %646 = vmatpush.msra.mxu1 %v304_v34  ;;  %v364_v56 = vld [vmem:[%s4146_s24 + $0x4d8] sm:$0xff]  ;;  %v326_v25 = vld [vmem:[%s4146_s24 + $0x3a8] sm:$0xff]  ;;  %v178_v34 = vsub.f32 %v148_v24, %v157_v19 }
  0x64   :  { %591 = vmatpush.msrb.mxu2 %v403_v38  ;;  %610 = vmatpush.msrb.mxu3 %v220_v39  ;;  %v252_v26 = vld [vmem:[%s4146_s24 + $0x158] sm:$0xff]  ;;  %v286_v27 = vld [vmem:[%s4146_s24 + $0x268] sm:$0xff] }
  0x65   :  { %625 = vmatpush.msra.mxu0 %v268_v41  ;;  %647 = vmatpush.msra.mxu1 %v302_v42  ;;  %v362_v29 = vld [vmem:[%s4146_s24 + $0x4c8] sm:$0xff]  ;;  %v324_v33 = vld [vmem:[%s4146_s24 + $0x398] sm:$0xff] }
  0x66   :  { %592 = vmatpush.msrb.mxu2 %v401_v43  ;;  %611 = vmatpush.msrb.mxu3 %v218_v45  ;;  %v250_v35 = vld [vmem:[%s4146_s24 + $0x148] sm:$0xff]  ;;  %v146_v37 = vld [vmem:[%s4148_s29 + $0x58] sm:$0xff]  ;;  %v3547_v43 = vmul.f32 %v187_v31, %v178_v34 }
  0x67   :  { %593 = vmatmul.f32.vlgmr.msrb.gmra.mxu2 %v3394_v44  ;;  %626 = vmatpush.msra.mxu0 %v266_v49  ;;  %v284_v5 = vld [vmem:[%s4146_s24 + $0x258] sm:$0xff]  ;;  %v322_v39 = vld [vmem:[%s4146_s24 + $0x388] sm:$0xff]  ;;  %v176_v45 = vsub.f32 %v146_v37, %v155_v21 }
  0x68   :  { %648 = vmatpush.msra.mxu1 %v300_v51  ;;  %547 = vmatmul.f32.vlgmr.msrb.gmra.mxu0 %v3407_v50  ;;  %v360_v19 = vld [vmem:[%s4146_s24 + $0x4b8] sm:$0xff]  ;;  %v282_v41 = vld [vmem:[%s4146_s24 + $0x248] sm:$0xff] }
  0x69   :  { %612 = vmatpush.msrb.mxu3 %v216_v52  ;;  %627 = vmatpush.msra.mxu0 %v264_v54  ;;  %v248_v38 = vld [vmem:[%s4146_s24 + $0x138] sm:$0xff]  ;;  %v358_v42 = vld [vmem:[%s4146_s24 + $0x4a8] sm:$0xff]  ;;  %v177_v54 = vsub.f32 %v147_v46, %v156_v32 }
  0x6a   :  { %649 = vmatpush.msra.mxu1 %v298_v55  ;;  %669 = vmatpush.msra.mxu2 %v336_v58  ;;  %v246_v49 = vld [vmem:[%s4146_s24 + $0x128] sm:$0xff]  ;;  %v280_v51 = vld [vmem:[%s4146_s24 + $0x238] sm:$0xff] }
  0x6b   :  { %570 = vmatmul.f32.vlgmr.msrb.gmra.mxu1 %v3424_v57  ;;  %613 = vmatpush.msrb.mxu3 %v214_v59  ;;  %v356_v21 = vld [vmem:[%s4146_s24 + $0x498] sm:$0xff]  ;;  %v278_v55 = vld [vmem:[%s4146_s24 + $0x228] sm:$0xff]  ;;  %v3580_v59 = vmul.f32 %v185_v36, %v176_v45 }
  0x6c   :  { %628 = vmatpush.msra.mxu0 %v262_v60  ;;  %650 = vmatpush.msra.mxu1 %v296_v61  ;;  %v244_v31 = vld [vmem:[%s4146_s24 + $0x118] sm:$0xff]  ;;  %v354_v58 = vld [vmem:[%s4146_s24 + $0x488] sm:$0xff]  ;;  %v3596_v61 = vmul.f32 %v186_v48, %v177_v54 }
  0x6d   :  { %614 = vmatpush.msrb.mxu3 %v212_v62  ;;  %670 = vmatpush.msra.mxu2 %v334_v63  ;;  %v320_v52 = vld [vmem:[%s4146_s24 + $0x378] sm:$0xff]  ;;  %v242_v10 = vld [vmem:[%s4146_s24 + $0x108] sm:$0xff] }
  0x6e   :  { %629 = vmatpush.msra.mxu0 %v260_v0  ;;  %651 = vmatpush.msra.mxu1 %v294_v1  ;;  %v276_v32 = vld [vmem:[%s4146_s24 + $0x218] sm:$0xff]  ;;  %v318_v60 = vld [vmem:[%s4146_s24 + $0x368] sm:$0xff] }
  0x6f   :  { %615 = vmatpush.msrb.mxu3 %v210_v2  ;;  %671 = vmatpush.msra.mxu2 %v332_v3  ;;  %v352_v36 = vld [vmem:[%s4146_s24 + $0x478] sm:$0xff]  ;;  %v274_v63 = vld [vmem:[%s4146_s24 + $0x208] sm:$0xff] }
  0x70   :  { %630 = vmatpush.msra.mxu0 %v258_v4  ;;  %652 = vmatpush.msra.mxu1 %v292_v6  ;;  %v400_v62 = vld [vmem:[%s4146_s24 + $0x5f8] sm:$0xff]  ;;  %v398_v48 = vld [vmem:[%s4146_s24 + $0x5e8] sm:$0xff] }
  0x71   :  { %692 = vmatpush.msra.mxu3 %v368_v8  ;;  %672 = vmatpush.msra.mxu2 %v330_v11  ;;  %v316_v22 = vld [vmem:[%s4146_s24 + $0x358] sm:$0xff]  ;;  %v314_v1 = vld [vmem:[%s4146_s24 + $0x348] sm:$0xff] }
  0x72   :  { %631 = vmatpush.msra.mxu0 %v256_v12  ;;  %653 = vmatpush.msra.mxu1 %v290_v13  ;;  %v432_v0 = vld [vmem:[%s4146_s24 + $0x6f8] sm:$0xff]  ;;  %v430_v4 = vld [vmem:[%s4146_s24 + $0x6e8] sm:$0xff] }
  0x73   :  { %693 = vmatpush.msra.mxu3 %v366_v14  ;;  %673 = vmatpush.msra.mxu2 %v328_v15  ;;  %v348_v2 = vld [vmem:[%s4146_s24 + $0x458] sm:$0xff]  ;;  %v346_v7 = vld [vmem:[%s4146_s24 + $0x448] sm:$0xff] }
  0x74   :  { %632 = vmatpush.msra.mxu0 %v254_v20  ;;  %654 = vmatpush.msra.mxu1 %v288_v23  ;;  %v396_v3 = vld [vmem:[%s4146_s24 + $0x5d8] sm:$0xff]  ;;  %v394_v8 = vld [vmem:[%s4146_s24 + $0x5c8] sm:$0xff] }
  0x75   :  { %694 = vmatpush.msra.mxu3 %v364_v56  ;;  %674 = vmatpush.msra.mxu2 %v326_v25  ;;  %v312_v6 = vld [vmem:[%s4146_s24 + $0x338] sm:$0xff]  ;;  %v310_v12 = vld [vmem:[%s4146_s24 + $0x328] sm:$0xff] }
  0x76   :  { %633 = vmatpush.msra.mxu0 %v252_v26  ;;  %655 = vmatpush.msra.mxu1 %v286_v27  ;;  %v428_v11 = vld [vmem:[%s4146_s24 + $0x6d8] sm:$0xff]  ;;  %v426_v15 = vld [vmem:[%s4146_s24 + $0x6c8] sm:$0xff] }
  0x77   :  { %695 = vmatpush.msra.mxu3 %v362_v29  ;;  %675 = vmatpush.msra.mxu2 %v324_v33  ;;  %v344_v13 = vld [vmem:[%s4146_s24 + $0x438] sm:$0xff]  ;;  %v342_v20 = vld [vmem:[%s4146_s24 + $0x428] sm:$0xff] }
  0x78   :  { %527 = vmatmul.f32.gmra.mxu3 %v3513_v30  ;;  %634 = vmatpush.msra.mxu0 %v250_v35  ;;  %v392_v14 = vld [vmem:[%s4146_s24 + $0x5b8] sm:$0xff]  ;;  %v390_v23 = vld [vmem:[%s4146_s24 + $0x5a8] sm:$0xff] }
  0x79   :  { %656 = vmatpush.msra.mxu1 %v284_v5  ;;  %696 = vmatpush.msra.mxu3 %v360_v19  ;;  %v308_v16 = vld [vmem:[%s4146_s24 + $0x318] sm:$0xff]  ;;  %v422_v26 = vld [vmem:[%s4146_s24 + $0x6a8] sm:$0xff] }
  0x7a   :  { %635 = vmatpush.msra.mxu0 %v248_v38  ;;  %676 = vmatpush.msra.mxu2 %v322_v39  ;;  %v424_v24 = vld [vmem:[%s4146_s24 + $0x6b8] sm:$0xff]  ;;  %v338_v27 = vld [vmem:[%s4146_s24 + $0x408] sm:$0xff] }
  0x7b   :  { %657 = vmatpush.msra.mxu1 %v282_v41  ;;  %697 = vmatpush.msra.mxu3 %v358_v42  ;;  %v340_v56 = vld [vmem:[%s4146_s24 + $0x418] sm:$0xff]  ;;  %v386_v29 = vld [vmem:[%s4146_s24 + $0x588] sm:$0xff] }
  0x7c   :  { %636 = vmatpush.msra.mxu0 %v246_v49  ;;  %596 = vmatmul.f32.gmra.mxu2 %v3547_v43  ;;  %v388_v25 = vld [vmem:[%s4146_s24 + $0x598] sm:$0xff]  ;;  %v418_v35 = vld [vmem:[%s4146_s24 + $0x688] sm:$0xff] }
  0x7d   :  { %658 = vmatpush.msra.mxu1 %v280_v51  ;;  %698 = vmatpush.msra.mxu3 %v356_v21  ;;  %v420_v33 = vld [vmem:[%s4146_s24 + $0x698] sm:$0xff]  ;;  %v382_v37 = vld [vmem:[%s4146_s24 + $0x568] sm:$0xff] }
  0x7e   :  { %637 = vmatpush.msra.mxu0 %v244_v31  ;;  %677 = vmatpush.msra.mxu2 %v320_v52  ;;  %v384_v34 = vld [vmem:[%s4146_s24 + $0x578] sm:$0xff]  ;;  %v410_v38 = vld [vmem:[%s4146_s24 + $0x648] sm:$0xff] }
  0x7f   :  { %659 = vmatpush.msra.mxu1 %v278_v55  ;;  %699 = vmatpush.msra.mxu3 %v354_v58  ;;  %v380_v5 = vld [vmem:[%s4146_s24 + $0x558] sm:$0xff]  ;;  %v374_v39 = vld [vmem:[%s4146_s24 + $0x528] sm:$0xff] }
  0x80   :  { %550 = vmatmul.f32.gmra.mxu0 %v3580_v59  ;;  %616 = vmatmul.f32.vlgmr.msrb.gmra.mxu3 %v3214_v40  ;;  %v350_v40 = vld [vmem:[%s4146_s24 + $0x468] sm:$0xff]  ;;  %v412_v19 = vld [vmem:[%s4146_s24 + $0x658] sm:$0xff] }
  0x81   :  { %638 = vmatpush.msra.mxu0 %v242_v10  ;;  %660 = vmatpush.msra.mxu1 %v276_v32  ;;  %v372_v41 = vld [vmem:[%s4146_s24 + $0x518] sm:$0xff]  ;;  %v370_v42 = vld [vmem:[%s4146_s24 + $0x508] sm:$0xff] }
  0x82   :  { %678 = vmatpush.msra.mxu2 %v318_v60  ;;  %700 = vmatpush.msra.mxu3 %v352_v36  ;;  %v404_v45 = vld [vmem:[%s4146_s24 + $0x618] sm:$0xff] }
  0x83   :  { %715 = vmatpush.msrb.mxu0 %v400_v62  ;;  %573 = vmatmul.f32.gmra.mxu1 %v3596_v61 }
  0x84   :  { %661 = vmatpush.msra.mxu1 %v274_v63  ;;  %679 = vmatpush.msra.mxu2 %v316_v22 }
  0x85   :  { %701 = vmatpush.msra.mxu3 %v350_v40  ;;  %716 = vmatpush.msrb.mxu0 %v398_v48 }
  0x86   :  { %738 = vmatpush.msrb.mxu1 %v432_v0  ;;  %680 = vmatpush.msra.mxu2 %v314_v1 }
  0x87   :  { %702 = vmatpush.msra.mxu3 %v348_v2  ;;  %717 = vmatpush.msrb.mxu0 %v396_v3 }
  0x88   :  { %739 = vmatpush.msrb.mxu1 %v430_v4  ;;  %681 = vmatpush.msra.mxu2 %v312_v6 }
  0x89   :  { %703 = vmatpush.msra.mxu3 %v346_v7  ;;  %718 = vmatpush.msrb.mxu0 %v394_v8 }
  0x8a   :  { %740 = vmatpush.msrb.mxu1 %v428_v11  ;;  %619 = vmatmul.f32.gmra.mxu3 %v3324_v17  ;;  %v306_v17 = vld [vmem:[%s4146_s24 + $0x308] sm:$0xff] }
  0x8b   :  { %682 = vmatpush.msra.mxu2 %v310_v12  ;;  %704 = vmatpush.msra.mxu3 %v344_v13 }
  0x8c   :  { %719 = vmatpush.msrb.mxu0 %v392_v14  ;;  %741 = vmatpush.msrb.mxu1 %v426_v15 }
  0x8d   :  { %683 = vmatpush.msra.mxu2 %v308_v16  ;;  %705 = vmatpush.msra.mxu3 %v342_v20 }
  0x8e   :  { %720 = vmatpush.msrb.mxu0 %v390_v23  ;;  %742 = vmatpush.msrb.mxu1 %v424_v24 }
  0x8f   :  { %684 = vmatpush.msra.mxu2 %v306_v17  ;;  %706 = vmatpush.msra.mxu3 %v340_v56 }
  0x90   :  { %721 = vmatpush.msrb.mxu0 %v388_v25  ;;  %743 = vmatpush.msrb.mxu1 %v422_v26 }
  0x91   :  { %685 = vmatmul.f32.vlgmr.msra.gmra.mxu2 %v3328_v18  ;;  %707 = vmatpush.msra.mxu3 %v338_v27  ;;  %v416_v18 = vld [vmem:[%s4146_s24 + $0x678] sm:$0xff] }
  0x92   :  { %722 = vmatpush.msrb.mxu0 %v386_v29  ;;  %744 = vmatpush.msrb.mxu1 %v420_v33 }
  0x93   :  { %639 = vmatmul.f32.vlgmr.msra.gmra.mxu0 %v3251_v53  ;;  %708 = vmatmul.f32.vlgmr.msra.gmra.mxu3 %v3407_v50  ;;  %v414_v53 = vld [vmem:[%s4146_s24 + $0x668] sm:$0xff] }
  0x94   :  { %723 = vmatpush.msrb.mxu0 %v384_v34  ;;  %745 = vmatpush.msrb.mxu1 %v418_v35  ;;  %v378_v50 = vld [vmem:[%s4146_s24 + $0x548] sm:$0xff] }
  0x95   :  { %662 = vmatmul.f32.vlgmr.msra.gmra.mxu1 %v3231_v47  ;;  %v376_v47 = vld [vmem:[%s4146_s24 + $0x538] sm:$0xff] }
  0x96   :  { %724 = vmatpush.msrb.mxu0 %v382_v37  ;;  %746 = vmatpush.msrb.mxu1 %v416_v18 }
  0x98   :  { %725 = vmatpush.msrb.mxu0 %v380_v5  ;;  %747 = vmatpush.msrb.mxu1 %v414_v53 }
  0x99   :  { %688 = vmatmul.f32.gmra.mxu2 %v3513_v30  ;;  %v408_v30 = vld [vmem:[%s4146_s24 + $0x638] sm:$0xff] }
  0x9a   :  { %726 = vmatpush.msrb.mxu0 %v378_v50  ;;  %748 = vmatpush.msrb.mxu1 %v412_v19 }
  0x9b   :  { %642 = vmatmul.f32.gmra.mxu0 %v3353_v28  ;;  %711 = vmatmul.f32.gmra.mxu3 %v3580_v59  ;;  %v406_v28 = vld [vmem:[%s4146_s24 + $0x628] sm:$0xff] }
  0x9c   :  { %727 = vmatpush.msrb.mxu0 %v376_v47  ;;  %749 = vmatpush.msrb.mxu1 %v410_v38 }
  0x9d   :  { %665 = vmatmul.f32.gmra.mxu1 %v3303_v9  ;;  %v402_v9 = vld [vmem:[%s4146_s24 + $0x608] sm:$0xff] }
  0x9e   :  { %728 = vmatpush.msrb.mxu0 %v374_v39  ;;  %750 = vmatpush.msrb.mxu1 %v408_v30 }
  0xa0   :  { %729 = vmatpush.msrb.mxu0 %v372_v41  ;;  %751 = vmatpush.msrb.mxu1 %v406_v28 }
  0xa2   :  { %730 = vmatpush.msrb.mxu0 %v370_v42  ;;  %752 = vmatpush.msrb.mxu1 %v404_v45 }
  0xa3   :  { %731 = vmatmul.f32.vlgmr.msrb.gmra.mxu0 %v3424_v57 }
  0xa4   :  { %753 = vmatpush.msrb.mxu1 %v402_v9 }
  0xa5   :  { %754 = vmatmul.f32.vlgmr.msrb.gmra.mxu1 %v3394_v44  ;;  %v433_v44 = vld [vmem:[%s4124_s4] sm:$0x3] }
  0xa6   :  { %v435_v46 = vperm.slane %v433_v44, 0  ;;  %v436_v13 = vperm.slane %v433_v44, 1 }
  0xab   :  { %734 = vmatmul.f32.gmra.mxu0 %v3596_v61 }
  0xad   :  { %757 = vmatmul.f32.gmra.mxu1 %v3547_v43 }
  0xcd   :  { %v456_v57 = vpop.f32.mrf.mxu0 }
  0xce   :  { %v457_v51 = vadd.f32 %v456_v57, %v435_v46 }
  0xd1   :  { %v479_v49 = vpop.f32.mrf.mxu1 }
  0xd2   :  { %v480_v31 = vadd.f32 %v479_v49, %v457_v51 }
  0xd7   :  { %v502_v21 = vpop.f32.mrf.mxu2 }
  0xd8   :  { %v503_v54 = vadd.f32 %v502_v21, %v480_v31 }
  0xd9   :  { %v459_v52 = vpop.f32.mrf.mxu0 }
  0xda   :  { %v460_v22 = vadd.f32 %v459_v52, %v435_v46 }
  0xdf   :  { %v482_v55 = vpop.f32.mrf.mxu1 }
  0xe0   :  { %v505_v58 = vpop.f32.mrf.mxu2  ;;  %v483_v40 = vadd.f32 %v482_v55, %v460_v22 }
  0xe2   :  { %v525_v59 = vpop.f32.mrf.mxu3  ;;  %v506_v48 = vadd.f32 %v505_v58, %v483_v40 }
  0xe3   :  { %v526_v10 = vadd.f32 %v525_v59, %v503_v54 }
  0xe5   :  { %v548_v32 = vpop.f32.mrf.mxu0 }
  0xe6   :  { %v549_v43 = vadd.f32 %v548_v32, %v526_v10 }
  0xe8   :  { %v571_v60 = vpop.f32.mrf.mxu1 }
  0xe9   :  { %v572_v36 = vadd.f32 %v571_v60, %v549_v43 }
  0xea   :  { %v594_v61 = vpop.f32.mrf.mxu2 }
  0xeb   :  { %v3763_v62 = vadd.f32 %v594_v61, %v572_v36 }
  0xed   :  { %v761_v63 = vmax.f32 %v3763_v62, 0.0 }
  0xfb   :  { %v528_v0 = vpop.f32.mrf.mxu3 }
  0xfc   :  { %v529_v1 = vadd.f32 %v528_v0, %v506_v48 }
  0xfd   :  { %v551_v2 = vpop.f32.mrf.mxu0 }
  0xfe   :  { %v552_v3 = vadd.f32 %v551_v2, %v529_v1 }
  0xff   :  { %v597_v6 = vpop.f32.mrf.mxu2 }
 0x100   :  { %v574_v4 = vpop.f32.mrf.mxu1 }
 0x101   :  { %v575_v7 = vadd.f32 %v574_v4, %v552_v3 }
 0x103   :  { %v3766_v8 = vadd.f32 %v597_v6, %v575_v7  ;;  %v617_v12 = vpop.f32.mrf.mxu3 }
 0x104   :  { %v618_v14 = vadd.f32 %v617_v12, %v436_v13 }
 0x105   :  { %v763_v11 = vmax.f32 %v3766_v8, 0.0 }
 0x10d   :  { %v620_v15 = vpop.f32.mrf.mxu3 }
 0x10e   :  { %v621_v17 = vadd.f32 %v620_v15, %v436_v13 }
 0x110   :  { %v640_v16 = vpop.f32.mrf.mxu0 }
 0x111   :  { %v641_v23 = vadd.f32 %v640_v16, %v618_v14 }
 0x112   :  { %v663_v20 = vpop.f32.mrf.mxu1 }
 0x113   :  { %v664_v56 = vadd.f32 %v663_v20, %v641_v23 }
 0x114   :  { %v686_v24 = vpop.f32.mrf.mxu2 }
 0x115   :  { %v687_v29 = vadd.f32 %v686_v24, %v664_v56 }
 0x116   :  { %v709_v26 = vpop.f32.mrf.mxu3 }
 0x117   :  { %v710_v34 = vadd.f32 %v709_v26, %v687_v29 }
 0x118   :  { %v643_v25 = vpop.f32.mrf.mxu0 }
 0x119   :  { %v644_v33 = vadd.f32 %v643_v25, %v621_v17 }
 0x11a   :  { %v666_v27 = vpop.f32.mrf.mxu1 }
 0x11b   :  { %v667_v35 = vadd.f32 %v666_v27, %v644_v33 }
 0x11c   :  { %v689_v37 = vpop.f32.mrf.mxu2 }
 0x11d   :  { %v690_v50 = vadd.f32 %v689_v37, %v667_v35 }
 0x11e   :  { %v712_v47 = vpop.f32.mrf.mxu3 }
 0x11f   :  { %v713_v39 = vadd.f32 %v712_v47, %v690_v50 }
 0x120   :  { %v732_v18 = vpop.f32.mrf.mxu0 }
 0x121   :  { %v733_v5 = vadd.f32 %v732_v18, %v710_v34 }
 0x122   :  { %v755_v53 = vpop.f32.mrf.mxu1 }
 0x123   :  { %v3769_v19 = vadd.f32 %v755_v53, %v733_v5 }
 0x125   :  { %v762_v38 = vmax.f32 %v3769_v19, 0.0 }
 0x128   :  { %v735_v30 = vpop.f32.mrf.mxu0 }
 0x129   :  { %v736_v41 = vadd.f32 %v735_v30, %v713_v39 }
 0x12a   :  { %v758_v28 = vpop.f32.mrf.mxu1 }
 0x12b   :  { %v3772_v42 = vadd.f32 %v758_v28, %v736_v41 }
 0x12d   :  { %v764_v45 = vmax.f32 %v3772_v42, 0.0 }
 0x12e   :  { %2778 = dma.done.wait [#allocation4], 8192 }
 0x12f   :  { %2779 = vsyncadd [#allocation4], 4294959104  ;;  %s778_s27 = sshll.u32 %s4129_s9, 4  ;;  %s2792_s29 = smov [#allocation2 + $0x200]   ;;  %v848_v62 = vld [vmem:[%s4126_s6] sm:$0x3]  ;;  %s779_s27 = int_to_ptr.hbm [resolvable:$true] %s778_s27 }
 0x130   :  { %s780_s12 = sshll.u32 %s2792_s29, 4  ;;  %v850_v8 = vperm.slane %v848_v62, 0  ;;  %s781_s12 = int_to_ptr.vmem [resolvable:$true] %s780_s12 }
 0x131   :  { %783 = dma.hbm_to_vmem [thread:$0]  %s779_s27, 8192, %s781_s12, [#allocation4 + $0x1] }
 0x132   :  { %v814_v9 = vld [vmem:[#allocation2 + $0xf0] sm:$0xff]  ;;  %v815_v44 = vld [vmem:[#allocation2 + $0xf8] sm:$0xff]  ;;  %v812_v57 = vld [vmem:[#allocation2 + $0xe0] sm:$0xff] }
 0x133   :  { %854 = vmatpush.msrb.mxu2 %v814_v9  ;;  %900 = vmatpush.msra.mxu0 %v815_v44  ;;  %v846_v46 = vld [vmem:[#allocation2 + $0x1f0] sm:$0xff]  ;;  %v813_v49 = vld [vmem:[#allocation2 + $0xe8] sm:$0xff]  ;;  %v847_v51 = vld [vmem:[#allocation2 + $0x1f8] sm:$0xff] }
 0x134   :  { %877 = vmatpush.msrb.mxu3 %v846_v46  ;;  %923 = vmatpush.msra.mxu1 %v847_v51  ;;  %v810_v21 = vld [vmem:[#allocation2 + $0xd0] sm:$0xff]  ;;  %v844_v31 = vld [vmem:[#allocation2 + $0x1e0] sm:$0xff]  ;;  %v811_v52 = vld [vmem:[#allocation2 + $0xd8] sm:$0xff] }
 0x135   :  { %855 = vmatpush.msrb.mxu2 %v812_v57  ;;  %901 = vmatpush.msra.mxu0 %v813_v49  ;;  %v845_v54 = vld [vmem:[#allocation2 + $0x1e8] sm:$0xff]  ;;  %v842_v55 = vld [vmem:[#allocation2 + $0x1d0] sm:$0xff]  ;;  %v808_v58 = vld [vmem:[#allocation2 + $0xc0] sm:$0xff] }
 0x136   :  { %878 = vmatpush.msrb.mxu3 %v844_v31  ;;  %924 = vmatpush.msra.mxu1 %v845_v54  ;;  %v809_v59 = vld [vmem:[#allocation2 + $0xc8] sm:$0xff]  ;;  %v843_v10 = vld [vmem:[#allocation2 + $0x1d8] sm:$0xff]  ;;  %v840_v32 = vld [vmem:[#allocation2 + $0x1c0] sm:$0xff] }
 0x137   :  { %856 = vmatpush.msrb.mxu2 %v810_v21  ;;  %902 = vmatpush.msra.mxu0 %v811_v52  ;;  %v841_v43 = vld [vmem:[#allocation2 + $0x1c8] sm:$0xff]  ;;  %v806_v60 = vld [vmem:[#allocation2 + $0xb0] sm:$0xff]  ;;  %v807_v36 = vld [vmem:[#allocation2 + $0xb8] sm:$0xff] }
 0x138   :  { %879 = vmatpush.msrb.mxu3 %v842_v55  ;;  %925 = vmatpush.msra.mxu1 %v843_v10  ;;  %v838_v61 = vld [vmem:[#allocation2 + $0x1b0] sm:$0xff]  ;;  %v839_v22 = vld [vmem:[#allocation2 + $0x1b8] sm:$0xff]  ;;  %v804_v40 = vld [vmem:[#allocation2 + $0xa0] sm:$0xff] }
 0x139   :  { %857 = vmatpush.msrb.mxu2 %v808_v58  ;;  %903 = vmatpush.msra.mxu0 %v809_v59  ;;  %v805_v48 = vld [vmem:[#allocation2 + $0xa8] sm:$0xff]  ;;  %v836_v0 = vld [vmem:[#allocation2 + $0x1a0] sm:$0xff]  ;;  %v802_v2 = vld [vmem:[#allocation2 + $0x90] sm:$0xff] }
 0x13a   :  { %880 = vmatpush.msrb.mxu3 %v840_v32  ;;  %926 = vmatpush.msra.mxu1 %v841_v43  ;;  %v837_v1 = vld [vmem:[#allocation2 + $0x1a8] sm:$0xff]  ;;  %v803_v3 = vld [vmem:[#allocation2 + $0x98] sm:$0xff]  ;;  %v834_v4 = vld [vmem:[#allocation2 + $0x190] sm:$0xff] }
 0x13b   :  { %858 = vmatpush.msrb.mxu2 %v806_v60  ;;  %904 = vmatpush.msra.mxu0 %v807_v36  ;;  %v835_v6 = vld [vmem:[#allocation2 + $0x198] sm:$0xff]  ;;  %v800_v7 = vld [vmem:[#allocation2 + $0x80] sm:$0xff]  ;;  %v801_v12 = vld [vmem:[#allocation2 + $0x88] sm:$0xff] }
 0x13c   :  { %881 = vmatpush.msrb.mxu3 %v838_v61  ;;  %927 = vmatpush.msra.mxu1 %v839_v22  ;;  %v832_v13 = vld [vmem:[#allocation2 + $0x180] sm:$0xff]  ;;  %v833_v14 = vld [vmem:[#allocation2 + $0x188] sm:$0xff]  ;;  %v798_v15 = vld [vmem:[#allocation2 + $0x70] sm:$0xff] }
 0x13d   :  { %859 = vmatpush.msrb.mxu2 %v804_v40  ;;  %905 = vmatpush.msra.mxu0 %v805_v48  ;;  %v799_v16 = vld [vmem:[#allocation2 + $0x78] sm:$0xff]  ;;  %v830_v20 = vld [vmem:[#allocation2 + $0x170] sm:$0xff]  ;;  %v796_v24 = vld [vmem:[#allocation2 + $0x60] sm:$0xff] }
 0x13e   :  { %882 = vmatpush.msrb.mxu3 %v836_v0  ;;  %928 = vmatpush.msra.mxu1 %v837_v1  ;;  %v831_v23 = vld [vmem:[#allocation2 + $0x178] sm:$0xff]  ;;  %v797_v17 = vld [vmem:[#allocation2 + $0x68] sm:$0xff]  ;;  %v828_v56 = vld [vmem:[#allocation2 + $0x160] sm:$0xff] }
 0x13f   :  { %860 = vmatpush.msrb.mxu2 %v802_v2  ;;  %906 = vmatpush.msra.mxu0 %v803_v3  ;;  %v829_v25 = vld [vmem:[#allocation2 + $0x168] sm:$0xff]  ;;  %v794_v26 = vld [vmem:[#allocation2 + $0x50] sm:$0xff]  ;;  %v795_v27 = vld [vmem:[#allocation2 + $0x58] sm:$0xff] }
 0x140   :  { %883 = vmatpush.msrb.mxu3 %v834_v4  ;;  %929 = vmatpush.msra.mxu1 %v835_v6  ;;  %v826_v29 = vld [vmem:[#allocation2 + $0x150] sm:$0xff]  ;;  %v827_v33 = vld [vmem:[#allocation2 + $0x158] sm:$0xff]  ;;  %v792_v34 = vld [vmem:[#allocation2 + $0x40] sm:$0xff] }
 0x141   :  { %861 = vmatpush.msrb.mxu2 %v800_v7  ;;  %907 = vmatpush.msra.mxu0 %v801_v12  ;;  %v793_v35 = vld [vmem:[#allocation2 + $0x48] sm:$0xff]  ;;  %v824_v37 = vld [vmem:[#allocation2 + $0x140] sm:$0xff]  ;;  %v790_v5 = vld [vmem:[#allocation2 + $0x30] sm:$0xff] }
 0x142   :  { %884 = vmatpush.msrb.mxu3 %v832_v13  ;;  %930 = vmatpush.msra.mxu1 %v833_v14  ;;  %v825_v18 = vld [vmem:[#allocation2 + $0x148] sm:$0xff]  ;;  %v791_v53 = vld [vmem:[#allocation2 + $0x38] sm:$0xff]  ;;  %v822_v50 = vld [vmem:[#allocation2 + $0x130] sm:$0xff] }
 0x143   :  { %862 = vmatpush.msrb.mxu2 %v798_v15  ;;  %908 = vmatpush.msra.mxu0 %v799_v16  ;;  %v823_v47 = vld [vmem:[#allocation2 + $0x138] sm:$0xff]  ;;  %v788_v39 = vld [vmem:[#allocation2 + $0x20] sm:$0xff]  ;;  %v789_v30 = vld [vmem:[#allocation2 + $0x28] sm:$0xff] }
 0x144   :  { %885 = vmatpush.msrb.mxu3 %v830_v20  ;;  %931 = vmatpush.msra.mxu1 %v831_v23  ;;  %v820_v41 = vld [vmem:[#allocation2 + $0x120] sm:$0xff]  ;;  %v821_v28 = vld [vmem:[#allocation2 + $0x128] sm:$0xff]  ;;  %v786_v9 = vld [vmem:[#allocation2 + $0x10] sm:$0xff] }
 0x145   :  { %863 = vmatpush.msrb.mxu2 %v796_v24  ;;  %909 = vmatpush.msra.mxu0 %v797_v17  ;;  %v787_v44 = vld [vmem:[#allocation2 + $0x18] sm:$0xff]  ;;  %v818_v57 = vld [vmem:[#allocation2 + $0x110] sm:$0xff]  ;;  %v784_v49 = vld [vmem:[#allocation2] sm:$0xff] }
 0x146   :  { %886 = vmatpush.msrb.mxu3 %v828_v56  ;;  %932 = vmatpush.msra.mxu1 %v829_v25  ;;  %v819_v46 = vld [vmem:[#allocation2 + $0x118] sm:$0xff]  ;;  %v785_v51 = vld [vmem:[#allocation2 + $0x8] sm:$0xff]  ;;  %v816_v21 = vld [vmem:[#allocation2 + $0x100] sm:$0xff] }
 0x147   :  { %864 = vmatpush.msrb.mxu2 %v794_v26  ;;  %910 = vmatpush.msra.mxu0 %v795_v27  ;;  %v817_v31 = vld [vmem:[#allocation2 + $0x108] sm:$0xff] }
 0x148   :  { %887 = vmatpush.msrb.mxu3 %v826_v29  ;;  %933 = vmatpush.msra.mxu1 %v827_v33 }
 0x149   :  { %865 = vmatpush.msrb.mxu2 %v792_v34  ;;  %911 = vmatpush.msra.mxu0 %v793_v35 }
 0x14a   :  { %888 = vmatpush.msrb.mxu3 %v824_v37  ;;  %934 = vmatpush.msra.mxu1 %v825_v18 }
 0x14b   :  { %866 = vmatpush.msrb.mxu2 %v790_v5  ;;  %912 = vmatpush.msra.mxu0 %v791_v53 }
 0x14c   :  { %889 = vmatpush.msrb.mxu3 %v822_v50  ;;  %935 = vmatpush.msra.mxu1 %v823_v47 }
 0x14d   :  { %867 = vmatpush.msrb.mxu2 %v788_v39  ;;  %913 = vmatpush.msra.mxu0 %v789_v30 }
 0x14e   :  { %890 = vmatpush.msrb.mxu3 %v820_v41  ;;  %936 = vmatpush.msra.mxu1 %v821_v28 }
 0x14f   :  { %868 = vmatpush.msrb.mxu2 %v786_v9  ;;  %914 = vmatpush.msra.mxu0 %v787_v44 }
 0x150   :  { %891 = vmatpush.msrb.mxu3 %v818_v57  ;;  %937 = vmatpush.msra.mxu1 %v819_v46 }
 0x151   :  { %869 = vmatpush.msrb.mxu2 %v784_v49  ;;  %915 = vmatpush.msra.mxu0 %v785_v51 }
 0x152   :  { %870 = vmatmul.f32.vlgmr.msrb.gmra.mxu2 %v761_v63  ;;  %916 = vmatmul.f32.vlgmr.msra.gmra.mxu0 %v761_v63  ;;  %v2793_v63 = vmov 16.0  }
 0x153   :  { %892 = vmatpush.msrb.mxu3 %v816_v21  ;;  %938 = vmatpush.msra.mxu1 %v817_v31  ;;  %2486 = vrcp.f32 %v2793_v63 }
 0x154   :  { %893 = vmatmul.f32.vlgmr.msrb.gmra.mxu3 %v762_v38  ;;  %939 = vmatmul.f32.vlgmr.msra.gmra.mxu1 %v762_v38  ;;  %v851_v38 = vperm.slane %v848_v62, 1 }
 0x159   :  { %v2487_v54 = vpop.eup %2486 }
 0x15a   :  { %873 = vmatmul.f32.gmra.mxu2 %v763_v11  ;;  %919 = vmatmul.f32.gmra.mxu0 %v763_v11  ;;  %v961_v10 = vmul.f32 16.0, %v2487_v54  ;;  %vm965_vm0 = vweird.f32 %v2487_v54 }
 0x15c   :  { %896 = vmatmul.f32.gmra.mxu3 %v764_v45  ;;  %942 = vmatmul.f32.gmra.mxu1 %v764_v45  ;;  %v962_v36 = vsub.f32 1.0, %v961_v10 }
 0x15e   :  { %v963_v4 = vmul.f32 %v2487_v54, %v962_v36 }
 0x160   :  { %v964_v24 = vadd.f32 %v2487_v54, %v963_v4 }
 0x162   :  { %v3817_v34 = vsel %vm965_vm0, %v2487_v54, %v964_v24 }
 0x1cf   :  { %v917_v19 = vpop.f32.mrf.mxu0 }
 0x1d0   :  { %v918_v55 = vadd.f32 %v917_v19, %v851_v38 }
 0x1d1   :  { %v940_v52 = vpop.f32.mrf.mxu1 }
 0x1d2   :  { %v3797_v32 = vadd.f32 %v940_v52, %v918_v55 }
 0x1d4   :  { %v970_v61 = vmul.f32 %v3797_v32, %v3797_v32 }
 0x1d5   :  { %v871_v58 = vpop.f32.mrf.mxu2 }
 0x1d6   :  { %v872_v60 = vadd.f32 %v871_v58, %v850_v8 }
 0x1d7   :  { %v894_v11 = vpop.f32.mrf.mxu3  ;;  %v920_v59 = vpop.f32.mrf.mxu0 }
 0x1d8   :  { %v921_v42 = vadd.f32 %v920_v59, %v851_v38  ;;  %v3807_v3 = vadd.f32 %v894_v11, %v872_v60  ;;  %v1023_v59 = vld [vmem:[%s4127_s7] sm:$0x3] }
 0x1d9   :  { %v943_v45 = vpop.f32.mrf.mxu1 }
 0x1da   :  { %v3799_v43 = vadd.f32 %v943_v45, %v921_v42  ;;  %v969_v23 = vmul.f32 %v3807_v3, %v3807_v3  ;;  %v1033_v45 = vld [vmem:[%s4128_s8] sm:$0x3] }
 0x1dc   :  { %v953_v22 = vadd.f32 %v3799_v43, %v3797_v32  ;;  %v972_v40 = vmul.f32 %v3799_v43, %v3799_v43 }
 0x1dd   :  { %v874_v48 = vpop.f32.mrf.mxu2 }
 0x1de   :  { %v954_v0 = vrot.slane %v953_v22, 4  ;;  %v980_v1 = vadd.f32 %v972_v40, %v970_v61  ;;  %v875_v2 = vadd.f32 %v874_v48, %v850_v8  ;;  %v1026_v61 = vperm.slane %v1023_v59, 1 }
 0x1df   :  { %v897_v6 = vpop.f32.mrf.mxu3 }
 0x1e0   :  { %v955_v7 = vadd.f32 %v954_v0, %v953_v22  ;;  %v981_v12 = vrot.slane %v980_v1, 4  ;;  %v3809_v13 = vadd.f32 %v897_v6, %v875_v2 }
 0x1e2   :  { %v956_v14 = vrot.slane %v955_v7, 2  ;;  %v982_v15 = vadd.f32 %v981_v12, %v980_v1  ;;  %v946_v16 = vadd.f32 %v3809_v13, %v3807_v3  ;;  %v971_v20 = vmul.f32 %v3809_v13, %v3809_v13 }
 0x1e3   :  { %v1036_v1 = vperm.slane %v1033_v45, 1 }
 0x1e4   :  { %v957_v17 = vadd.f32 %v956_v14, %v955_v7  ;;  %v983_v56 = vrot.slane %v982_v15, 2  ;;  %v947_v25 = vrot.slane %v946_v16, 4  ;;  %v973_v26 = vadd.f32 %v971_v20, %v969_v23 }
 0x1e6   :  { %v958_v27 = vrot.slane %v957_v17, 1  ;;  %v984_v29 = vadd.f32 %v983_v56, %v982_v15  ;;  %v948_v33 = vadd.f32 %v947_v25, %v946_v16  ;;  %v974_v35 = vrot.slane %v973_v26, 4 }
 0x1e7   :  { %v1025_v16 = vperm.slane %v1023_v59, 0  ;;  %v1035_v25 = vperm.slane %v1033_v45, 0 }
 0x1e8   :  { %v959_v37 = vadd.f32 %v958_v27, %v957_v17  ;;  %v985_v18 = vrot.slane %v984_v29, 1  ;;  %v949_v5 = vrot.slane %v948_v33, 2  ;;  %v975_v53 = vadd.f32 %v974_v35, %v973_v26 }
 0x1ea   :  { %v968_v50 = vmul.f32 %v3817_v34, %v959_v37  ;;  %v986_v47 = vadd.f32 %v985_v18, %v984_v29  ;;  %v950_v39 = vadd.f32 %v949_v5, %v948_v33  ;;  %v976_v30 = vrot.slane %v975_v53, 2 }
 0x1ec   :  { %v988_v41 = vmul.f32 %v986_v47, %v3817_v34  ;;  %v990_v28 = vmul.f32 %v968_v50, %v968_v50  ;;  %v951_v9 = vrot.slane %v950_v39, 1  ;;  %v977_v44 = vadd.f32 %v976_v30, %v975_v53 }
 0x1ed   :  { %v994_v60 = vsub.f32 %v3797_v32, %v968_v50  ;;  %v996_v36 = vsub.f32 %v3799_v43, %v968_v50 }
 0x1ee   :  { %v992_v57 = vsub.f32 %v988_v41, %v990_v28  ;;  %v952_v46 = vadd.f32 %v951_v9, %v950_v39  ;;  %v978_v49 = vrot.slane %v977_v44, 1 }
 0x1f0   :  { %v998_v51 = vadd.f32 1e-05, %v992_v57  ;;  %v967_v21 = vmul.f32 %v3817_v34, %v952_v46  ;;  %v979_v31 = vadd.f32 %v978_v49, %v977_v44 }
 0x1f2   :  { %2488 = vrsqrt.f32 %v998_v51  ;;  %v987_v62 = vmul.f32 %v979_v31, %v3817_v34  ;;  %v989_v63 = vmul.f32 %v967_v21, %v967_v21  ;;  %vm1015_vm2 = vweird.f32 %v998_v51 }
 0x1f3   :  { %v993_v32 = vsub.f32 %v3807_v3, %v967_v21  ;;  %v995_v43 = vsub.f32 %v3809_v13, %v967_v21 }
 0x1f4   :  { %v991_v19 = vsub.f32 %v987_v62, %v989_v63 }
 0x1f6   :  { %v997_v38 = vadd.f32 1e-05, %v991_v19 }
 0x1f8   :  { %v2489_v52 = vpop.eup %2488  ;;  %2490 = vrsqrt.f32 %v997_v38  ;;  %vm1005_vm5 = vweird.f32 %v997_v38 }
 0x1f9   :  { %v1010_v54 = vmul.f32 %v2489_v52, %v998_v51  ;;  %vm1016_vm1 = vweird.f32 %v2489_v52 }
 0x1fa   :  { %vm1017_vm3 = vmor %vm1015_vm2, %vm1016_vm1 }
 0x1fb   :  { %v1011_v55 = vmul.f32 %v2489_v52, %v1010_v54 }
 0x1fd   :  { %v1012_v58 = vmul.f32 0.5, %v1011_v55 }
 0x1fe   :  { %v2491_v8 = vpop.eup %2490 }
 0x1ff   :  { %v1013_v11 = vsub.f32 1.5, %v1012_v58  ;;  %v1000_v10 = vmul.f32 %v2491_v8, %v997_v38  ;;  %vm1006_vm4 = vweird.f32 %v2491_v8 }
 0x200   :  { %vm1007_vm6 = vmor %vm1005_vm5, %vm1006_vm4 }
 0x201   :  { %v1014_v42 = vmul.f32 %v2489_v52, %v1013_v11  ;;  %v1001_v22 = vmul.f32 %v2491_v8, %v1000_v10 }
 0x203   :  { %v1018_v40 = vsel %vm1017_vm3, %v2489_v52, %v1014_v42  ;;  %v1002_v2 = vmul.f32 0.5, %v1001_v22 }
 0x204   :  { %v1020_v48 = vmul.f32 %v1018_v40, %v994_v60  ;;  %v1022_v0 = vmul.f32 %v1018_v40, %v996_v36 }
 0x205   :  { %v1003_v7 = vsub.f32 1.5, %v1002_v2 }
 0x206   :  { %v1030_v4 = vmul.f32 %v1026_v61, %v1020_v48  ;;  %v1032_v6 = vmul.f32 %v1026_v61, %v1022_v0 }
 0x207   :  { %v1004_v15 = vmul.f32 %v2491_v8, %v1003_v7 }
 0x208   :  { %v3831_v12 = vadd.f32 %v1036_v1, %v1030_v4  ;;  %v3833_v14 = vadd.f32 %v1036_v1, %v1032_v6 }
 0x209   :  { %v1008_v24 = vsel %vm1007_vm6, %v2491_v8, %v1004_v15 }
 0x20a   :  { %v1044_v20 = vmax.f32 %v3831_v12, 0.0  ;;  %v1046_v23 = vmax.f32 %v3833_v14, 0.0  ;;  %v1019_v17 = vmul.f32 %v1008_v24, %v993_v32  ;;  %v1021_v56 = vmul.f32 %v1008_v24, %v995_v43 }
 0x20c   :  { %v1029_v26 = vmul.f32 %v1025_v16, %v1019_v17  ;;  %v1031_v27 = vmul.f32 %v1025_v16, %v1021_v56 }
 0x20e   :  { %v3839_v29 = vadd.f32 %v1035_v25, %v1029_v26  ;;  %v3841_v33 = vadd.f32 %v1035_v25, %v1031_v27 }
 0x210   :  { %v1043_v3 = vmax.f32 %v3839_v29, 0.0  ;;  %v1045_v13 = vmax.f32 %v3841_v33, 0.0 }
 0x211   :  { %2780 = dma.done.wait [#allocation4 + $0x1], 8192 }
 0x212   :  { %2781 = vsyncadd [#allocation4 + $0x1], 4294959104  ;;  %s1056_s20 = sshll.u32 %s4133_s13, 4  ;;  %s1069_s1 = sshll.u32 %s4137_s17, 4  ;;  %v1139_v12 = vld [vmem:[%s4130_s10] sm:$0x3]  ;;  %s1057_s20 = int_to_ptr.hbm [resolvable:$true] %s1056_s20  ;;  %s1070_s1 = int_to_ptr.hbm [resolvable:$true] %s1069_s1 }
 0x213   :  { %1061 = dma.hbm_to_vmem [thread:$0]  %s1057_s20, 8192, %s132_s16, [#allocation4]  ;;  %v1142_v29 = vperm.slane %v1139_v12, 1  ;;  %v1141_v14 = vperm.slane %v1139_v12, 0 }
 0x214   :  { %v1105_v35 = vld [vmem:[#allocation2 + $0x2f0] sm:$0xff]  ;;  %v1106_v37 = vld [vmem:[#allocation2 + $0x2f8] sm:$0xff]  ;;  %v1103_v18 = vld [vmem:[#allocation2 + $0x2e0] sm:$0xff]  ;;  %s2794_s22 = smov [#allocation3]  }
 0x215   :  { %1145 = vmatpush.msra.mxu2 %v1105_v35  ;;  %1191 = vmatpush.msrb.mxu0 %v1106_v37  ;;  %v1137_v5 = vld [vmem:[#allocation2 + $0x3f0] sm:$0xff]  ;;  %v1104_v53 = vld [vmem:[#allocation2 + $0x2e8] sm:$0xff]  ;;  %v1138_v50 = vld [vmem:[#allocation2 + $0x3f8] sm:$0xff]  ;;  %s1071_s11 = sshll.u32 %s2794_s22, 4  ;;  %s1072_s11 = int_to_ptr.vmem [resolvable:$true] %s1071_s11 }
 0x216   :  { %1168 = vmatpush.msra.mxu3 %v1137_v5  ;;  %1214 = vmatpush.msrb.mxu1 %v1138_v50  ;;  %v1101_v47 = vld [vmem:[#allocation2 + $0x2d0] sm:$0xff]  ;;  %v1135_v39 = vld [vmem:[#allocation2 + $0x3e0] sm:$0xff]  ;;  %v1102_v30 = vld [vmem:[#allocation2 + $0x2d8] sm:$0xff]  ;;  %1074 = dma.hbm_to_vmem [thread:$0]  %s1070_s1, 28672, %s1072_s11, [#allocation5] }
 0x217   :  { %1146 = vmatpush.msra.mxu2 %v1103_v18  ;;  %1192 = vmatpush.msrb.mxu0 %v1104_v53  ;;  %v1136_v41 = vld [vmem:[#allocation2 + $0x3e8] sm:$0xff]  ;;  %v1133_v28 = vld [vmem:[#allocation2 + $0x3d0] sm:$0xff]  ;;  %v1099_v9 = vld [vmem:[#allocation2 + $0x2c0] sm:$0xff] }
 0x218   :  { %1169 = vmatpush.msra.mxu3 %v1135_v39  ;;  %1215 = vmatpush.msrb.mxu1 %v1136_v41  ;;  %v1100_v44 = vld [vmem:[#allocation2 + $0x2c8] sm:$0xff]  ;;  %v1134_v57 = vld [vmem:[#allocation2 + $0x3d8] sm:$0xff]  ;;  %v1131_v46 = vld [vmem:[#allocation2 + $0x3c0] sm:$0xff] }
 0x219   :  { %1147 = vmatpush.msra.mxu2 %v1101_v47  ;;  %1193 = vmatpush.msrb.mxu0 %v1102_v30  ;;  %v1132_v49 = vld [vmem:[#allocation2 + $0x3c8] sm:$0xff]  ;;  %v1097_v51 = vld [vmem:[#allocation2 + $0x2b0] sm:$0xff]  ;;  %v1098_v21 = vld [vmem:[#allocation2 + $0x2b8] sm:$0xff] }
 0x21a   :  { %1170 = vmatpush.msra.mxu3 %v1133_v28  ;;  %1216 = vmatpush.msrb.mxu1 %v1134_v57  ;;  %v1129_v31 = vld [vmem:[#allocation2 + $0x3b0] sm:$0xff]  ;;  %v1130_v62 = vld [vmem:[#allocation2 + $0x3b8] sm:$0xff]  ;;  %v1095_v63 = vld [vmem:[#allocation2 + $0x2a0] sm:$0xff] }
 0x21b   :  { %1148 = vmatpush.msra.mxu2 %v1099_v9  ;;  %1194 = vmatpush.msrb.mxu0 %v1100_v44  ;;  %v1096_v19 = vld [vmem:[#allocation2 + $0x2a8] sm:$0xff]  ;;  %v1127_v38 = vld [vmem:[#allocation2 + $0x3a0] sm:$0xff]  ;;  %v1093_v54 = vld [vmem:[#allocation2 + $0x290] sm:$0xff] }
 0x21c   :  { %1171 = vmatpush.msra.mxu3 %v1131_v46  ;;  %1217 = vmatpush.msrb.mxu1 %v1132_v49  ;;  %v1128_v52 = vld [vmem:[#allocation2 + $0x3a8] sm:$0xff]  ;;  %v1094_v55 = vld [vmem:[#allocation2 + $0x298] sm:$0xff]  ;;  %v1125_v58 = vld [vmem:[#allocation2 + $0x390] sm:$0xff] }
 0x21d   :  { %1149 = vmatpush.msra.mxu2 %v1097_v51  ;;  %1195 = vmatpush.msrb.mxu0 %v1098_v21  ;;  %v1126_v8 = vld [vmem:[#allocation2 + $0x398] sm:$0xff]  ;;  %v1091_v11 = vld [vmem:[#allocation2 + $0x280] sm:$0xff]  ;;  %v1092_v59 = vld [vmem:[#allocation2 + $0x288] sm:$0xff] }
 0x21e   :  { %1172 = vmatpush.msra.mxu3 %v1129_v31  ;;  %1218 = vmatpush.msrb.mxu1 %v1130_v62  ;;  %v1123_v10 = vld [vmem:[#allocation2 + $0x380] sm:$0xff]  ;;  %v1124_v42 = vld [vmem:[#allocation2 + $0x388] sm:$0xff]  ;;  %v1089_v45 = vld [vmem:[#allocation2 + $0x270] sm:$0xff] }
 0x21f   :  { %1150 = vmatpush.msra.mxu2 %v1095_v63  ;;  %1196 = vmatpush.msrb.mxu0 %v1096_v19  ;;  %v1090_v60 = vld [vmem:[#allocation2 + $0x278] sm:$0xff]  ;;  %v1121_v36 = vld [vmem:[#allocation2 + $0x370] sm:$0xff]  ;;  %v1087_v22 = vld [vmem:[#allocation2 + $0x260] sm:$0xff] }
 0x220   :  { %1173 = vmatpush.msra.mxu3 %v1127_v38  ;;  %1219 = vmatpush.msrb.mxu1 %v1128_v52  ;;  %v1122_v61 = vld [vmem:[#allocation2 + $0x378] sm:$0xff]  ;;  %v1088_v40 = vld [vmem:[#allocation2 + $0x268] sm:$0xff]  ;;  %v1119_v48 = vld [vmem:[#allocation2 + $0x360] sm:$0xff] }
 0x221   :  { %1151 = vmatpush.msra.mxu2 %v1093_v54  ;;  %1197 = vmatpush.msrb.mxu0 %v1094_v55  ;;  %v1120_v0 = vld [vmem:[#allocation2 + $0x368] sm:$0xff]  ;;  %v1085_v1 = vld [vmem:[#allocation2 + $0x250] sm:$0xff]  ;;  %v1086_v2 = vld [vmem:[#allocation2 + $0x258] sm:$0xff] }
 0x222   :  { %1174 = vmatpush.msra.mxu3 %v1125_v58  ;;  %1220 = vmatpush.msrb.mxu1 %v1126_v8  ;;  %v1117_v4 = vld [vmem:[#allocation2 + $0x350] sm:$0xff]  ;;  %v1118_v6 = vld [vmem:[#allocation2 + $0x358] sm:$0xff]  ;;  %v1083_v7 = vld [vmem:[#allocation2 + $0x240] sm:$0xff] }
 0x223   :  { %1152 = vmatpush.msra.mxu2 %v1091_v11  ;;  %1198 = vmatpush.msrb.mxu0 %v1092_v59  ;;  %v1084_v15 = vld [vmem:[#allocation2 + $0x248] sm:$0xff]  ;;  %v1115_v32 = vld [vmem:[#allocation2 + $0x340] sm:$0xff]  ;;  %v1081_v16 = vld [vmem:[#allocation2 + $0x230] sm:$0xff] }
 0x224   :  { %1175 = vmatpush.msra.mxu3 %v1123_v10  ;;  %1221 = vmatpush.msrb.mxu1 %v1124_v42  ;;  %v1116_v43 = vld [vmem:[#allocation2 + $0x348] sm:$0xff]  ;;  %v1082_v24 = vld [vmem:[#allocation2 + $0x238] sm:$0xff]  ;;  %v1113_v17 = vld [vmem:[#allocation2 + $0x330] sm:$0xff] }
 0x225   :  { %1153 = vmatpush.msra.mxu2 %v1089_v45  ;;  %1199 = vmatpush.msrb.mxu0 %v1090_v60  ;;  %v1114_v56 = vld [vmem:[#allocation2 + $0x338] sm:$0xff]  ;;  %v1079_v25 = vld [vmem:[#allocation2 + $0x220] sm:$0xff]  ;;  %v1080_v26 = vld [vmem:[#allocation2 + $0x228] sm:$0xff] }
 0x226   :  { %1176 = vmatpush.msra.mxu3 %v1121_v36  ;;  %1222 = vmatpush.msrb.mxu1 %v1122_v61  ;;  %v1111_v27 = vld [vmem:[#allocation2 + $0x320] sm:$0xff]  ;;  %v1112_v35 = vld [vmem:[#allocation2 + $0x328] sm:$0xff]  ;;  %v1077_v37 = vld [vmem:[#allocation2 + $0x210] sm:$0xff] }
 0x227   :  { %1154 = vmatpush.msra.mxu2 %v1087_v22  ;;  %1200 = vmatpush.msrb.mxu0 %v1088_v40  ;;  %v1078_v18 = vld [vmem:[#allocation2 + $0x218] sm:$0xff]  ;;  %v1109_v5 = vld [vmem:[#allocation2 + $0x310] sm:$0xff]  ;;  %v1075_v50 = vld [vmem:[#allocation2 + $0x200] sm:$0xff] }
 0x228   :  { %1177 = vmatpush.msra.mxu3 %v1119_v48  ;;  %1223 = vmatpush.msrb.mxu1 %v1120_v0  ;;  %v1110_v53 = vld [vmem:[#allocation2 + $0x318] sm:$0xff]  ;;  %v1076_v47 = vld [vmem:[#allocation2 + $0x208] sm:$0xff]  ;;  %v1107_v39 = vld [vmem:[#allocation2 + $0x300] sm:$0xff] }
 0x229   :  { %1155 = vmatpush.msra.mxu2 %v1085_v1  ;;  %1201 = vmatpush.msrb.mxu0 %v1086_v2  ;;  %v1108_v30 = vld [vmem:[#allocation2 + $0x308] sm:$0xff] }
 0x22a   :  { %1178 = vmatpush.msra.mxu3 %v1117_v4  ;;  %1224 = vmatpush.msrb.mxu1 %v1118_v6 }
 0x22b   :  { %1156 = vmatpush.msra.mxu2 %v1083_v7  ;;  %1202 = vmatpush.msrb.mxu0 %v1084_v15 }
 0x22c   :  { %1179 = vmatpush.msra.mxu3 %v1115_v32  ;;  %1225 = vmatpush.msrb.mxu1 %v1116_v43 }
 0x22d   :  { %1157 = vmatpush.msra.mxu2 %v1081_v16  ;;  %1203 = vmatpush.msrb.mxu0 %v1082_v24 }
 0x22e   :  { %1180 = vmatpush.msra.mxu3 %v1113_v17  ;;  %1226 = vmatpush.msrb.mxu1 %v1114_v56 }
 0x22f   :  { %1158 = vmatpush.msra.mxu2 %v1079_v25  ;;  %1204 = vmatpush.msrb.mxu0 %v1080_v26 }
 0x230   :  { %1181 = vmatpush.msra.mxu3 %v1111_v27  ;;  %1227 = vmatpush.msrb.mxu1 %v1112_v35 }
 0x231   :  { %1159 = vmatpush.msra.mxu2 %v1077_v37  ;;  %1205 = vmatpush.msrb.mxu0 %v1078_v18 }
 0x232   :  { %1182 = vmatpush.msra.mxu3 %v1109_v5  ;;  %1228 = vmatpush.msrb.mxu1 %v1110_v53 }
 0x233   :  { %1160 = vmatpush.msra.mxu2 %v1075_v50  ;;  %1206 = vmatpush.msrb.mxu0 %v1076_v47 }
 0x234   :  { %1161 = vmatmul.f32.vlgmr.msra.gmra.mxu2 %v1043_v3  ;;  %1207 = vmatmul.f32.vlgmr.msrb.gmra.mxu0 %v1043_v3 }
 0x235   :  { %1183 = vmatpush.msra.mxu3 %v1107_v39  ;;  %1229 = vmatpush.msrb.mxu1 %v1108_v30 }
 0x236   :  { %1184 = vmatmul.f32.vlgmr.msra.gmra.mxu3 %v1044_v20  ;;  %1230 = vmatmul.f32.vlgmr.msrb.gmra.mxu1 %v1044_v20 }
 0x23c   :  { %1164 = vmatmul.f32.gmra.mxu2 %v1045_v13  ;;  %1210 = vmatmul.f32.gmra.mxu0 %v1045_v13 }
 0x23e   :  { %1187 = vmatmul.f32.gmra.mxu3 %v1046_v23  ;;  %1233 = vmatmul.f32.gmra.mxu1 %v1046_v23 }
 0x2b1   :  { %v1208_v20 = vpop.f32.mrf.mxu0 }
 0x2b2   :  { %v1209_v3 = vadd.f32 %v1208_v20, %v1142_v29 }
 0x2b3   :  { %v1231_v33 = vpop.f32.mrf.mxu1 }
 0x2b4   :  { %v3872_v28 = vadd.f32 %v1231_v33, %v1209_v3  ;;  %v1307_v3 = vld [vmem:[#allocation6] sm:$0x3] }
 0x2b6   :  { %v1254_v49 = vmul.f32 %v3872_v28, %v3872_v28 }
 0x2b7   :  { %v1162_v13 = vpop.f32.mrf.mxu2 }
 0x2b8   :  { %v1163_v46 = vadd.f32 %v1162_v13, %v1141_v14 }
 0x2b9   :  { %v1185_v23 = vpop.f32.mrf.mxu3  ;;  %v1211_v41 = vpop.f32.mrf.mxu0 }
 0x2ba   :  { %v1212_v9 = vadd.f32 %v1211_v41, %v1142_v29  ;;  %v3882_v38 = vadd.f32 %v1185_v23, %v1163_v46  ;;  %v1317_v23 = vld [vmem:[#allocation8] sm:$0x3] }
 0x2bb   :  { %v1234_v44 = vpop.f32.mrf.mxu1 }
 0x2bc   :  { %v3874_v57 = vadd.f32 %v1234_v44, %v1212_v9  ;;  %v1253_v42 = vmul.f32 %v3882_v38, %v3882_v38  ;;  %v1310_v44 = vperm.slane %v1307_v3, 1 }
 0x2be   :  { %v1244_v51 = vadd.f32 %v3874_v57, %v3872_v28  ;;  %v1256_v21 = vmul.f32 %v3874_v57, %v3874_v57 }
 0x2bf   :  { %v1165_v31 = vpop.f32.mrf.mxu2 }
 0x2c0   :  { %v1245_v62 = vrot.slane %v1244_v51, 4  ;;  %v1264_v63 = vadd.f32 %v1256_v21, %v1254_v49  ;;  %v1166_v19 = vadd.f32 %v1165_v31, %v1141_v14  ;;  %v1320_v31 = vperm.slane %v1317_v23, 1 }
 0x2c1   :  { %v1188_v52 = vpop.f32.mrf.mxu3 }
 0x2c2   :  { %v1246_v54 = vadd.f32 %v1245_v62, %v1244_v51  ;;  %v1265_v55 = vrot.slane %v1264_v63, 4  ;;  %v3884_v58 = vadd.f32 %v1188_v52, %v1166_v19 }
 0x2c4   :  { %v1247_v8 = vrot.slane %v1246_v54, 2  ;;  %v1266_v11 = vadd.f32 %v1265_v55, %v1264_v63  ;;  %v1237_v59 = vadd.f32 %v3884_v58, %v3882_v38  ;;  %v1255_v10 = vmul.f32 %v3884_v58, %v3884_v58 }
 0x2c6   :  { %v1248_v45 = vadd.f32 %v1247_v8, %v1246_v54  ;;  %v1267_v60 = vrot.slane %v1266_v11, 2  ;;  %v1238_v36 = vrot.slane %v1237_v59, 4  ;;  %v1257_v61 = vadd.f32 %v1255_v10, %v1253_v42 }
 0x2c8   :  { %v1249_v22 = vrot.slane %v1248_v45, 1  ;;  %v1268_v40 = vadd.f32 %v1267_v60, %v1266_v11  ;;  %v1239_v48 = vadd.f32 %v1238_v36, %v1237_v59  ;;  %v1258_v0 = vrot.slane %v1257_v61, 4 }
 0x2c9   :  { %v1309_v11 = vperm.slane %v1307_v3, 0  ;;  %v1319_v36 = vperm.slane %v1317_v23, 0 }
 0x2ca   :  { %v1250_v1 = vadd.f32 %v1249_v22, %v1248_v45  ;;  %v1269_v2 = vrot.slane %v1268_v40, 1  ;;  %v1240_v4 = vrot.slane %v1239_v48, 2  ;;  %v1259_v6 = vadd.f32 %v1258_v0, %v1257_v61 }
 0x2cc   :  { %v1252_v7 = vmul.f32 %v1250_v1, %v3817_v34  ;;  %v1270_v15 = vadd.f32 %v1269_v2, %v1268_v40  ;;  %v1241_v32 = vadd.f32 %v1240_v4, %v1239_v48  ;;  %v1260_v43 = vrot.slane %v1259_v6, 2 }
 0x2ce   :  { %v1272_v16 = vmul.f32 %v1270_v15, %v3817_v34  ;;  %v1274_v24 = vmul.f32 %v1252_v7, %v1252_v7  ;;  %v1242_v17 = vrot.slane %v1241_v32, 1  ;;  %v1261_v56 = vadd.f32 %v1260_v43, %v1259_v6 }
 0x2cf   :  { %v1278_v41 = vsub.f32 %v3872_v28, %v1252_v7  ;;  %v1280_v9 = vsub.f32 %v3874_v57, %v1252_v7 }
 0x2d0   :  { %v1276_v25 = vsub.f32 %v1272_v16, %v1274_v24  ;;  %v1243_v26 = vadd.f32 %v1242_v17, %v1241_v32  ;;  %v1262_v27 = vrot.slane %v1261_v56, 1 }
 0x2d2   :  { %v1282_v35 = vadd.f32 1e-05, %v1276_v25  ;;  %v1251_v37 = vmul.f32 %v1243_v26, %v3817_v34  ;;  %v1263_v18 = vadd.f32 %v1262_v27, %v1261_v56 }
 0x2d4   :  { %2492 = vrsqrt.f32 %v1282_v35  ;;  %v1271_v5 = vmul.f32 %v1263_v18, %v3817_v34  ;;  %v1273_v53 = vmul.f32 %v1251_v37, %v1251_v37  ;;  %vm1299_vm8 = vweird.f32 %v1282_v35 }
 0x2d5   :  { %v1277_v28 = vsub.f32 %v3882_v38, %v1251_v37  ;;  %v1279_v57 = vsub.f32 %v3884_v58, %v1251_v37 }
 0x2d6   :  { %v1275_v50 = vsub.f32 %v1271_v5, %v1273_v53 }
 0x2d8   :  { %v1281_v47 = vadd.f32 1e-05, %v1275_v50 }
 0x2da   :  { %v2493_v39 = vpop.eup %2492  ;;  %2494 = vrsqrt.f32 %v1281_v47  ;;  %vm1289_vm11 = vweird.f32 %v1281_v47 }
 0x2db   :  { %v1294_v30 = vmul.f32 %v2493_v39, %v1282_v35  ;;  %vm1300_vm7 = vweird.f32 %v2493_v39 }
 0x2dc   :  { %vm1301_vm9 = vmor %vm1299_vm8, %vm1300_vm7 }
 0x2dd   :  { %v1295_v12 = vmul.f32 %v2493_v39, %v1294_v30 }
 0x2df   :  { %v1296_v20 = vmul.f32 0.5, %v1295_v12 }
 0x2e0   :  { %v2495_v29 = vpop.eup %2494 }
 0x2e1   :  { %v1297_v33 = vsub.f32 1.5, %v1296_v20  ;;  %v1284_v13 = vmul.f32 %v2495_v29, %v1281_v47  ;;  %vm1290_vm10 = vweird.f32 %v2495_v29 }
 0x2e2   :  { %vm1291_vm12 = vmor %vm1289_vm11, %vm1290_vm10 }
 0x2e3   :  { %v1298_v14 = vmul.f32 %v2493_v39, %v1297_v33  ;;  %v1285_v46 = vmul.f32 %v2495_v29, %v1284_v13 }
 0x2e5   :  { %v1302_v49 = vsel %vm1301_vm9, %v2493_v39, %v1298_v14  ;;  %v1286_v62 = vmul.f32 0.5, %v1285_v46 }
 0x2e6   :  { %v1304_v51 = vmul.f32 %v1302_v49, %v1278_v41  ;;  %v1306_v21 = vmul.f32 %v1302_v49, %v1280_v9 }
 0x2e7   :  { %v1287_v52 = vsub.f32 1.5, %v1286_v62 }
 0x2e8   :  { %v1314_v63 = vmul.f32 %v1310_v44, %v1304_v51  ;;  %v1316_v19 = vmul.f32 %v1310_v44, %v1306_v21 }
 0x2e9   :  { %v1288_v8 = vmul.f32 %v2495_v29, %v1287_v52 }
 0x2ea   :  { %v3898_v54 = vadd.f32 %v1320_v31, %v1314_v63  ;;  %v3900_v55 = vadd.f32 %v1320_v31, %v1316_v19 }
 0x2eb   :  { %v1292_v42 = vsel %vm1291_vm12, %v2495_v29, %v1288_v8 }
 0x2ec   :  { %v1328_v59 = vmax.f32 %v3898_v54, 0.0  ;;  %v1330_v10 = vmax.f32 %v3900_v55, 0.0  ;;  %v1303_v45 = vmul.f32 %v1292_v42, %v1277_v28  ;;  %v1305_v60 = vmul.f32 %v1292_v42, %v1279_v57 }
 0x2ee   :  { %v1313_v61 = vmul.f32 %v1309_v11, %v1303_v45  ;;  %v1315_v22 = vmul.f32 %v1309_v11, %v1305_v60 }
 0x2f0   :  { %v3906_v40 = vadd.f32 %v1319_v36, %v1313_v61  ;;  %v3908_v48 = vadd.f32 %v1319_v36, %v1315_v22 }
 0x2f2   :  { %v1327_v38 = vmax.f32 %v3906_v40, 0.0  ;;  %v1329_v58 = vmax.f32 %v3908_v48, 0.0 }
 0x2f3   :  { %2782 = dma.done.wait [#allocation4], 8192 }
 0x2f4   :  { %2783 = vsyncadd [#allocation4], 4294959104  ;;  %v1363_v0 = vld [vmem:[#allocation2 + $0xf0] sm:$0xff]  ;;  %v1364_v1 = vld [vmem:[#allocation2 + $0xf8] sm:$0xff] }
 0x2f5   :  { %v1361_v2 = vld [vmem:[#allocation2 + $0xe0] sm:$0xff]  ;;  %1403 = vmatpush.msrb.mxu2 %v1363_v0  ;;  %1449 = vmatpush.msra.mxu0 %v1364_v1  ;;  %v1395_v4 = vld [vmem:[#allocation2 + $0x1f0] sm:$0xff]  ;;  %v1362_v6 = vld [vmem:[#allocation2 + $0xe8] sm:$0xff] }
 0x2f6   :  { %v1396_v7 = vld [vmem:[#allocation2 + $0x1f8] sm:$0xff]  ;;  %1426 = vmatpush.msrb.mxu3 %v1395_v4  ;;  %v1359_v15 = vld [vmem:[#allocation2 + $0xd0] sm:$0xff]  ;;  %v1393_v32 = vld [vmem:[#allocation2 + $0x1e0] sm:$0xff] }
 0x2f7   :  { %1472 = vmatpush.msra.mxu1 %v1396_v7  ;;  %v1360_v43 = vld [vmem:[#allocation2 + $0xd8] sm:$0xff]  ;;  %1404 = vmatpush.msrb.mxu2 %v1361_v2  ;;  %v1394_v16 = vld [vmem:[#allocation2 + $0x1e8] sm:$0xff]  ;;  %v1391_v24 = vld [vmem:[#allocation2 + $0x1d0] sm:$0xff] }
 0x2f8   :  { %1450 = vmatpush.msra.mxu0 %v1362_v6  ;;  %1427 = vmatpush.msrb.mxu3 %v1393_v32  ;;  %v1357_v17 = vld [vmem:[#allocation2 + $0xc0] sm:$0xff]  ;;  %v1358_v56 = vld [vmem:[#allocation2 + $0xc8] sm:$0xff]  ;;  %v1392_v25 = vld [vmem:[#allocation2 + $0x1d8] sm:$0xff] }
 0x2f9   :  { %1473 = vmatpush.msra.mxu1 %v1394_v16  ;;  %1405 = vmatpush.msrb.mxu2 %v1359_v15  ;;  %v1389_v26 = vld [vmem:[#allocation2 + $0x1c0] sm:$0xff]  ;;  %v1390_v27 = vld [vmem:[#allocation2 + $0x1c8] sm:$0xff]  ;;  %v1355_v35 = vld [vmem:[#allocation2 + $0xb0] sm:$0xff] }
 0x2fa   :  { %1451 = vmatpush.msra.mxu0 %v1360_v43  ;;  %1428 = vmatpush.msrb.mxu3 %v1391_v24  ;;  %v1356_v37 = vld [vmem:[#allocation2 + $0xb8] sm:$0xff]  ;;  %v1387_v18 = vld [vmem:[#allocation2 + $0x1b0] sm:$0xff]  ;;  %v1353_v53 = vld [vmem:[#allocation2 + $0xa0] sm:$0xff] }
 0x2fb   :  { %1474 = vmatpush.msra.mxu1 %v1392_v25  ;;  %1406 = vmatpush.msrb.mxu2 %v1357_v17  ;;  %v1388_v5 = vld [vmem:[#allocation2 + $0x1b8] sm:$0xff]  ;;  %v1354_v50 = vld [vmem:[#allocation2 + $0xa8] sm:$0xff]  ;;  %v1385_v47 = vld [vmem:[#allocation2 + $0x1a0] sm:$0xff] }
 0x2fc   :  { %1452 = vmatpush.msra.mxu0 %v1358_v56  ;;  %1429 = vmatpush.msrb.mxu3 %v1389_v26  ;;  %v1386_v39 = vld [vmem:[#allocation2 + $0x1a8] sm:$0xff]  ;;  %v1351_v30 = vld [vmem:[#allocation2 + $0x90] sm:$0xff]  ;;  %v1352_v12 = vld [vmem:[#allocation2 + $0x98] sm:$0xff] }
 0x2fd   :  { %1475 = vmatpush.msra.mxu1 %v1390_v27  ;;  %1407 = vmatpush.msrb.mxu2 %v1355_v35  ;;  %v1383_v20 = vld [vmem:[#allocation2 + $0x190] sm:$0xff]  ;;  %v1384_v29 = vld [vmem:[#allocation2 + $0x198] sm:$0xff]  ;;  %v1349_v33 = vld [vmem:[#allocation2 + $0x80] sm:$0xff] }
 0x2fe   :  { %1453 = vmatpush.msra.mxu0 %v1356_v37  ;;  %1430 = vmatpush.msrb.mxu3 %v1387_v18  ;;  %v1350_v3 = vld [vmem:[#allocation2 + $0x88] sm:$0xff]  ;;  %v1381_v13 = vld [vmem:[#allocation2 + $0x180] sm:$0xff]  ;;  %v1347_v23 = vld [vmem:[#allocation2 + $0x70] sm:$0xff] }
 0x2ff   :  { %1476 = vmatpush.msra.mxu1 %v1388_v5  ;;  %1408 = vmatpush.msrb.mxu2 %v1353_v53  ;;  %v1382_v14 = vld [vmem:[#allocation2 + $0x188] sm:$0xff]  ;;  %v1348_v41 = vld [vmem:[#allocation2 + $0x78] sm:$0xff]  ;;  %v1379_v9 = vld [vmem:[#allocation2 + $0x170] sm:$0xff] }
 0x300   :  { %1454 = vmatpush.msra.mxu0 %v1354_v50  ;;  %1431 = vmatpush.msrb.mxu3 %v1385_v47  ;;  %v1380_v44 = vld [vmem:[#allocation2 + $0x178] sm:$0xff]  ;;  %v1345_v46 = vld [vmem:[#allocation2 + $0x60] sm:$0xff]  ;;  %v1346_v49 = vld [vmem:[#allocation2 + $0x68] sm:$0xff] }
 0x301   :  { %1477 = vmatpush.msra.mxu1 %v1386_v39  ;;  %1409 = vmatpush.msrb.mxu2 %v1351_v30  ;;  %v1377_v51 = vld [vmem:[#allocation2 + $0x160] sm:$0xff]  ;;  %v1378_v21 = vld [vmem:[#allocation2 + $0x168] sm:$0xff]  ;;  %v1343_v31 = vld [vmem:[#allocation2 + $0x50] sm:$0xff] }
 0x302   :  { %1455 = vmatpush.msra.mxu0 %v1352_v12  ;;  %1432 = vmatpush.msrb.mxu3 %v1383_v20  ;;  %v1344_v62 = vld [vmem:[#allocation2 + $0x58] sm:$0xff]  ;;  %v1375_v63 = vld [vmem:[#allocation2 + $0x150] sm:$0xff]  ;;  %v1341_v52 = vld [vmem:[#allocation2 + $0x40] sm:$0xff] }
 0x303   :  { %1478 = vmatpush.msra.mxu1 %v1384_v29  ;;  %1410 = vmatpush.msrb.mxu2 %v1349_v33  ;;  %v1376_v19 = vld [vmem:[#allocation2 + $0x158] sm:$0xff]  ;;  %v1342_v8 = vld [vmem:[#allocation2 + $0x48] sm:$0xff]  ;;  %v1373_v28 = vld [vmem:[#allocation2 + $0x140] sm:$0xff] }
 0x304   :  { %1456 = vmatpush.msra.mxu0 %v1350_v3  ;;  %1433 = vmatpush.msrb.mxu3 %v1381_v13  ;;  %v1374_v57 = vld [vmem:[#allocation2 + $0x148] sm:$0xff]  ;;  %v1339_v11 = vld [vmem:[#allocation2 + $0x30] sm:$0xff]  ;;  %v1340_v42 = vld [vmem:[#allocation2 + $0x38] sm:$0xff] }
 0x305   :  { %1479 = vmatpush.msra.mxu1 %v1382_v14  ;;  %1411 = vmatpush.msrb.mxu2 %v1347_v23  ;;  %v1371_v45 = vld [vmem:[#allocation2 + $0x130] sm:$0xff]  ;;  %v1372_v60 = vld [vmem:[#allocation2 + $0x138] sm:$0xff]  ;;  %v1337_v36 = vld [vmem:[#allocation2 + $0x20] sm:$0xff] }
 0x306   :  { %1457 = vmatpush.msra.mxu0 %v1348_v41  ;;  %1434 = vmatpush.msrb.mxu3 %v1379_v9  ;;  %v1338_v61 = vld [vmem:[#allocation2 + $0x28] sm:$0xff]  ;;  %v1369_v22 = vld [vmem:[#allocation2 + $0x120] sm:$0xff]  ;;  %v1335_v1 = vld [vmem:[#allocation2 + $0x10] sm:$0xff] }
 0x307   :  { %1480 = vmatpush.msra.mxu1 %v1380_v44  ;;  %1412 = vmatpush.msrb.mxu2 %v1345_v46  ;;  %v1370_v0 = vld [vmem:[#allocation2 + $0x128] sm:$0xff]  ;;  %v1336_v2 = vld [vmem:[#allocation2 + $0x18] sm:$0xff]  ;;  %v1367_v4 = vld [vmem:[#allocation2 + $0x110] sm:$0xff] }
 0x308   :  { %1458 = vmatpush.msra.mxu0 %v1346_v49  ;;  %1435 = vmatpush.msrb.mxu3 %v1377_v51  ;;  %v1368_v6 = vld [vmem:[#allocation2 + $0x118] sm:$0xff]  ;;  %v1333_v7 = vld [vmem:[#allocation2] sm:$0xff]  ;;  %v1334_v15 = vld [vmem:[#allocation2 + $0x8] sm:$0xff] }
 0x309   :  { %1481 = vmatpush.msra.mxu1 %v1378_v21  ;;  %1413 = vmatpush.msrb.mxu2 %v1343_v31  ;;  %v1365_v32 = vld [vmem:[#allocation2 + $0x100] sm:$0xff]  ;;  %v1366_v43 = vld [vmem:[#allocation2 + $0x108] sm:$0xff] }
 0x30a   :  { %1459 = vmatpush.msra.mxu0 %v1344_v62  ;;  %1436 = vmatpush.msrb.mxu3 %v1375_v63  ;;  %v1397_v40 = vld [vmem:[#allocation10] sm:$0x3] }
 0x30b   :  { %1482 = vmatpush.msra.mxu1 %v1376_v19  ;;  %1414 = vmatpush.msrb.mxu2 %v1341_v52  ;;  %v1400_v16 = vperm.slane %v1397_v40, 1  ;;  %v1399_v54 = vperm.slane %v1397_v40, 0 }
 0x30c   :  { %1460 = vmatpush.msra.mxu0 %v1342_v8  ;;  %1437 = vmatpush.msrb.mxu3 %v1373_v28 }
 0x30d   :  { %1483 = vmatpush.msra.mxu1 %v1374_v57  ;;  %1415 = vmatpush.msrb.mxu2 %v1339_v11 }
 0x30e   :  { %1461 = vmatpush.msra.mxu0 %v1340_v42  ;;  %1438 = vmatpush.msrb.mxu3 %v1371_v45 }
 0x30f   :  { %1484 = vmatpush.msra.mxu1 %v1372_v60  ;;  %1416 = vmatpush.msrb.mxu2 %v1337_v36 }
 0x310   :  { %1462 = vmatpush.msra.mxu0 %v1338_v61  ;;  %1439 = vmatpush.msrb.mxu3 %v1369_v22 }
 0x311   :  { %1485 = vmatpush.msra.mxu1 %v1370_v0  ;;  %1417 = vmatpush.msrb.mxu2 %v1335_v1 }
 0x312   :  { %1463 = vmatpush.msra.mxu0 %v1336_v2  ;;  %1440 = vmatpush.msrb.mxu3 %v1367_v4 }
 0x313   :  { %1486 = vmatpush.msra.mxu1 %v1368_v6  ;;  %1418 = vmatpush.msrb.mxu2 %v1333_v7 }
 0x314   :  { %1464 = vmatpush.msra.mxu0 %v1334_v15  ;;  %1419 = vmatmul.f32.vlgmr.msrb.gmra.mxu2 %v1327_v38 }
 0x315   :  { %1465 = vmatmul.f32.vlgmr.msra.gmra.mxu0 %v1327_v38  ;;  %1441 = vmatpush.msrb.mxu3 %v1365_v32 }
 0x316   :  { %1487 = vmatpush.msra.mxu1 %v1366_v43  ;;  %1442 = vmatmul.f32.vlgmr.msrb.gmra.mxu3 %v1328_v59 }
 0x317   :  { %1488 = vmatmul.f32.vlgmr.msra.gmra.mxu1 %v1328_v59 }
 0x31c   :  { %1422 = vmatmul.f32.gmra.mxu2 %v1329_v58 }
 0x31d   :  { %1468 = vmatmul.f32.gmra.mxu0 %v1329_v58 }
 0x31e   :  { %1445 = vmatmul.f32.gmra.mxu3 %v1330_v10 }
 0x31f   :  { %1491 = vmatmul.f32.gmra.mxu1 %v1330_v10 }
 0x392   :  { %v1466_v38 = vpop.f32.mrf.mxu0 }
 0x393   :  { %v1467_v17 = vadd.f32 %v1466_v38, %v1400_v16 }
 0x394   :  { %v1489_v24 = vpop.f32.mrf.mxu1 }
 0x395   :  { %v3928_v26 = vadd.f32 %v1489_v24, %v1467_v17  ;;  %v1565_v17 = vld [vmem:[#allocation11] sm:$0x3] }
 0x397   :  { %v1420_v56 = vpop.f32.mrf.mxu2  ;;  %v1512_v55 = vmul.f32 %v3928_v26, %v3928_v26 }
 0x398   :  { %v1421_v35 = vadd.f32 %v1420_v56, %v1399_v54 }
 0x399   :  { %v1443_v59 = vpop.f32.mrf.mxu3 }
 0x39a   :  { %v1469_v25 = vpop.f32.mrf.mxu0  ;;  %v3938_v47 = vadd.f32 %v1443_v59, %v1421_v35  ;;  %v1575_v59 = vld [vmem:[#allocation13] sm:$0x3] }
 0x39b   :  { %v1470_v27 = vadd.f32 %v1469_v25, %v1400_v16 }
 0x39c   :  { %v1492_v48 = vpop.f32.mrf.mxu1  ;;  %v1511_v14 = vmul.f32 %v3938_v47, %v3938_v47 }
 0x39d   :  { %v3930_v58 = vadd.f32 %v1492_v48, %v1470_v27  ;;  %v1568_v27 = vperm.slane %v1565_v17, 1 }
 0x39f   :  { %v1502_v10 = vadd.f32 %v3930_v58, %v3928_v26  ;;  %v1514_v37 = vmul.f32 %v3930_v58, %v3930_v58  ;;  %v1423_v18 = vpop.f32.mrf.mxu2 }
 0x3a0   :  { %v1424_v50 = vadd.f32 %v1423_v18, %v1399_v54 }
 0x3a1   :  { %v1503_v5 = vrot.slane %v1502_v10, 4  ;;  %v1522_v53 = vadd.f32 %v1514_v37, %v1512_v55  ;;  %v1446_v39 = vpop.f32.mrf.mxu3  ;;  %v1578_v37 = vperm.slane %v1575_v59, 1 }
 0x3a2   :  { %v3940_v20 = vadd.f32 %v1446_v39, %v1424_v50 }
 0x3a3   :  { %v1504_v30 = vadd.f32 %v1503_v5, %v1502_v10  ;;  %v1523_v12 = vrot.slane %v1522_v53, 4 }
 0x3a4   :  { %v1495_v3 = vadd.f32 %v3940_v20, %v3938_v47  ;;  %v1513_v13 = vmul.f32 %v3940_v20, %v3940_v20 }
 0x3a5   :  { %v1505_v29 = vrot.slane %v1504_v30, 2  ;;  %v1524_v33 = vadd.f32 %v1523_v12, %v1522_v53 }
 0x3a6   :  { %v1496_v9 = vrot.slane %v1495_v3, 4  ;;  %v1515_v44 = vadd.f32 %v1513_v13, %v1511_v14 }
 0x3a7   :  { %v1506_v23 = vadd.f32 %v1505_v29, %v1504_v30  ;;  %v1525_v41 = vrot.slane %v1524_v33, 2  ;;  %v1567_v29 = vperm.slane %v1565_v17, 0 }
 0x3a8   :  { %v1497_v51 = vadd.f32 %v1496_v9, %v1495_v3  ;;  %v1516_v21 = vrot.slane %v1515_v44, 4 }
 0x3a9   :  { %v1507_v46 = vrot.slane %v1506_v23, 1  ;;  %v1526_v49 = vadd.f32 %v1525_v41, %v1524_v33  ;;  %v1577_v41 = vperm.slane %v1575_v59, 0 }
 0x3aa   :  { %v1498_v63 = vrot.slane %v1497_v51, 2  ;;  %v1517_v19 = vadd.f32 %v1516_v21, %v1515_v44 }
 0x3ab   :  { %v1508_v31 = vadd.f32 %v1507_v46, %v1506_v23  ;;  %v1527_v62 = vrot.slane %v1526_v49, 1 }
 0x3ac   :  { %v1499_v28 = vadd.f32 %v1498_v63, %v1497_v51  ;;  %v1518_v57 = vrot.slane %v1517_v19, 2 }
 0x3ad   :  { %v1510_v52 = vmul.f32 %v1508_v31, %v3817_v34  ;;  %v1528_v8 = vadd.f32 %v1527_v62, %v1526_v49 }
 0x3ae   :  { %v1500_v45 = vrot.slane %v1499_v28, 1  ;;  %v1519_v60 = vadd.f32 %v1518_v57, %v1517_v19 }
 0x3af   :  { %v1530_v11 = vmul.f32 %v1528_v8, %v3817_v34  ;;  %v1532_v42 = vmul.f32 %v1510_v52, %v1510_v52  ;;  %v1536_v25 = vsub.f32 %v3928_v26, %v1510_v52 }
 0x3b0   :  { %v1501_v61 = vadd.f32 %v1500_v45, %v1499_v28  ;;  %v1520_v22 = vrot.slane %v1519_v60, 1 }
 0x3b1   :  { %v1534_v36 = vsub.f32 %v1530_v11, %v1532_v42 }
 0x3b2   :  { %v1509_v1 = vmul.f32 %v1501_v61, %v3817_v34  ;;  %v1521_v2 = vadd.f32 %v1520_v22, %v1519_v60 }
 0x3b3   :  { %v1540_v0 = vadd.f32 1e-05, %v1534_v36 }
 0x3b4   :  { %v1529_v4 = vmul.f32 %v1521_v2, %v3817_v34  ;;  %v1531_v6 = vmul.f32 %v1509_v1, %v1509_v1  ;;  %v1538_v34 = vsub.f32 %v3930_v58, %v1510_v52  ;;  %v1535_v26 = vsub.f32 %v3938_v47, %v1509_v1 }
 0x3b5   :  { %2496 = vrsqrt.f32 %v1540_v0  ;;  %vm1557_vm14 = vweird.f32 %v1540_v0  ;;  %v1537_v58 = vsub.f32 %v3940_v20, %v1509_v1 }
 0x3b6   :  { %v1533_v7 = vsub.f32 %v1529_v4, %v1531_v6 }
 0x3b8   :  { %v1539_v15 = vadd.f32 1e-05, %v1533_v7 }
 0x3ba   :  { %2498 = vrsqrt.f32 %v1539_v15  ;;  %vm1547_vm1 = vweird.f32 %v1539_v15 }
 0x3bb   :  { %v2497_v32 = vpop.eup %2496 }
 0x3bc   :  { %v1552_v43 = vmul.f32 %v2497_v32, %v1540_v0  ;;  %vm1558_vm13 = vweird.f32 %v2497_v32 }
 0x3bd   :  { %vm1559_vm15 = vmor %vm1557_vm14, %vm1558_vm13 }
 0x3be   :  { %v1553_v40 = vmul.f32 %v2497_v32, %v1552_v43 }
 0x3c0   :  { %v1554_v38 = vmul.f32 0.5, %v1553_v40  ;;  %v2499_v16 = vpop.eup %2498 }
 0x3c1   :  { %v1542_v56 = vmul.f32 %v2499_v16, %v1539_v15  ;;  %vm1548_vm0 = vweird.f32 %v2499_v16 }
 0x3c2   :  { %v1555_v24 = vsub.f32 1.5, %v1554_v38  ;;  %vm1549_vm2 = vmor %vm1547_vm1, %vm1548_vm0 }
 0x3c3   :  { %v1543_v48 = vmul.f32 %v2499_v16, %v1542_v56 }
 0x3c4   :  { %v1556_v54 = vmul.f32 %v2497_v32, %v1555_v24 }
 0x3c5   :  { %v1544_v18 = vmul.f32 0.5, %v1543_v48 }
 0x3c6   :  { %v1560_v35 = vsel %vm1559_vm15, %v2497_v32, %v1556_v54 }
 0x3c7   :  { %v1562_v55 = vmul.f32 %v1560_v35, %v1536_v25  ;;  %v1564_v10 = vmul.f32 %v1560_v35, %v1538_v34  ;;  %v1545_v50 = vsub.f32 1.5, %v1544_v18 }
 0x3c9   :  { %v1572_v5 = vmul.f32 %v1568_v27, %v1562_v55  ;;  %v1574_v53 = vmul.f32 %v1568_v27, %v1564_v10  ;;  %v1546_v12 = vmul.f32 %v2499_v16, %v1545_v50 }
 0x3cb   :  { %v1582_v39 = vadd.f32 %v1578_v37, %v1572_v5  ;;  %v1584_v30 = vadd.f32 %v1578_v37, %v1574_v53  ;;  %v1550_v13 = vsel %vm1549_vm2, %v2499_v16, %v1546_v12 }
 0x3cc   :  { %v1561_v14 = vmul.f32 %v1550_v13, %v1535_v26  ;;  %v1563_v23 = vmul.f32 %v1550_v13, %v1537_v58 }
 0x3cd   :  { %v3956_v33 = vmax.f32 %v1582_v39, 0.0  ;;  %v3958_v3 = vmax.f32 %v1584_v30, 0.0 }
 0x3ce   :  { %v1571_v9 = vmul.f32 %v1567_v29, %v1561_v14  ;;  %v1573_v44 = vmul.f32 %v1567_v29, %v1563_v23 }
 0x3d0   :  { %v1581_v46 = vadd.f32 %v1577_v41, %v1571_v9  ;;  %v1583_v49 = vadd.f32 %v1577_v41, %v1573_v44 }
 0x3d2   :  { %v3960_v51 = vmax.f32 %v1581_v46, 0.0  ;;  %v3962_v21 = vmax.f32 %v1583_v49, 0.0 }
 0x3d3   :  { %2784 = dma.done.wait [#allocation5], 28672 }
 0x3d4   :  { %2785 = vsyncadd [#allocation5], 4294938624  ;;  %v1697_v47 = vld [vmem:[#allocation3 + $0x348] sm:$0xff]  ;;  %v1690_v20 = vld [vmem:[#allocation3 + $0x310] sm:$0xff] }
 0x3d5   :  { %v1809_v31 = vld [vmem:[#allocation3 + $0x6c8] sm:$0xff]  ;;  %1832 = vmatpush.msra.mxu2 %v1697_v47  ;;  %v1802_v62 = vld [vmem:[#allocation3 + $0x690] sm:$0xff]  ;;  %v1683_v63 = vld [vmem:[#allocation3 + $0x2d8] sm:$0xff] }
 0x3d6   :  { %1855 = vmatpush.msra.mxu3 %v1809_v31  ;;  %v1795_v19 = vld [vmem:[#allocation3 + $0x658] sm:$0xff]  ;;  %v1676_v52 = vld [vmem:[#allocation3 + $0x2a0] sm:$0xff]  ;;  %v1669_v28 = vld [vmem:[#allocation3 + $0x268] sm:$0xff] }
 0x3d7   :  { %1833 = vmatpush.msra.mxu2 %v1690_v20  ;;  %v1788_v8 = vld [vmem:[#allocation3 + $0x620] sm:$0xff]  ;;  %v1781_v57 = vld [vmem:[#allocation3 + $0x5e8] sm:$0xff]  ;;  %v1662_v11 = vld [vmem:[#allocation3 + $0x230] sm:$0xff] }
 0x3d8   :  { %1856 = vmatpush.msra.mxu3 %v1802_v62  ;;  %v1774_v42 = vld [vmem:[#allocation3 + $0x5b0] sm:$0xff]  ;;  %v1691_v60 = vld [vmem:[#allocation3 + $0x318] sm:$0xff]  ;;  %v1684_v0 = vld [vmem:[#allocation3 + $0x2e0] sm:$0xff] }
 0x3d9   :  { %1834 = vmatpush.msra.mxu2 %v1683_v63  ;;  %v1698_v45 = vld [vmem:[#allocation3 + $0x350] sm:$0xff]  ;;  %v1655_v61 = vld [vmem:[#allocation3 + $0x1f8] sm:$0xff]  ;;  %v1648_v2 = vld [vmem:[#allocation3 + $0x1c0] sm:$0xff] }
 0x3da   :  { %1857 = vmatpush.msra.mxu3 %v1795_v19  ;;  %v1810_v36 = vld [vmem:[#allocation3 + $0x6d0] sm:$0xff]  ;;  %v1767_v22 = vld [vmem:[#allocation3 + $0x578] sm:$0xff]  ;;  %1878 = vmatpush.msrb.mxu0 %v1698_v45  ;;  %v1760_v4 = vld [vmem:[#allocation3 + $0x540] sm:$0xff] }
 0x3db   :  { %1835 = vmatpush.msra.mxu2 %v1676_v52  ;;  %1901 = vmatpush.msrb.mxu1 %v1810_v36  ;;  %v1803_v1 = vld [vmem:[#allocation3 + $0x698] sm:$0xff]  ;;  %v1796_v6 = vld [vmem:[#allocation3 + $0x660] sm:$0xff]  ;;  %v1677_v7 = vld [vmem:[#allocation3 + $0x2a8] sm:$0xff] }
 0x3dc   :  { %1858 = vmatpush.msra.mxu3 %v1788_v8  ;;  %1879 = vmatpush.msrb.mxu0 %v1691_v60  ;;  %v1789_v15 = vld [vmem:[#allocation3 + $0x628] sm:$0xff]  ;;  %v1670_v40 = vld [vmem:[#allocation3 + $0x270] sm:$0xff]  ;;  %v1663_v17 = vld [vmem:[#allocation3 + $0x238] sm:$0xff] }
 0x3dd   :  { %1836 = vmatpush.msra.mxu2 %v1669_v28  ;;  %1902 = vmatpush.msrb.mxu1 %v1803_v1  ;;  %v1641_v32 = vld [vmem:[#allocation3 + $0x188] sm:$0xff]  ;;  %v1782_v38 = vld [vmem:[#allocation3 + $0x5f0] sm:$0xff]  ;;  %v1775_v56 = vld [vmem:[#allocation3 + $0x5b8] sm:$0xff] }
 0x3de   :  { %1859 = vmatpush.msra.mxu3 %v1781_v57  ;;  %v1753_v43 = vld [vmem:[#allocation3 + $0x508] sm:$0xff]  ;;  %1880 = vmatpush.msrb.mxu0 %v1684_v0  ;;  %v1634_v16 = vld [vmem:[#allocation3 + $0x150] sm:$0xff]  ;;  %v1627_v54 = vld [vmem:[#allocation3 + $0x118] sm:$0xff] }
 0x3df   :  { %1837 = vmatpush.msra.mxu2 %v1662_v11  ;;  %1903 = vmatpush.msrb.mxu1 %v1796_v6  ;;  %v1746_v24 = vld [vmem:[#allocation3 + $0x4d0] sm:$0xff]  ;;  %v1739_v59 = vld [vmem:[#allocation3 + $0x498] sm:$0xff]  ;;  %v1656_v25 = vld [vmem:[#allocation3 + $0x200] sm:$0xff] }
 0x3e0   :  { %1860 = vmatpush.msra.mxu3 %v1774_v42  ;;  %1881 = vmatpush.msrb.mxu0 %v1677_v7  ;;  %v1768_v34 = vld [vmem:[#allocation3 + $0x580] sm:$0xff]  ;;  %v1649_v35 = vld [vmem:[#allocation3 + $0x1c8] sm:$0xff]  ;;  %v1642_v18 = vld [vmem:[#allocation3 + $0x190] sm:$0xff] }
 0x3e1   :  { %1838 = vmatpush.msra.mxu2 %v1655_v61  ;;  %1904 = vmatpush.msrb.mxu1 %v1789_v15  ;;  %v1620_v27 = vld [vmem:[#allocation3 + $0xe0] sm:$0xff]  ;;  %v1761_v55 = vld [vmem:[#allocation3 + $0x548] sm:$0xff]  ;;  %v1754_v5 = vld [vmem:[#allocation3 + $0x510] sm:$0xff] }
 0x3e2   :  { %1861 = vmatpush.msra.mxu3 %v1767_v22  ;;  %1882 = vmatpush.msrb.mxu0 %v1670_v40  ;;  %v1732_v48 = vld [vmem:[#allocation3 + $0x460] sm:$0xff]  ;;  %v1613_v10 = vld [vmem:[#allocation3 + $0xa8] sm:$0xff]  ;;  %v1606_v53 = vld [vmem:[#allocation3 + $0x70] sm:$0xff] }
 0x3e3   :  { %1839 = vmatpush.msra.mxu2 %v1648_v2  ;;  %1905 = vmatpush.msrb.mxu1 %v1782_v38  ;;  %v1725_v37 = vld [vmem:[#allocation3 + $0x428] sm:$0xff]  ;;  %v1718_v50 = vld [vmem:[#allocation3 + $0x3f0] sm:$0xff]  ;;  %v1635_v39 = vld [vmem:[#allocation3 + $0x158] sm:$0xff] }
 0x3e4   :  { %1862 = vmatpush.msra.mxu3 %v1760_v4  ;;  %1883 = vmatpush.msrb.mxu0 %v1663_v17  ;;  %v1747_v30 = vld [vmem:[#allocation3 + $0x4d8] sm:$0xff]  ;;  %v1628_v58 = vld [vmem:[#allocation3 + $0x120] sm:$0xff]  ;;  %v1621_v9 = vld [vmem:[#allocation3 + $0xe8] sm:$0xff] }
 0x3e5   :  { %1840 = vmatpush.msra.mxu2 %v1641_v32  ;;  %1906 = vmatpush.msrb.mxu1 %v1775_v56  ;;  %v1599_v12 = vld [vmem:[#allocation3 + $0x38] sm:$0xff]  ;;  %v1740_v29 = vld [vmem:[#allocation3 + $0x4a0] sm:$0xff]  ;;  %v1733_v44 = vld [vmem:[#allocation3 + $0x468] sm:$0xff] }
 0x3e6   :  { %1863 = vmatpush.msra.mxu3 %v1753_v43  ;;  %1884 = vmatpush.msrb.mxu0 %v1656_v25  ;;  %v1711_v26 = vld [vmem:[#allocation3 + $0x3b8] sm:$0xff]  ;;  %v1592_v13 = vld [vmem:[#allocation3] sm:$0xff]  ;;  %v1614_v47 = vld [vmem:[#allocation3 + $0xb0] sm:$0xff] }
 0x3e7   :  { %1841 = vmatpush.msra.mxu2 %v1634_v16  ;;  %1907 = vmatpush.msrb.mxu1 %v1768_v34  ;;  %v1704_v14 = vld [vmem:[#allocation3 + $0x380] sm:$0xff]  ;;  %v1699_v23 = vld [vmem:[#allocation3 + $0x358] sm:$0xff]  ;;  %v1685_v20 = vld [vmem:[#allocation3 + $0x2e8] sm:$0xff] }
 0x3e8   :  { %1864 = vmatpush.msra.mxu3 %v1746_v24  ;;  %1885 = vmatpush.msrb.mxu0 %v1649_v35  ;;  %v1811_v41 = vld [vmem:[#allocation3 + $0x6d8] sm:$0xff]  ;;  %v1692_v46 = vld [vmem:[#allocation3 + $0x320] sm:$0xff]  ;;  %v1797_v31 = vld [vmem:[#allocation3 + $0x668] sm:$0xff] }
 0x3e9   :  { %1842 = vmatpush.msra.mxu2 %v1627_v54  ;;  %1908 = vmatpush.msrb.mxu1 %v1761_v55  ;;  %v1804_v49 = vld [vmem:[#allocation3 + $0x6a0] sm:$0xff]  ;;  %v1607_v62 = vld [vmem:[#allocation3 + $0x78] sm:$0xff]  ;;  %v1726_v63 = vld [vmem:[#allocation3 + $0x430] sm:$0xff] }
 0x3ea   :  { %1865 = vmatpush.msra.mxu3 %v1739_v59  ;;  %1886 = vmatpush.msrb.mxu0 %v1642_v18  ;;  %v1678_v19 = vld [vmem:[#allocation3 + $0x2b0] sm:$0xff]  ;;  %v1600_v8 = vld [vmem:[#allocation3 + $0x40] sm:$0xff]  ;;  %v1671_v28 = vld [vmem:[#allocation3 + $0x278] sm:$0xff] }
 0x3eb   :  { %1843 = vmatpush.msra.mxu2 %v1620_v27  ;;  %1909 = vmatpush.msrb.mxu1 %v1754_v5  ;;  %v1790_v52 = vld [vmem:[#allocation3 + $0x630] sm:$0xff]  ;;  %v1783_v57 = vld [vmem:[#allocation3 + $0x5f8] sm:$0xff]  ;;  %v1593_v42 = vld [vmem:[#allocation3 + $0x8] sm:$0xff] }
 0x3ec   :  { %1866 = vmatpush.msra.mxu3 %v1732_v48  ;;  %1887 = vmatpush.msrb.mxu0 %v1635_v39  ;;  %v1719_v11 = vld [vmem:[#allocation3 + $0x3f8] sm:$0xff]  ;;  %v1664_v45 = vld [vmem:[#allocation3 + $0x240] sm:$0xff]  ;;  %v1657_v22 = vld [vmem:[#allocation3 + $0x208] sm:$0xff] }
 0x3ed   :  { %1844 = vmatpush.msra.mxu2 %v1613_v10  ;;  %1910 = vmatpush.msrb.mxu1 %v1747_v30  ;;  %v1776_v60 = vld [vmem:[#allocation3 + $0x5c0] sm:$0xff]  ;;  %v1769_v0 = vld [vmem:[#allocation3 + $0x588] sm:$0xff]  ;;  %v1650_v4 = vld [vmem:[#allocation3 + $0x1d0] sm:$0xff] }
 0x3ee   :  { %1867 = vmatpush.msra.mxu3 %v1725_v37  ;;  %1888 = vmatpush.msrb.mxu0 %v1628_v58  ;;  %v1712_v36 = vld [vmem:[#allocation3 + $0x3c0] sm:$0xff]  ;;  %v1705_v1 = vld [vmem:[#allocation3 + $0x388] sm:$0xff]  ;;  %v1762_v6 = vld [vmem:[#allocation3 + $0x550] sm:$0xff] }
 0x3ef   :  { %1845 = vmatpush.msra.mxu2 %v1606_v53  ;;  %1911 = vmatpush.msrb.mxu1 %v1740_v29  ;;  %v1700_v61 = vld [vmem:[#allocation3 + $0x360] sm:$0xff]  ;;  %v1693_v2 = vld [vmem:[#allocation3 + $0x328] sm:$0xff]  ;;  %v1686_v15 = vld [vmem:[#allocation3 + $0x2f0] sm:$0xff] }
 0x3f0   :  { %1868 = vmatpush.msra.mxu3 %v1718_v50  ;;  %1889 = vmatpush.msrb.mxu0 %v1621_v9  ;;  %v1812_v7 = vld [vmem:[#allocation3 + $0x6e0] sm:$0xff]  ;;  %v1643_v32 = vld [vmem:[#allocation3 + $0x198] sm:$0xff]  ;;  %v1805_v40 = vld [vmem:[#allocation3 + $0x6a8] sm:$0xff] }
 0x3f1   :  { %1846 = vmatpush.msra.mxu2 %v1599_v12  ;;  %1912 = vmatpush.msrb.mxu1 %v1733_v44  ;;  %v1755_v43 = vld [vmem:[#allocation3 + $0x518] sm:$0xff]  ;;  %v1636_v16 = vld [vmem:[#allocation3 + $0x160] sm:$0xff]  ;;  %v1798_v17 = vld [vmem:[#allocation3 + $0x670] sm:$0xff] }
 0x3f2   :  { %1869 = vmatpush.msra.mxu3 %v1711_v26  ;;  %1890 = vmatpush.msrb.mxu0 %v1614_v47  ;;  %v1679_v38 = vld [vmem:[#allocation3 + $0x2b8] sm:$0xff]  ;;  %v1748_v24 = vld [vmem:[#allocation3 + $0x4e0] sm:$0xff]  ;;  %v1629_v54 = vld [vmem:[#allocation3 + $0x128] sm:$0xff] }
 0x3f3   :  { %1847 = vmatpush.msra.mxu2 %v1592_v13  ;;  %1913 = vmatpush.msrb.mxu1 %v1726_v63  ;;  %v1672_v56 = vld [vmem:[#allocation3 + $0x280] sm:$0xff]  ;;  %v1741_v59 = vld [vmem:[#allocation3 + $0x4a8] sm:$0xff]  ;;  %v1791_v25 = vld [vmem:[#allocation3 + $0x638] sm:$0xff] }
 0x3f4   :  { %1870 = vmatpush.msra.mxu3 %v1704_v14  ;;  %1848 = vmatmul.f32.vlgmr.msra.gmra.mxu2 %v3960_v51  ;;  %v1665_v34 = vld [vmem:[#allocation3 + $0x248] sm:$0xff]  ;;  %v1622_v27 = vld [vmem:[#allocation3 + $0xf0] sm:$0xff]  ;;  %v1784_v35 = vld [vmem:[#allocation3 + $0x600] sm:$0xff] }
 0x3f5   :  { %1924 = vmatpush.msrb.mxu2 %v1699_v23  ;;  %1891 = vmatpush.msrb.mxu0 %v1607_v62  ;;  %v1734_v48 = vld [vmem:[#allocation3 + $0x470] sm:$0xff]  ;;  %v1615_v10 = vld [vmem:[#allocation3 + $0xb8] sm:$0xff]  ;;  %v1777_v18 = vld [vmem:[#allocation3 + $0x5c8] sm:$0xff] }
 0x3f6   :  { %1947 = vmatpush.msrb.mxu3 %v1811_v41  ;;  %1914 = vmatpush.msrb.mxu1 %v1719_v11  ;;  %v1658_v55 = vld [vmem:[#allocation3 + $0x210] sm:$0xff]  ;;  %v1727_v37 = vld [vmem:[#allocation3 + $0x438] sm:$0xff]  ;;  %v1608_v53 = vld [vmem:[#allocation3 + $0x80] sm:$0xff] }
 0x3f7   :  { %1925 = vmatpush.msrb.mxu2 %v1692_v46  ;;  %1871 = vmatmul.f32.vlgmr.msra.gmra.mxu3 %v3956_v33  ;;  %v1651_v5 = vld [vmem:[#allocation3 + $0x1d8] sm:$0xff]  ;;  %v1720_v50 = vld [vmem:[#allocation3 + $0x400] sm:$0xff]  ;;  %v1770_v39 = vld [vmem:[#allocation3 + $0x590] sm:$0xff] }
 0x3f8   :  { %1948 = vmatpush.msrb.mxu3 %v1804_v49  ;;  %1892 = vmatpush.msrb.mxu0 %v1600_v8  ;;  %v1601_v30 = vld [vmem:[#allocation3 + $0x48] sm:$0xff]  ;;  %v1644_v26 = vld [vmem:[#allocation3 + $0x1a0] sm:$0xff]  ;;  %v1763_v58 = vld [vmem:[#allocation3 + $0x558] sm:$0xff] }
 0x3f9   :  { %1926 = vmatpush.msrb.mxu2 %v1685_v20  ;;  %1915 = vmatpush.msrb.mxu1 %v1712_v36  ;;  %v1713_v12 = vld [vmem:[#allocation3 + $0x3c8] sm:$0xff]  ;;  %v1594_v29 = vld [vmem:[#allocation3 + $0x10] sm:$0xff]  ;;  %v1756_v46 = vld [vmem:[#allocation3 + $0x520] sm:$0xff] }
 0x3fa   :  { %1949 = vmatpush.msrb.mxu3 %v1797_v31  ;;  %1893 = vmatpush.msrb.mxu0 %v1593_v42  ;;  %v1706_v13 = vld [vmem:[#allocation3 + $0x390] sm:$0xff]  ;;  %v1701_v14 = vld [vmem:[#allocation3 + $0x368] sm:$0xff]  ;;  %v1687_v47 = vld [vmem:[#allocation3 + $0x2f8] sm:$0xff] }
 0x3fb   :  { %1927 = vmatpush.msrb.mxu2 %v1678_v19  ;;  %1916 = vmatpush.msrb.mxu1 %v1705_v1  ;;  %v1813_v23 = vld [vmem:[#allocation3 + $0x6e8] sm:$0xff]  ;;  %v1694_v9 = vld [vmem:[#allocation3 + $0x330] sm:$0xff]  ;;  %v1799_v20 = vld [vmem:[#allocation3 + $0x678] sm:$0xff] }
 0x3fc   :  { %1950 = vmatpush.msrb.mxu3 %v1790_v52  ;;  %1970 = vmatpush.msra.mxu0 %v1700_v61  ;;  %v1637_v41 = vld [vmem:[#allocation3 + $0x168] sm:$0xff]  ;;  %v1806_v44 = vld [vmem:[#allocation3 + $0x6b0] sm:$0xff]  ;;  %v1623_v62 = vld [vmem:[#allocation3 + $0xf8] sm:$0xff] }
 0x3fd   :  { %1928 = vmatpush.msrb.mxu2 %v1671_v28  ;;  %1993 = vmatpush.msra.mxu1 %v1812_v7  ;;  %v1630_v49 = vld [vmem:[#allocation3 + $0x130] sm:$0xff]  ;;  %v1749_v31 = vld [vmem:[#allocation3 + $0x4e8] sm:$0xff]  ;;  %v1680_v63 = vld [vmem:[#allocation3 + $0x2c0] sm:$0xff] }
 0x3fe   :  { %1951 = vmatpush.msrb.mxu3 %v1783_v57  ;;  %1971 = vmatpush.msra.mxu0 %v1693_v2  ;;  %v1792_v19 = vld [vmem:[#allocation3 + $0x640] sm:$0xff]  ;;  %v1742_v52 = vld [vmem:[#allocation3 + $0x4b0] sm:$0xff]  ;;  %v1673_v8 = vld [vmem:[#allocation3 + $0x288] sm:$0xff] }
 0x3ff   :  { %1929 = vmatpush.msrb.mxu2 %v1664_v45  ;;  %1994 = vmatpush.msra.mxu1 %v1805_v40  ;;  %v1785_v28 = vld [vmem:[#allocation3 + $0x608] sm:$0xff]  ;;  %v1616_v57 = vld [vmem:[#allocation3 + $0xc0] sm:$0xff]  ;;  %v1735_v11 = vld [vmem:[#allocation3 + $0x478] sm:$0xff] }
 0x400   :  { %1952 = vmatpush.msrb.mxu3 %v1776_v60  ;;  %1972 = vmatpush.msra.mxu0 %v1686_v15  ;;  %v1666_v42 = vld [vmem:[#allocation3 + $0x250] sm:$0xff]  ;;  %v1609_v60 = vld [vmem:[#allocation3 + $0x88] sm:$0xff]  ;;  %v1659_v36 = vld [vmem:[#allocation3 + $0x218] sm:$0xff] }
 0x401   :  { %1930 = vmatpush.msrb.mxu2 %v1657_v22  ;;  %1995 = vmatpush.msra.mxu1 %v1798_v17  ;;  %v1778_v45 = vld [vmem:[#allocation3 + $0x5d0] sm:$0xff]  ;;  %v1771_v61 = vld [vmem:[#allocation3 + $0x598] sm:$0xff]  ;;  %v1728_v22 = vld [vmem:[#allocation3 + $0x440] sm:$0xff] }
 0x402   :  { %1953 = vmatpush.msrb.mxu3 %v1769_v0  ;;  %1973 = vmatpush.msra.mxu0 %v1679_v38  ;;  %v1602_v0 = vld [vmem:[#allocation3 + $0x50] sm:$0xff]  ;;  %v1652_v1 = vld [vmem:[#allocation3 + $0x1e0] sm:$0xff]  ;;  %v1757_v7 = vld [vmem:[#allocation3 + $0x528] sm:$0xff] }
 0x403   :  { %1931 = vmatpush.msrb.mxu2 %v1650_v4  ;;  %1996 = vmatpush.msra.mxu1 %v1791_v25  ;;  %v1764_v2 = vld [vmem:[#allocation3 + $0x560] sm:$0xff]  ;;  %v1721_v4 = vld [vmem:[#allocation3 + $0x408] sm:$0xff]  ;;  %v1595_v15 = vld [vmem:[#allocation3 + $0x18] sm:$0xff] }
 0x404   :  { %1954 = vmatpush.msrb.mxu3 %v1762_v6  ;;  %1974 = vmatpush.msra.mxu0 %v1672_v56  ;;  %v1645_v6 = vld [vmem:[#allocation3 + $0x1a8] sm:$0xff]  ;;  %v1750_v40 = vld [vmem:[#allocation3 + $0x4f0] sm:$0xff]  ;;  %v1707_v17 = vld [vmem:[#allocation3 + $0x398] sm:$0xff] }
 0x405   :  { %1932 = vmatpush.msrb.mxu2 %v1643_v32  ;;  %1997 = vmatpush.msra.mxu1 %v1784_v35  ;;  %v1714_v32 = vld [vmem:[#allocation3 + $0x3d0] sm:$0xff]  ;;  %v1624_v56 = vld [vmem:[#allocation3 + $0x100] sm:$0xff] }
 0x406   :  { %1955 = vmatpush.msrb.mxu3 %v1755_v43  ;;  %1975 = vmatpush.msra.mxu0 %v1665_v34  ;;  %v1638_v43 = vld [vmem:[#allocation3 + $0x170] sm:$0xff]  ;;  %v1617_v34 = vld [vmem:[#allocation3 + $0xc8] sm:$0xff] }
 0x407   :  { %1933 = vmatpush.msrb.mxu2 %v1636_v16  ;;  %1998 = vmatpush.msra.mxu1 %v1777_v18  ;;  %v1702_v38 = vld [vmem:[#allocation3 + $0x370] sm:$0xff]  ;;  %v1631_v16 = vld [vmem:[#allocation3 + $0x138] sm:$0xff] }
 0x408   :  { %1956 = vmatpush.msrb.mxu3 %v1748_v24  ;;  %1976 = vmatpush.msra.mxu0 %v1658_v55  ;;  %v1743_v24 = vld [vmem:[#allocation3 + $0x4b8] sm:$0xff]  ;;  %v1814_v25 = vld [vmem:[#allocation3 + $0x6f0] sm:$0xff] }
 0x409   :  { %1934 = vmatpush.msrb.mxu2 %v1629_v54  ;;  %1999 = vmatpush.msra.mxu1 %v1770_v39  ;;  %v1736_v54 = vld [vmem:[#allocation3 + $0x480] sm:$0xff]  ;;  %v1610_v35 = vld [vmem:[#allocation3 + $0x90] sm:$0xff]  ;;  %v1603_v18 = vld [vmem:[#allocation3 + $0x58] sm:$0xff] }
 0x40a   :  { %1957 = vmatpush.msrb.mxu3 %v1741_v59  ;;  %1977 = vmatpush.msra.mxu0 %v1651_v5  ;;  %v1695_v59 = vld [vmem:[#allocation3 + $0x338] sm:$0xff]  ;;  %v1722_v55 = vld [vmem:[#allocation3 + $0x410] sm:$0xff]  ;;  %v1708_v39 = vld [vmem:[#allocation3 + $0x3a0] sm:$0xff] }
 0x40b   :  { %1935 = vmatpush.msrb.mxu2 %v1622_v27  ;;  %2000 = vmatpush.msra.mxu1 %v1763_v58  ;;  %v1729_v27 = vld [vmem:[#allocation3 + $0x448] sm:$0xff]  ;;  %v1715_v5 = vld [vmem:[#allocation3 + $0x3d8] sm:$0xff]  ;;  %v1696_v58 = vld [vmem:[#allocation3 + $0x340] sm:$0xff] }
 0x40c   :  { %1958 = vmatpush.msrb.mxu3 %v1734_v48  ;;  %1851 = vmatmul.f32.gmra.mxu2 %v3962_v21  ;;  %v1688_v48 = vld [vmem:[#allocation3 + $0x300] sm:$0xff] }
 0x40d   :  { %1936 = vmatpush.msrb.mxu2 %v1615_v10  ;;  %1978 = vmatpush.msra.mxu0 %v1644_v26  ;;  %v1807_v10 = vld [vmem:[#allocation3 + $0x6b8] sm:$0xff]  ;;  %v1793_v26 = vld [vmem:[#allocation3 + $0x648] sm:$0xff] }
 0x40e   :  { %1959 = vmatpush.msrb.mxu3 %v1727_v37  ;;  %2001 = vmatpush.msra.mxu1 %v1756_v46  ;;  %v1681_v37 = vld [vmem:[#allocation3 + $0x2c8] sm:$0xff]  ;;  %v1682_v46 = vld [vmem:[#allocation3 + $0x2d0] sm:$0xff] }
 0x40f   :  { %1937 = vmatpush.msrb.mxu2 %v1608_v53  ;;  %1874 = vmatmul.f32.gmra.mxu3 %v3958_v3  ;;  %v1800_v53 = vld [vmem:[#allocation3 + $0x680] sm:$0xff] }
 0x410   :  { %1960 = vmatpush.msrb.mxu3 %v1720_v50  ;;  %1979 = vmatpush.msra.mxu0 %v1637_v41  ;;  %v1596_v50 = vld [vmem:[#allocation3 + $0x20] sm:$0xff] }
 0x411   :  { %1938 = vmatpush.msrb.mxu2 %v1601_v30  ;;  %2002 = vmatpush.msra.mxu1 %v1749_v31  ;;  %v1703_v30 = vld [vmem:[#allocation3 + $0x378] sm:$0xff]  ;;  %v1808_v41 = vld [vmem:[#allocation3 + $0x6c0] sm:$0xff] }
 0x412   :  { %1961 = vmatpush.msrb.mxu3 %v1713_v12  ;;  %1980 = vmatpush.msra.mxu0 %v1630_v49  ;;  %v1674_v12 = vld [vmem:[#allocation3 + $0x290] sm:$0xff]  ;;  %v1801_v49 = vld [vmem:[#allocation3 + $0x688] sm:$0xff]  ;;  %v1675_v31 = vld [vmem:[#allocation3 + $0x298] sm:$0xff] }
 0x413   :  { %1939 = vmatpush.msrb.mxu2 %v1594_v29  ;;  %2003 = vmatpush.msra.mxu1 %v1742_v52  ;;  %v1815_v29 = vld [vmem:[#allocation3 + $0x6f8] sm:$0xff]  ;;  %v1668_v52 = vld [vmem:[#allocation3 + $0x260] sm:$0xff] }
 0x414   :  { %1962 = vmatpush.msrb.mxu3 %v1706_v13  ;;  %1981 = vmatpush.msra.mxu0 %v1623_v62  ;;  %v1667_v13 = vld [vmem:[#allocation3 + $0x258] sm:$0xff]  ;;  %v1794_v62 = vld [vmem:[#allocation3 + $0x650] sm:$0xff] }
 0x415   :  { %2016 = vmatpush.msra.mxu2 %v1701_v14  ;;  %2004 = vmatpush.msra.mxu1 %v1735_v11  ;;  %v1786_v14 = vld [vmem:[#allocation3 + $0x610] sm:$0xff]  ;;  %v1661_v11 = vld [vmem:[#allocation3 + $0x228] sm:$0xff] }
 0x416   :  { %2039 = vmatpush.msra.mxu3 %v1813_v23  ;;  %1940 = vmatmul.f32.vlgmr.msrb.gmra.mxu2 %v3960_v51  ;;  %v1689_v23 = vld [vmem:[#allocation3 + $0x308] sm:$0xff] }
 0x417   :  { %2017 = vmatpush.msra.mxu2 %v1694_v9  ;;  %1982 = vmatpush.msra.mxu0 %v1616_v57  ;;  %v1660_v9 = vld [vmem:[#allocation3 + $0x220] sm:$0xff]  ;;  %v1758_v57 = vld [vmem:[#allocation3 + $0x530] sm:$0xff] }
 0x418   :  { %2040 = vmatpush.msra.mxu3 %v1806_v44  ;;  %2005 = vmatpush.msra.mxu1 %v1728_v22  ;;  %v1779_v44 = vld [vmem:[#allocation3 + $0x5d8] sm:$0xff]  ;;  %v1625_v22 = vld [vmem:[#allocation3 + $0x108] sm:$0xff] }
 0x419   :  { %2018 = vmatpush.msra.mxu2 %v1687_v47  ;;  %1963 = vmatmul.f32.vlgmr.msrb.gmra.mxu3 %v3956_v33  ;;  %v1653_v47 = vld [vmem:[#allocation3 + $0x1e8] sm:$0xff] }
 0x41a   :  { %2041 = vmatpush.msra.mxu3 %v1799_v20  ;;  %1983 = vmatpush.msra.mxu0 %v1609_v60  ;;  %v1772_v20 = vld [vmem:[#allocation3 + $0x5a0] sm:$0xff]  ;;  %v1751_v60 = vld [vmem:[#allocation3 + $0x4f8] sm:$0xff] }
 0x41b   :  { %2019 = vmatpush.msra.mxu2 %v1680_v63  ;;  %2006 = vmatpush.msra.mxu1 %v1721_v4  ;;  %v1646_v63 = vld [vmem:[#allocation3 + $0x1b0] sm:$0xff] }
 0x41c   :  { %2042 = vmatpush.msra.mxu3 %v1792_v19  ;;  %1984 = vmatpush.msra.mxu0 %v1602_v0  ;;  %v1765_v19 = vld [vmem:[#allocation3 + $0x568] sm:$0xff]  ;;  %v1744_v0 = vld [vmem:[#allocation3 + $0x4c0] sm:$0xff]  ;;  %v1618_v4 = vld [vmem:[#allocation3 + $0xd0] sm:$0xff] }
 0x41d   :  { %2020 = vmatpush.msra.mxu2 %v1673_v8  ;;  %1894 = vmatmul.f32.vlgmr.msrb.gmra.mxu0 %v3960_v51  ;;  %v1787_v8 = vld [vmem:[#allocation3 + $0x618] sm:$0xff] }
 0x41e   :  { %2043 = vmatpush.msra.mxu3 %v1785_v28  ;;  %1985 = vmatpush.msra.mxu0 %v1595_v15  ;;  %v1639_v28 = vld [vmem:[#allocation3 + $0x178] sm:$0xff] }
 0x41f   :  { %2021 = vmatpush.msra.mxu2 %v1666_v42  ;;  %2007 = vmatpush.msra.mxu1 %v1714_v32  ;;  %v1780_v42 = vld [vmem:[#allocation3 + $0x5e0] sm:$0xff]  ;;  %v1759_v15 = vld [vmem:[#allocation3 + $0x538] sm:$0xff] }
 0x420   :  { %2044 = vmatpush.msra.mxu3 %v1778_v45  ;;  %2062 = vmatpush.msrb.mxu0 %v1702_v38  ;;  %v1632_v45 = vld [vmem:[#allocation3 + $0x140] sm:$0xff]  ;;  %v1611_v32 = vld [vmem:[#allocation3 + $0x98] sm:$0xff] }
 0x421   :  { %2022 = vmatpush.msra.mxu2 %v1659_v36  ;;  %1917 = vmatmul.f32.vlgmr.msrb.gmra.mxu1 %v3956_v33  ;;  %v1654_v36 = vld [vmem:[#allocation3 + $0x1f0] sm:$0xff]  ;;  %v1752_v38 = vld [vmem:[#allocation3 + $0x500] sm:$0xff] }
 0x422   :  { %2045 = vmatpush.msra.mxu3 %v1771_v61  ;;  %1943 = vmatmul.f32.gmra.mxu2 %v3962_v21  ;;  %v1773_v61 = vld [vmem:[#allocation3 + $0x5a8] sm:$0xff] }
 0x423   :  { %2023 = vmatpush.msra.mxu2 %v1652_v1  ;;  %2008 = vmatpush.msra.mxu1 %v1707_v17  ;;  %v1647_v1 = vld [vmem:[#allocation3 + $0x1b8] sm:$0xff]  ;;  %v1626_v17 = vld [vmem:[#allocation3 + $0x110] sm:$0xff] }
 0x424   :  { %2046 = vmatpush.msra.mxu3 %v1764_v2  ;;  %2063 = vmatpush.msrb.mxu0 %v1695_v59  ;;  %v1766_v2 = vld [vmem:[#allocation3 + $0x570] sm:$0xff]  ;;  %v1716_v59 = vld [vmem:[#allocation3 + $0x3e0] sm:$0xff] }
 0x425   :  { %2024 = vmatpush.msra.mxu2 %v1645_v6  ;;  %2085 = vmatpush.msrb.mxu1 %v1814_v25  ;;  %v1737_v6 = vld [vmem:[#allocation3 + $0x488] sm:$0xff]  ;;  %v1619_v25 = vld [vmem:[#allocation3 + $0xd8] sm:$0xff] }
 0x426   :  { %2047 = vmatpush.msra.mxu3 %v1757_v7  ;;  %2064 = vmatpush.msrb.mxu0 %v1688_v48  ;;  %v1640_v7 = vld [vmem:[#allocation3 + $0x180] sm:$0xff] }
 0x427   :  { %2025 = vmatpush.msra.mxu2 %v1638_v43  ;;  %1966 = vmatmul.f32.gmra.mxu3 %v3958_v3  ;;  %v1730_v43 = vld [vmem:[#allocation3 + $0x450] sm:$0xff]  ;;  %v1612_v48 = vld [vmem:[#allocation3 + $0xa0] sm:$0xff] }
 0x428   :  { %2048 = vmatpush.msra.mxu3 %v1750_v40  ;;  %2086 = vmatpush.msrb.mxu1 %v1807_v10  ;;  %v1633_v40 = vld [vmem:[#allocation3 + $0x148] sm:$0xff]  ;;  %v1724_v10 = vld [vmem:[#allocation3 + $0x420] sm:$0xff] }
 0x429   :  { %2026 = vmatpush.msra.mxu2 %v1631_v16  ;;  %2065 = vmatpush.msrb.mxu0 %v1681_v37  ;;  %v1604_v16 = vld [vmem:[#allocation3 + $0x60] sm:$0xff]  ;;  %v1598_v37 = vld [vmem:[#allocation3 + $0x30] sm:$0xff] }
 0x42a   :  { %2049 = vmatpush.msra.mxu3 %v1743_v24  ;;  %2087 = vmatpush.msrb.mxu1 %v1800_v53  ;;  %v1723_v24 = vld [vmem:[#allocation3 + $0x418] sm:$0xff]  ;;  %v3995_v53 = vld [vmem:[%s4138_s18] sm:$0xff] }
 0x42b   :  { %2027 = vmatpush.msra.mxu2 %v1624_v56  ;;  %1897 = vmatmul.f32.gmra.mxu0 %v3962_v21  ;;  %v1745_v56 = vld [vmem:[#allocation3 + $0x4c8] sm:$0xff] }
 0x42c   :  { %2050 = vmatpush.msra.mxu3 %v1736_v54  ;;  %2066 = vmatpush.msrb.mxu0 %v1674_v12  ;;  %v1597_v54 = vld [vmem:[#allocation3 + $0x28] sm:$0xff] }
 0x42d   :  { %2028 = vmatpush.msra.mxu2 %v1617_v34  ;;  %2088 = vmatpush.msrb.mxu1 %v1793_v26  ;;  %v1738_v34 = vld [vmem:[#allocation3 + $0x490] sm:$0xff] }
 0x42e   :  { %2051 = vmatpush.msra.mxu3 %v1729_v27  ;;  %1920 = vmatmul.f32.gmra.mxu1 %v3958_v3  ;;  %v1709_v27 = vld [vmem:[#allocation3 + $0x3a8] sm:$0xff] }
 0x42f   :  { %2029 = vmatpush.msra.mxu2 %v1610_v35  ;;  %2067 = vmatpush.msrb.mxu0 %v1667_v13  ;;  %v1731_v35 = vld [vmem:[#allocation3 + $0x458] sm:$0xff] }
 0x430   :  { %2052 = vmatpush.msra.mxu3 %v1722_v55  ;;  %2089 = vmatpush.msrb.mxu1 %v1786_v14  ;;  %v1605_v55 = vld [vmem:[#allocation3 + $0x68] sm:$0xff] }
 0x431   :  { %2030 = vmatpush.msra.mxu2 %v1603_v18  ;;  %2068 = vmatpush.msrb.mxu0 %v1660_v9  ;;  %v1717_v18 = vld [vmem:[#allocation3 + $0x3e8] sm:$0xff] }
 0x432   :  { %2053 = vmatpush.msra.mxu3 %v1715_v5  ;;  %2090 = vmatpush.msrb.mxu1 %v1779_v44  ;;  %v1710_v5 = vld [vmem:[#allocation3 + $0x3b0] sm:$0xff] }
 0x433   :  { %2031 = vmatpush.msra.mxu2 %v1596_v50  ;;  %2069 = vmatpush.msrb.mxu0 %v1653_v47  ;;  %v1818_v50 = vperm.slane %v3995_v53, 0 }
 0x434   :  { %2054 = vmatpush.msra.mxu3 %v1708_v39  ;;  %2032 = vmatmul.f32.vlgmr.msra.gmra.mxu2 %v3960_v51 }
 0x435   :  { %2108 = vmatpush.msrb.mxu2 %v1703_v30  ;;  %2055 = vmatmul.f32.vlgmr.msra.gmra.mxu3 %v3956_v33 }
 0x436   :  { %2131 = vmatpush.msrb.mxu3 %v1815_v29  ;;  %2091 = vmatpush.msrb.mxu1 %v1772_v20 }
 0x437   :  { %2109 = vmatpush.msrb.mxu2 %v1696_v58  ;;  %1986 = vmatmul.f32.vlgmr.msra.gmra.mxu0 %v3960_v51 }
 0x438   :  { %2132 = vmatpush.msrb.mxu3 %v1808_v41  ;;  %2070 = vmatpush.msrb.mxu0 %v1646_v63 }
 0x439   :  { %2110 = vmatpush.msrb.mxu2 %v1689_v23  ;;  %2092 = vmatpush.msrb.mxu1 %v1765_v19  ;;  %v1819_v19 = vperm.slane %v3995_v53, 1 }
 0x43a   :  { %2133 = vmatpush.msrb.mxu3 %v1801_v49  ;;  %2009 = vmatmul.f32.vlgmr.msra.gmra.mxu1 %v3956_v33 }
 0x43b   :  { %2111 = vmatpush.msrb.mxu2 %v1682_v46  ;;  %2071 = vmatpush.msrb.mxu0 %v1639_v28 }
 0x43c   :  { %2134 = vmatpush.msrb.mxu3 %v1794_v62  ;;  %2035 = vmatmul.f32.gmra.mxu2 %v3962_v21 }
 0x43d   :  { %2112 = vmatpush.msrb.mxu2 %v1675_v31  ;;  %2093 = vmatpush.msrb.mxu1 %v1758_v57  ;;  %v1820_v31 = vperm.slane %v3995_v53, 2 }
 0x43e   :  { %2135 = vmatpush.msrb.mxu3 %v1787_v8  ;;  %2072 = vmatpush.msrb.mxu0 %v1632_v45 }
 0x43f   :  { %2113 = vmatpush.msrb.mxu2 %v1668_v52  ;;  %2058 = vmatmul.f32.gmra.mxu3 %v3958_v3 }
 0x440   :  { %2136 = vmatpush.msrb.mxu3 %v1780_v42  ;;  %2094 = vmatpush.msrb.mxu1 %v1751_v60 }
 0x441   :  { %2114 = vmatpush.msrb.mxu2 %v1661_v11  ;;  %2073 = vmatpush.msrb.mxu0 %v1625_v22 }
 0x442   :  { %2137 = vmatpush.msrb.mxu3 %v1773_v61  ;;  %2095 = vmatpush.msrb.mxu1 %v1744_v0 }
 0x443   :  { %2115 = vmatpush.msrb.mxu2 %v1654_v36  ;;  %1989 = vmatmul.f32.gmra.mxu0 %v3962_v21 }
 0x444   :  { %2138 = vmatpush.msrb.mxu3 %v1766_v2  ;;  %2074 = vmatpush.msrb.mxu0 %v1618_v4 }
 0x445   :  { %2116 = vmatpush.msrb.mxu2 %v1647_v1  ;;  %2096 = vmatpush.msrb.mxu1 %v1737_v6 }
 0x446   :  { %2012 = vmatmul.f32.gmra.mxu1 %v3958_v3  ;;  %2139 = vmatpush.msrb.mxu3 %v1759_v15 }
 0x447   :  { %2117 = vmatpush.msrb.mxu2 %v1640_v7  ;;  %2075 = vmatpush.msrb.mxu0 %v1611_v32 }
 0x448   :  { %2097 = vmatpush.msrb.mxu1 %v1730_v43  ;;  %2140 = vmatpush.msrb.mxu3 %v1752_v38 }
 0x449   :  { %2118 = vmatpush.msrb.mxu2 %v1633_v40  ;;  %2076 = vmatpush.msrb.mxu0 %v1604_v16 }
 0x44a   :  { %2098 = vmatpush.msrb.mxu1 %v1723_v24  ;;  %2141 = vmatpush.msrb.mxu3 %v1745_v56 }
 0x44b   :  { %2119 = vmatpush.msrb.mxu2 %v1626_v17  ;;  %2077 = vmatpush.msrb.mxu0 %v1597_v54 }
 0x44c   :  { %2099 = vmatpush.msrb.mxu1 %v1716_v59  ;;  %2078 = vmatmul.f32.vlgmr.msrb.gmra.mxu0 %v3960_v51 }
 0x44d   :  { %2120 = vmatpush.msrb.mxu2 %v1619_v25  ;;  %2142 = vmatpush.msrb.mxu3 %v1738_v34 }
 0x44e   :  { %2100 = vmatpush.msrb.mxu1 %v1709_v27 }
 0x44f   :  { %2101 = vmatmul.f32.vlgmr.msrb.gmra.mxu1 %v3956_v33  ;;  %2121 = vmatpush.msrb.mxu2 %v1612_v48 }
 0x450   :  { %2143 = vmatpush.msrb.mxu3 %v1731_v35 }
 0x451   :  { %2122 = vmatpush.msrb.mxu2 %v1605_v55  ;;  %v1822_v55 = vperm.slane %v3995_v53, 4 }
 0x452   :  { %2144 = vmatpush.msrb.mxu3 %v1724_v10 }
 0x453   :  { %2123 = vmatpush.msrb.mxu2 %v1598_v37 }
 0x454   :  { %2145 = vmatpush.msrb.mxu3 %v1717_v18  ;;  %2124 = vmatmul.f32.vlgmr.msrb.gmra.mxu2 %v3960_v51 }
 0x455   :  { %2081 = vmatmul.f32.gmra.mxu0 %v3962_v21 }
 0x456   :  { %2146 = vmatpush.msrb.mxu3 %v1710_v5 }
 0x457   :  { %2147 = vmatmul.f32.vlgmr.msrb.gmra.mxu3 %v3956_v33  ;;  %2104 = vmatmul.f32.gmra.mxu1 %v3958_v3 }
 0x45c   :  { %2127 = vmatmul.f32.gmra.mxu2 %v3962_v21 }
 0x45f   :  { %2150 = vmatmul.f32.gmra.mxu3 %v3958_v3 }
 0x477   :  { %v1849_v39 = vpop.f32.mrf.mxu2 }
 0x478   :  { %v1850_v51 = vadd.f32 %v1849_v39, %v1818_v50 }
 0x47a   :  { %v1872_v30 = vpop.f32.mrf.mxu3 }
 0x47b   :  { %v1873_v12 = vadd.f32 %v1872_v30, %v1850_v51 }
 0x47d   :  { %v2460_v26 = vmul.f32 -1.442695, %v1873_v12 }
 0x47f   :  { %2500 = vpow2.f32 %v2460_v26 }
 0x485   :  { %v2501_v33 = vpop.eup %2500 }
 0x486   :  { %v2196_v58 = vadd.f32 1.0, %v2501_v33 }
 0x488   :  { %2502 = vrcp.f32 %v2196_v58  ;;  %v2221_v3 = vand.u32 2147483648, %v2196_v58  ;;  %vm2215_vm3 = vweird.f32 %v2196_v58  ;;  %v2219_v41 = vand.u32 2147483647, %v2196_v58 }
 0x48a   :  { %v2222_v46 = vor.u32 1.1754944e-38, %v2221_v3  ;;  %vm2220_vm6 = vcmp.eq.f32.partialorder %v2219_v41, 8.507059e+37 }
 0x48e   :  { %v2503_v29 = vpop.eup %2502 }
 0x48f   :  { %v1852_v21 = vpop.f32.mrf.mxu2  ;;  %v2211_v13 = vmul.f32 %v2503_v29, %v2196_v58  ;;  %vm2216_vm4 = vweird.f32 %v2503_v29 }
 0x490   :  { %v1853_v14 = vadd.f32 %v1852_v21, %v1818_v50  ;;  %vm2217_vm5 = vmor %vm2215_vm3, %vm2216_vm4  ;;  %v1821_v50 = vperm.slane %v3995_v53, 3 }
 0x491   :  { %v2212_v23 = vsub.f32 1.0, %v2211_v13 }
 0x492   :  { %v1875_v44 = vpop.f32.mrf.mxu3 }
 0x493   :  { %v2213_v9 = vmul.f32 %v2503_v29, %v2212_v23  ;;  %v1876_v49 = vadd.f32 %v1875_v44, %v1853_v14 }
 0x495   :  { %v2214_v47 = vadd.f32 %v2503_v29, %v2213_v9  ;;  %v2467_v20 = vmul.f32 -1.442695, %v1876_v49 }
 0x497   :  { %v2218_v62 = vsel %vm2217_vm5, %v2503_v29, %v2214_v47  ;;  %2504 = vpow2.f32 %v2467_v20 }
 0x498   :  { %v2223_v63 = vsel %vm2220_vm6, %v2222_v46, %v2218_v62 }
 0x499   :  { %2420 = vst [vmem:[%s4139_s19] sm:$0xff] %v2223_v63  ;;  %v1941_v52 = vpop.f32.mrf.mxu2 }
 0x49a   :  { %v1942_v8 = vadd.f32 %v1941_v52, %v1820_v31  ;;  %v1895_v28 = vpop.f32.mrf.mxu0 }
 0x49b   :  { %v1896_v57 = vadd.f32 %v1895_v28, %v1819_v19 }
 0x49c   :  { %v1964_v11 = vpop.f32.mrf.mxu3 }
 0x49d   :  { %v2505_v42 = vpop.eup %2504  ;;  %v1965_v45 = vadd.f32 %v1964_v11, %v1942_v8 }
 0x49e   :  { %v2203_v60 = vadd.f32 1.0, %v2505_v42  ;;  %v1918_v36 = vpop.f32.mrf.mxu1 }
 0x49f   :  { %v1919_v61 = vadd.f32 %v1918_v36, %v1896_v57  ;;  %v2462_v22 = vmul.f32 -1.442695, %v1965_v45 }
 0x4a0   :  { %2506 = vrcp.f32 %v2203_v60  ;;  %vm2320_vm7 = vweird.f32 %v2203_v60  ;;  %v2326_v15 = vand.u32 2147483648, %v2203_v60  ;;  %v2324_v16 = vand.u32 2147483647, %v2203_v60 }
 0x4a1   :  { %v2461_v0 = vmul.f32 -1.442695, %v1919_v61  ;;  %2508 = vpow2.f32 %v2462_v22 }
 0x4a2   :  { %v2327_v25 = vor.u32 1.1754944e-38, %v2326_v15  ;;  %vm2325_vm10 = vcmp.eq.f32.partialorder %v2324_v16, 8.507059e+37 }
 0x4a3   :  { %2510 = vpow2.f32 %v2461_v0 }
 0x4a5   :  { %v1944_v2 = vpop.f32.mrf.mxu2 }
 0x4a6   :  { %v2507_v1 = vpop.eup %2506  ;;  %v1945_v7 = vadd.f32 %v1944_v2, %v1820_v31 }
 0x4a7   :  { %v2509_v4 = vpop.eup %2508  ;;  %v2316_v6 = vmul.f32 %v2507_v1, %v2203_v60  ;;  %vm2321_vm8 = vweird.f32 %v2507_v1 }
 0x4a8   :  { %v2198_v32 = vadd.f32 1.0, %v2509_v4  ;;  %v1898_v43 = vpop.f32.mrf.mxu0  ;;  %vm2322_vm9 = vmor %vm2320_vm7, %vm2321_vm8 }
 0x4a9   :  { %v2511_v40 = vpop.eup %2510  ;;  %v2317_v38 = vsub.f32 1.0, %v2316_v6  ;;  %v1899_v24 = vadd.f32 %v1898_v43, %v1819_v19 }
 0x4aa   :  { %v2197_v17 = vadd.f32 1.0, %v2511_v40  ;;  %2512 = vrcp.f32 %v2198_v32  ;;  %v1967_v56 = vpop.f32.mrf.mxu3  ;;  %vm2245_vm11 = vweird.f32 %v2198_v32  ;;  %v2251_v12 = vand.u32 2147483648, %v2198_v32 }
 0x4ab   :  { %v2318_v54 = vmul.f32 %v2507_v1, %v2317_v38  ;;  %v1968_v59 = vadd.f32 %v1967_v56, %v1945_v7  ;;  %v1921_v34 = vpop.f32.mrf.mxu1  ;;  %v2249_v29 = vand.u32 2147483647, %v2198_v32 }
 0x4ac   :  { %2514 = vrcp.f32 %v2197_v17  ;;  %v1922_v48 = vadd.f32 %v1921_v34, %v1899_v24  ;;  %vm2230_vm13 = vweird.f32 %v2197_v17  ;;  %v2234_v13 = vand.u32 2147483647, %v2197_v17 }
 0x4ad   :  { %v2319_v27 = vadd.f32 %v2507_v1, %v2318_v54  ;;  %v2469_v35 = vmul.f32 -1.442695, %v1968_v59  ;;  %v2236_v3 = vand.u32 2147483648, %v2197_v17  ;;  %v2252_v47 = vor.u32 1.1754944e-38, %v2251_v12 }
 0x4ae   :  { %v2468_v37 = vmul.f32 -1.442695, %v1922_v48  ;;  %vm2250_vm0 = vcmp.eq.f32.partialorder %v2249_v29, 8.507059e+37  ;;  %vm2235_vm2 = vcmp.eq.f32.partialorder %v2234_v13, 8.507059e+37 }
 0x4af   :  { %v2323_v10 = vsel %vm2322_vm9, %v2507_v1, %v2319_v27  ;;  %2516 = vpow2.f32 %v2469_v35  ;;  %v2237_v52 = vor.u32 1.1754944e-38, %v2236_v3 }
 0x4b0   :  { %v2513_v18 = vpop.eup %2512  ;;  %v2328_v5 = vsel %vm2325_vm10, %v2327_v25, %v2323_v10  ;;  %2518 = vpow2.f32 %v2468_v37  ;;  %v1823_v10 = vperm.slane %v3995_v53, 5 }
 0x4b1   :  { %2427 = vst [vmem:[%s4139_s19 + $0x38] sm:$0xff] %v2328_v5  ;;  %v2241_v39 = vmul.f32 %v2513_v18, %v2198_v32  ;;  %vm2246_vm12 = vweird.f32 %v2513_v18 }
 0x4b2   :  { %v2515_v30 = vpop.eup %2514  ;;  %vm4009_vm15 = vmor %vm2245_vm11, %vm2246_vm12 }
 0x4b3   :  { %v2226_v33 = vmul.f32 %v2515_v30, %v2197_v17  ;;  %v2242_v58 = vsub.f32 1.0, %v2241_v39  ;;  %vm2231_vm14 = vweird.f32 %v2515_v30 }
 0x4b4   :  { %v1987_v21 = vpop.f32.mrf.mxu0  ;;  %vm2232_vm1 = vmor %vm2230_vm13, %vm2231_vm14 }
 0x4b5   :  { %v1988_v14 = vadd.f32 %v1987_v21, %v1821_v50  ;;  %v2227_v41 = vsub.f32 1.0, %v2226_v33  ;;  %v2243_v9 = vmul.f32 %v2513_v18, %v2242_v58  ;;  %v2517_v46 = vpop.eup %2516 }
 0x4b6   :  { %v2519_v31 = vpop.eup %2518  ;;  %v2205_v19 = vadd.f32 1.0, %v2517_v46 }
 0x4b7   :  { %v2033_v51 = vpop.f32.mrf.mxu2  ;;  %v2010_v20 = vpop.f32.mrf.mxu1  ;;  %v2228_v62 = vmul.f32 %v2515_v30, %v2227_v41  ;;  %v2244_v63 = vadd.f32 %v2513_v18, %v2243_v9  ;;  %v2204_v8 = vadd.f32 1.0, %v2519_v31 }
 0x4b8   :  { %v2034_v26 = vadd.f32 %v2033_v51, %v1822_v55  ;;  %v2056_v23 = vpop.f32.mrf.mxu3  ;;  %v2011_v28 = vadd.f32 %v2010_v20, %v1988_v14  ;;  %2520 = vrcp.f32 %v2205_v19  ;;  %vm2350_vm3 = vweird.f32 %v2205_v19 }
 0x4b9   :  { %v2229_v11 = vadd.f32 %v2515_v30, %v2228_v62  ;;  %v2248_v42 = vsel %vm4009_vm15, %v2513_v18, %v2244_v63  ;;  %2522 = vrcp.f32 %v2204_v8  ;;  %vm2335_vm4 = vweird.f32 %v2204_v8 }
 0x4ba   :  { %v2057_v44 = vadd.f32 %v2056_v23, %v2034_v26  ;;  %v2253_v45 = vsel %vm2250_vm0, %v2252_v47, %v2248_v42  ;;  %v2463_v22 = vmul.f32 -1.442695, %v2011_v28  ;;  %v2339_v32 = vand.u32 2147483647, %v2204_v8 }
 0x4bb   :  { %v2233_v60 = vsel %vm2232_vm1, %v2515_v30, %v2229_v11  ;;  %2422 = vst [vmem:[%s4139_s19 + $0x10] sm:$0xff] %v2253_v45  ;;  %v2341_v43 = vand.u32 2147483648, %v2204_v8  ;;  %v2356_v24 = vand.u32 2147483648, %v2205_v19  ;;  %v2354_v25 = vand.u32 2147483647, %v2205_v19 }
 0x4bc   :  { %v2464_v57 = vmul.f32 -1.442695, %v2057_v44  ;;  %v2238_v61 = vsel %vm2235_vm2, %v2237_v52, %v2233_v60  ;;  %vm2340_vm10 = vcmp.eq.f32.partialorder %v2339_v32, 8.507059e+37 }
 0x4bd   :  { %2421 = vst [vmem:[%s4139_s19 + $0x8] sm:$0xff] %v2238_v61  ;;  %v2357_v5 = vor.u32 1.1754944e-38, %v2356_v24  ;;  %v2342_v51 = vor.u32 1.1754944e-38, %v2341_v43  ;;  %vm2355_vm9 = vcmp.eq.f32.partialorder %v2354_v25, 8.507059e+37 }
 0x4be   :  { %2524 = vpow2.f32 %v2464_v57  ;;  %v2521_v6 = vpop.eup %2520  ;;  %v1824_v57 = vperm.slane %v3995_v53, 6 }
 0x4bf   :  { %v2036_v36 = vpop.f32.mrf.mxu2  ;;  %2526 = vpow2.f32 %v2463_v22  ;;  %v2523_v15 = vpop.eup %2522  ;;  %v2346_v40 = vmul.f32 %v2521_v6, %v2205_v19  ;;  %vm2351_vm6 = vweird.f32 %v2521_v6 }
 0x4c0   :  { %v1990_v0 = vpop.f32.mrf.mxu0  ;;  %v2037_v1 = vadd.f32 %v2036_v36, %v1822_v55  ;;  %v2331_v16 = vmul.f32 %v2523_v15, %v2204_v8  ;;  %vm2336_vm5 = vweird.f32 %v2523_v15  ;;  %vm4024_vm7 = vmor %vm2350_vm3, %vm2351_vm6 }
 0x4c1   :  { %v1991_v2 = vadd.f32 %v1990_v0, %v1821_v50  ;;  %v2347_v59 = vsub.f32 1.0, %v2346_v40  ;;  %vm4030_vm8 = vmor %vm2335_vm4, %vm2336_vm5 }
 0x4c2   :  { %v2059_v4 = vpop.f32.mrf.mxu3  ;;  %v2332_v34 = vsub.f32 1.0, %v2331_v16 }
 0x4c3   :  { %v2060_v7 = vadd.f32 %v2059_v4, %v2037_v1  ;;  %v2013_v38 = vpop.f32.mrf.mxu1  ;;  %v2348_v55 = vmul.f32 %v2521_v6, %v2347_v59 }
 0x4c4   :  { %v2014_v17 = vadd.f32 %v2013_v38, %v1991_v2  ;;  %v2525_v54 = vpop.eup %2524  ;;  %v2333_v37 = vmul.f32 %v2523_v15, %v2332_v34 }
 0x4c5   :  { %v2471_v56 = vmul.f32 -1.442695, %v2060_v7  ;;  %v2200_v27 = vadd.f32 1.0, %v2525_v54  ;;  %v2527_v35 = vpop.eup %2526  ;;  %v2349_v30 = vadd.f32 %v2521_v6, %v2348_v55 }
 0x4c6   :  { %v2470_v48 = vmul.f32 -1.442695, %v2014_v17  ;;  %v2199_v50 = vadd.f32 1.0, %v2527_v35  ;;  %v2334_v26 = vadd.f32 %v2523_v15, %v2333_v37 }
 0x4c7   :  { %2528 = vpow2.f32 %v2471_v56  ;;  %v2353_v33 = vsel %vm4024_vm7, %v2521_v6, %v2349_v30  ;;  %vm2275_vm11 = vweird.f32 %v2200_v27  ;;  %v2279_v49 = vand.u32 2147483647, %v2200_v27 }
 0x4c8   :  { %2530 = vrcp.f32 %v2200_v27  ;;  %v2338_v21 = vsel %vm4030_vm8, %v2523_v15, %v2334_v26  ;;  %v2358_v13 = vsel %vm2355_vm9, %v2357_v5, %v2353_v33  ;;  %v2264_v20 = vand.u32 2147483647, %v2199_v50 }
 0x4c9   :  { %2532 = vpow2.f32 %v2470_v48  ;;  %v2079_v12 = vpop.f32.mrf.mxu0  ;;  %v2343_v14 = vsel %vm2340_vm10, %v2342_v51, %v2338_v21  ;;  %2429 = vst [vmem:[%s4139_s19 + $0x48] sm:$0xff] %v2358_v13  ;;  %v2281_v31 = vand.u32 2147483648, %v2200_v27  ;;  %v2266_v52 = vand.u32 2147483648, %v2199_v50 }
 0x4ca   :  { %2534 = vrcp.f32 %v2199_v50  ;;  %v2080_v3 = vadd.f32 %v2079_v12, %v1823_v10  ;;  %2428 = vst [vmem:[%s4139_s19 + $0x40] sm:$0xff] %v2343_v14  ;;  %vm2260_vm13 = vweird.f32 %v2199_v50  ;;  %vm4051_vm15 = vcmp.eq.f32.partialorder %v2279_v49, 8.507059e+37 }
 0x4cb   :  { %vm4055_vm0 = vcmp.eq.f32.partialorder %v2264_v20, 8.507059e+37  ;;  %v2282_v22 = vor.u32 1.1754944e-38, %v2281_v31  ;;  %v2267_v2 = vor.u32 1.1754944e-38, %v2266_v52 }
 0x4cc   :  { %v2102_v58 = vpop.f32.mrf.mxu1 }
 0x4cd   :  { %v2529_v29 = vpop.eup %2528  ;;  %v2103_v9 = vadd.f32 %v2102_v58, %v2080_v3 }
 0x4ce   :  { %v4041_v23 = vadd.f32 1.0, %v2529_v29  ;;  %v2531_v41 = vpop.eup %2530 }
 0x4cf   :  { %v2533_v44 = vpop.eup %2532  ;;  %v2271_v46 = vmul.f32 %v2531_v41, %v2200_v27  ;;  %v2465_v63 = vmul.f32 -1.442695, %v2103_v9  ;;  %vm2276_vm12 = vweird.f32 %v2531_v41 }
 0x4d0   :  { %2536 = vrcp.f32 %v4041_v23  ;;  %v2535_v47 = vpop.eup %2534  ;;  %v4047_v62 = vadd.f32 1.0, %v2533_v44  ;;  %vm4060_vm1 = vmor %vm2275_vm11, %vm2276_vm12  ;;  %vm2380_vm2 = vweird.f32 %v4041_v23  ;;  %v2384_v15 = vand.u32 2147483647, %v4041_v23 }
 0x4d1   :  { %v2256_v19 = vmul.f32 %v2535_v47, %v2199_v50  ;;  %v2272_v8 = vsub.f32 1.0, %v2271_v46  ;;  %vm2261_vm14 = vweird.f32 %v2535_v47  ;;  %v2386_v32 = vand.u32 2147483648, %v4041_v23 }
 0x4d2   :  { %v2082_v28 = vpop.f32.mrf.mxu0  ;;  %2538 = vrcp.f32 %v4047_v62  ;;  %vm4066_vm3 = vmor %vm2260_vm13, %vm2261_vm14  ;;  %vm2365_vm4 = vweird.f32 %v4047_v62  ;;  %v2369_v27 = vand.u32 2147483647, %v4047_v62  ;;  %v2371_v48 = vand.u32 2147483648, %v4047_v62 }
 0x4d3   :  { %v2257_v11 = vsub.f32 1.0, %v2256_v19  ;;  %v2273_v42 = vmul.f32 %v2531_v41, %v2272_v8  ;;  %2540 = vpow2.f32 %v2465_v63  ;;  %v2083_v53 = vadd.f32 %v2082_v28, %v1823_v10 }
 0x4d4   :  { %v2105_v60 = vpop.f32.mrf.mxu1  ;;  %v2387_v39 = vor.u32 1.1754944e-38, %v2386_v32  ;;  %vm2385_vm8 = vcmp.eq.f32.partialorder %v2384_v15, 8.507059e+37  ;;  %v2372_v33 = vor.u32 1.1754944e-38, %v2371_v48  ;;  %vm2370_vm10 = vcmp.eq.f32.partialorder %v2369_v27, 8.507059e+37 }
 0x4d5   :  { %v2258_v1 = vmul.f32 %v2535_v47, %v2257_v11  ;;  %v2274_v4 = vadd.f32 %v2531_v41, %v2273_v42  ;;  %v2106_v43 = vadd.f32 %v2105_v60, %v2083_v53 }
 0x4d6   :  { %v2537_v0 = vpop.eup %2536 }
 0x4d7   :  { %v2376_v7 = vmul.f32 %v2537_v0, %v4041_v23  ;;  %v2125_v40 = vpop.f32.mrf.mxu2  ;;  %v2259_v38 = vadd.f32 %v2535_v47, %v2258_v1  ;;  %v2278_v16 = vsel %vm4060_vm1, %v2531_v41, %v2274_v4  ;;  %vm2381_vm5 = vweird.f32 %v2537_v0 }
 0x4d8   :  { %v2126_v24 = vadd.f32 %v2125_v40, %v1824_v57  ;;  %v2539_v17 = vpop.eup %2538  ;;  %v2283_v56 = vsel %vm4051_vm15, %v2282_v22, %v2278_v16  ;;  %v2472_v59 = vmul.f32 -1.442695, %v2106_v43  ;;  %vm4094_vm7 = vmor %vm2380_vm2, %vm2381_vm5 }
 0x4d9   :  { %v2377_v54 = vsub.f32 1.0, %v2376_v7  ;;  %v2263_v25 = vsel %vm4066_vm3, %v2535_v47, %v2259_v38  ;;  %2424 = vst [vmem:[%s4139_s19 + $0x20] sm:$0xff] %v2283_v56  ;;  %v2361_v34 = vmul.f32 %v2539_v17, %v4047_v62  ;;  %v2541_v55 = vpop.eup %2540  ;;  %vm2366_vm6 = vweird.f32 %v2539_v17 }
 0x4da   :  { %v2148_v35 = vpop.f32.mrf.mxu3  ;;  %v2268_v10 = vsel %vm4055_vm0, %v2267_v2, %v2263_v25  ;;  %2542 = vpow2.f32 %v2472_v59  ;;  %v2201_v51 = vadd.f32 1.0, %v2541_v55  ;;  %vm2367_vm9 = vmor %vm2365_vm4, %vm2366_vm6 }
 0x4db   :  { %v2378_v37 = vmul.f32 %v2537_v0, %v2377_v54  ;;  %v2149_v18 = vadd.f32 %v2148_v35, %v2126_v24  ;;  %2423 = vst [vmem:[%s4139_s19 + $0x18] sm:$0xff] %v2268_v10  ;;  %v2362_v5 = vsub.f32 1.0, %v2361_v34 }
 0x4dc   :  { %2544 = vrcp.f32 %v2201_v51  ;;  %vm2290_vm11 = vweird.f32 %v2201_v51  ;;  %v2296_v62 = vand.u32 2147483648, %v2201_v51  ;;  %v2294_v52 = vand.u32 2147483647, %v2201_v51 }
 0x4dd   :  { %v2379_v30 = vadd.f32 %v2537_v0, %v2378_v37  ;;  %v2466_v12 = vmul.f32 -1.442695, %v2149_v18  ;;  %v2363_v26 = vmul.f32 %v2539_v17, %v2362_v5 }
 0x4de   :  { %vm2295_vm14 = vcmp.eq.f32.partialorder %v2294_v52, 8.507059e+37 }
 0x4df   :  { %v2383_v58 = vsel %vm4094_vm7, %v2537_v0, %v2379_v30  ;;  %2546 = vpow2.f32 %v2466_v12  ;;  %v2128_v29 = vpop.f32.mrf.mxu2  ;;  %v2364_v21 = vadd.f32 %v2539_v17, %v2363_v26 }
 0x4e0   :  { %v2388_v13 = vsel %vm2385_vm8, %v2387_v39, %v2383_v58  ;;  %v2129_v3 = vadd.f32 %v2128_v29, %v1824_v57  ;;  %v2543_v14 = vpop.eup %2542  ;;  %v2297_v57 = vor.u32 1.1754944e-38, %v2296_v62 }
 0x4e1   :  { %2431 = vst [vmem:[%s4139_s19 + $0x58] sm:$0xff] %v2388_v13  ;;  %v2368_v23 = vsel %vm2367_vm9, %v2539_v17, %v2364_v21  ;;  %v2208_v41 = vadd.f32 1.0, %v2543_v14 }
 0x4e2   :  { %v2151_v9 = vpop.f32.mrf.mxu3  ;;  %v2373_v44 = vsel %vm2370_vm10, %v2372_v33, %v2368_v23  ;;  %v2545_v49 = vpop.eup %2544 }
 0x4e3   :  { %v2152_v46 = vadd.f32 %v2151_v9, %v2129_v3  ;;  %2430 = vst [vmem:[%s4139_s19 + $0x50] sm:$0xff] %v2373_v44  ;;  %2548 = vrcp.f32 %v2208_v41  ;;  %v2286_v20 = vmul.f32 %v2545_v49, %v2201_v51  ;;  %vm2291_vm12 = vweird.f32 %v2545_v49 }
 0x4e4   :  { %vm2292_vm13 = vmor %vm2290_vm11, %vm2291_vm12  ;;  %vm2395_vm15 = vweird.f32 %v2208_v41  ;;  %v2401_v45 = vand.u32 2147483648, %v2208_v41  ;;  %v2399_v22 = vand.u32 2147483647, %v2208_v41 }
 0x4e5   :  { %v2547_v47 = vpop.eup %2546  ;;  %v2473_v31 = vmul.f32 -1.442695, %v2152_v46  ;;  %v2287_v19 = vsub.f32 1.0, %v2286_v20 }
 0x4e6   :  { %v2202_v63 = vadd.f32 1.0, %v2547_v47  ;;  %v2402_v6 = vor.u32 1.1754944e-38, %v2401_v45  ;;  %vm2400_vm2 = vcmp.eq.f32.partialorder %v2399_v22, 8.507059e+37 }
 0x4e7   :  { %2550 = vpow2.f32 %v2473_v31  ;;  %v2288_v8 = vmul.f32 %v2545_v49, %v2287_v19 }
 0x4e8   :  { %2552 = vrcp.f32 %v2202_v63  ;;  %v2311_v32 = vand.u32 2147483648, %v2202_v63  ;;  %v2309_v38 = vand.u32 2147483647, %v2202_v63  ;;  %vm2305_vm4 = vweird.f32 %v2202_v63 }
 0x4e9   :  { %v2549_v28 = vpop.eup %2548  ;;  %v2289_v11 = vadd.f32 %v2545_v49, %v2288_v8 }
 0x4ea   :  { %v2391_v42 = vmul.f32 %v2549_v28, %v2208_v41  ;;  %vm2396_vm0 = vweird.f32 %v2549_v28  ;;  %v2312_v56 = vor.u32 1.1754944e-38, %v2311_v32  ;;  %vm2310_vm6 = vcmp.eq.f32.partialorder %v2309_v38, 8.507059e+37 }
 0x4eb   :  { %v2293_v36 = vsel %vm2292_vm13, %v2545_v49, %v2289_v11  ;;  %vm2397_vm1 = vmor %vm2395_vm15, %vm2396_vm0 }
 0x4ec   :  { %v2392_v61 = vsub.f32 1.0, %v2391_v42  ;;  %v2298_v0 = vsel %vm2295_vm14, %v2297_v57, %v2293_v36 }
 0x4ed   :  { %v2551_v60 = vpop.eup %2550  ;;  %2425 = vst [vmem:[%s4139_s19 + $0x28] sm:$0xff] %v2298_v0 }
 0x4ee   :  { %v2553_v53 = vpop.eup %2552  ;;  %v2209_v1 = vadd.f32 1.0, %v2551_v60  ;;  %v2393_v2 = vmul.f32 %v2549_v28, %v2392_v61 }
 0x4ef   :  { %v2301_v4 = vmul.f32 %v2553_v53, %v2202_v63  ;;  %vm2306_vm3 = vweird.f32 %v2553_v53 }
 0x4f0   :  { %2554 = vrcp.f32 %v2209_v1  ;;  %v2394_v7 = vadd.f32 %v2549_v28, %v2393_v2  ;;  %vm2307_vm5 = vmor %vm2305_vm4, %vm2306_vm3  ;;  %v2416_v27 = vand.u32 2147483648, %v2209_v1  ;;  %v2414_v35 = vand.u32 2147483647, %v2209_v1 }
 0x4f1   :  { %v2302_v15 = vsub.f32 1.0, %v2301_v4  ;;  %vm2410_vm8 = vweird.f32 %v2209_v1 }
 0x4f2   :  { %v2398_v43 = vsel %vm2397_vm1, %v2549_v28, %v2394_v7  ;;  %v2417_v10 = vor.u32 1.1754944e-38, %v2416_v27  ;;  %vm2415_vm10 = vcmp.eq.f32.partialorder %v2414_v35, 8.507059e+37 }
 0x4f3   :  { %v2303_v40 = vmul.f32 %v2553_v53, %v2302_v15  ;;  %v2403_v16 = vsel %vm2400_vm2, %v2402_v6, %v2398_v43 }
 0x4f4   :  { %2432 = vst [vmem:[%s4139_s19 + $0x60] sm:$0xff] %v2403_v16 }
 0x4f5   :  { %v2304_v24 = vadd.f32 %v2553_v53, %v2303_v40 }
 0x4f6   :  { %v2555_v17 = vpop.eup %2554 }
 0x4f7   :  { %v2308_v54 = vsel %vm2307_vm5, %v2553_v53, %v2304_v24  ;;  %v2406_v59 = vmul.f32 %v2555_v17, %v2209_v1  ;;  %vm2411_vm7 = vweird.f32 %v2555_v17 }
 0x4f8   :  { %v2313_v25 = vsel %vm2310_vm6, %v2312_v56, %v2308_v54  ;;  %vm2412_vm9 = vmor %vm2410_vm8, %vm2411_vm7 }
 0x4f9   :  { %2426 = vst [vmem:[%s4139_s19 + $0x30] sm:$0xff] %v2313_v25  ;;  %v2407_v34 = vsub.f32 1.0, %v2406_v59 }
 0x4fb   :  { %v2408_v48 = vmul.f32 %v2555_v17, %v2407_v34 }
 0x4fd   :  { %v2409_v55 = vadd.f32 %v2555_v17, %v2408_v48 }
 0x4ff   :  { %v2413_v37 = vsel %vm2412_vm9, %v2555_v17, %v2409_v55 }
 0x500   :  { %v2418_v18 = vsel %vm2415_vm10, %v2417_v10, %v2413_v37 }
 0x501   :  { %2433 = vst [vmem:[%s4139_s19 + $0x68] sm:$0xff] %v2418_v18 }
 0x502   :  { %2438 = vsyncpa [#allocation7], 1 }
 0x503   :  { %2439 = vsyncpa [#allocation9], 1 }
 0x504   :  { %2440 = vsyncpa [#allocation12], 1 }
 0x505   :  { %2441 = vsyncmov [#allocation4] }
 0x508   :  { %s2442_s10 = vpop.sfrf %2441 }
 0x509   :  { %p2474_p0 = scmp.ne.s32.totalorder %s2442_s10, 0 }
 0x50b   :  { %2446 = shalt.err (%p2474_p0)  }
 0x50c   :  { %2448 = vsyncmov [#allocation4 + $0x1] }
 0x50f   :  { %s2449_s17 = vpop.sfrf %2448 }
 0x510   :  { %p2475_p1 = scmp.ne.s32.totalorder %s2449_s17, 0 }
 0x512   :  { %2453 = shalt.err (%p2475_p1)  }
 0x513   :  { %2454 = vsyncmov [#allocation5] }
 0x516   :  { %s2455_s18 = vpop.sfrf %2454 }
 0x517   :  { %p2476_p2 = scmp.ne.s32.totalorder %s2455_s18, 0 }
 0x519   :  { %2459 = shalt.err (%p2476_p2)  }

</bundles_post_ra>
